<compile_context>
chip_gen: v5e
topology: v5e:2x2
jax: 0.10.0
libtpu: 0.0.40
codegen_flags: <defaults>
</compile_context>

<pallas_src>
import jax
import jax.numpy as jnp
import numpy as np
from jax.experimental import pallas as pl
from jax.experimental.pallas import tpu as pltpu

KERNEL_SIZE = 7
PAD = (KERNEL_SIZE - 1) // 2


def _make_kernel(H, W, block_n):
    K, P = KERNEL_SIZE, PAD
    HW = H * W

    def kernel(w_ref, b_ref, x_ref, o_ref):
        # w_ref:  SMEM (2*K*K,) flattened conv weight, layout [in_ch, kh, kw]
        # b_ref:  SMEM (1,)     conv bias
        # x_ref:  VMEM (block_n, C, HW) lane-dense batch block
        # o_ref:  VMEM (block_n, C, HW) output block
        bias = b_ref[0]
        wv = [w_ref[i] for i in range(2 * K * K)]           # scalar SMEM reads

        # Row / column index of each flattened spatial position (once per grid
        # step; f32 divide + floor avoids vector integer div/mod).
        lane = jax.lax.broadcasted_iota(jnp.int32, (1, HW), 1)
        row = jnp.floor((lane.astype(jnp.float32) + 0.5) / float(W)).astype(jnp.int32)
        col = lane - row * W

        # Static "same"-padding validity masks for each kernel offset.
        row_ok = [(row + (di - P) >= 0) & (row + (di - P) < H) for di in range(K)]
        col_ok = [(col + (dj - P) >= 0) & (col + (dj - P) < W) for dj in range(K)]

        # Channel (sublane) reductions for the whole batch block at once.
        xb = x_ref[...]                                      # (block_n, C, HW)
        avg = jnp.mean(xb, axis=1, dtype=jnp.float32)        # (block_n, HW)
        mx = jnp.max(xb, axis=1).astype(jnp.float32)         # (block_n, HW)

        # 2-in / 1-out 7x7 "same" conv in flattened coordinates:
        #   out[p] += w[c,di,dj] * plane_c[p + (di-P)*W + (dj-P)]  (0 if OOB)
        # One roll per plane per offset; avg+max share one validity select.
        acc = jnp.full((block_n, HW), bias, dtype=jnp.float32)
        for di in range(K):
            r_ok = row_ok[di]
            off_row = (di - P) * W
            for dj in range(K):
                off = off_row + (dj - P)
                m = r_ok & col_ok[dj]                        # (1, HW) bool
                w_avg = wv[di * K + dj]
                w_max = wv[K * K + di * K + dj]
                a_sh = jnp.roll(avg, -off, axis=1) if off else avg
                m_sh = jnp.roll(mx, -off, axis=1) if off else mx
                acc = acc + jnp.where(m, w_avg * a_sh + w_max * m_sh, 0.0)

        attn = jax.nn.sigmoid(acc).astype(o_ref.dtype)       # (block_n, HW)

        # Fresh read of x for the bulk multiply; broadcast attention over the
        # channel (sublane) axis in the input dtype.
        o_ref[...] = (x_ref[...] * attn[:, None, :]).astype(o_ref.dtype)

    return kernel


def _pick_block_n(N, C, HW, itemsize):
    """Largest divisor of N that fits the VMEM budget, keeping >=2 grid steps."""
    budget = 24 * 1024 * 1024                   # double-buffered in+out blocks
    per_n = 4 * C * HW * itemsize               # (in + out) * 2 buffers
    cap = max(1, min(8, budget // max(per_n, 1)))
    divisors = [d for d in range(1, N + 1) if N % d == 0 and d <= cap]
    multi = [d for d in divisors if N // d >= 2]   # keep both v7x TCs busy
    return max(multi) if multi else max(divisors)


@jax.jit
def spatial_attention(x, conv_w, conv_b):
    """x: (N, C, H, W); conv_w: (1, 2, K, K); conv_b: (1,)"""
    N, C, H, W = x.shape
    HW = H * W
    itemsize = jnp.dtype(x.dtype).itemsize

    x_flat = x.reshape(N, C, HW)                        # lane-dense view
    w_flat = conv_w.reshape(-1).astype(jnp.float32)     # (2*K*K,)
    b_flat = conv_b.reshape(-1).astype(jnp.float32)     # (1,)

    block_n = _pick_block_n(N, C, HW, itemsize)
    grid = (N // block_n,)

    block_bytes = 4 * block_n * C * HW * itemsize       # double-buffered in+out
    vmem_limit = int(min(56 * 2**20, max(32 * 2**20, block_bytes + (4 << 20))))

    cost = pl.CostEstimate(
        flops=int(N * HW * (3 * C + 6 * KERNEL_SIZE * KERNEL_SIZE)),
        transcendentals=int(N * HW),
        bytes_accessed=int(2 * N * C * HW * itemsize + (2 * KERNEL_SIZE**2 + 1) * 4),
    )

    out_flat = pl.pallas_call(
        _make_kernel(H, W, block_n),
        out_shape=jax.ShapeDtypeStruct((N, C, HW), x.dtype),
        grid_spec=pltpu.PrefetchScalarGridSpec(
            num_scalar_prefetch=0,
            grid=grid,
            in_specs=[
                pl.BlockSpec(memory_space=pltpu.SMEM),                 # weights
                pl.BlockSpec(memory_space=pltpu.SMEM),                 # bias
                pl.BlockSpec((block_n, C, HW), lambda n: (n, 0, 0)),   # x
            ],
            out_specs=pl.BlockSpec((block_n, C, HW), lambda n: (n, 0, 0)),
        ),
        compiler_params=pltpu.CompilerParams(
            dimension_semantics=("parallel",),
            vmem_limit_bytes=vmem_limit,
        ),
        cost_estimate=cost,
    )(w_flat, b_flat, x_flat)

    return out_flat.reshape(N, C, H, W)


def _reference(x, conv_w, conv_b):
    """Pure-JAX reference matching the PyTorch forward."""
    avg = jnp.mean(x, axis=1, keepdims=True)
    mx = jnp.max(x, axis=1, keepdims=True)
    concat = jnp.concatenate([avg, mx], axis=1)           # (N, 2, H, W)
    out = jax.lax.conv_general_dilated(
        concat, conv_w,
        window_strides=(1, 1),
        padding=[(PAD, PAD), (PAD, PAD)],
        dimension_numbers=("NCHW", "OIHW", "NCHW"),
    ) + conv_b.reshape(1, -1, 1, 1)
    return x * jax.nn.sigmoid(out)


if __name__ == "__main__":
    key = jax.random.PRNGKey(0)
    kx, kw, kb = jax.random.split(key, 3)

    N, C, H, W = 2, 4, 16, 16
    x = jax.random.normal(kx, (N, C, H, W), dtype=jnp.float32)

    # Deterministic parameter init (Conv2d(2, 1, 7, padding=3) shapes).
    fan_in = 2 * KERNEL_SIZE * KERNEL_SIZE
    bound = 1.0 / np.sqrt(fan_in)
    conv_w = jax.random.uniform(kw, (1, 2, KERNEL_SIZE, KERNEL_SIZE),
                                minval=-bound, maxval=bound, dtype=jnp.float32)
    conv_b = jax.random.uniform(kb, (1,), minval=-bound, maxval=bound,
                                dtype=jnp.float32)

    out = spatial_attention(x, conv_w, conv_b)
    out = jax.block_until_ready(out)

    ref = _reference(x, conv_w, conv_b)
    np.testing.assert_allclose(np.asarray(out), np.asarray(ref),
                               rtol=1e-5, atol=1e-5)
    print("KERNEL_OK")
</pallas_src>

<mosaic_0001>
module attributes {stable_mosaic.version = 11 : i64} {
  func.func @kernel(%arg0: i32, %arg1: memref<98xf32, #tpu.memory_space<smem>>, %arg2: memref<1xf32, #tpu.memory_space<smem>>, %arg3: memref<1x4x256xf32, #tpu.memory_space<vmem>>, %arg4: memref<1x4x256xf32, #tpu.memory_space<vmem>>) attributes {dimension_semantics = [#tpu.dimension_semantics<parallel>], iteration_bounds = array<i64: 2>, scalar_prefetch = 0 : i64, scratch_operands = 0 : i64, tpu.core_type = #tpu.core_type<tc>, window_params = [{transform_indices = @transform_0, window_bounds = array<i64: 98>}, {transform_indices = @transform_1, window_bounds = array<i64: 1>}, {transform_indices = @transform_2, window_bounds = array<i64: 1, 4, 256>}, {transform_indices = @transform_3, window_bounds = array<i64: 1, 4, 256>}]} {
    %c0 = arith.constant 0 : index
    %0 = memref.load %arg2[%c0] : memref<1xf32, #tpu.memory_space<smem>>
    %c0_0 = arith.constant 0 : index
    %1 = memref.load %arg1[%c0_0] : memref<98xf32, #tpu.memory_space<smem>>
    %c1 = arith.constant 1 : index
    %2 = memref.load %arg1[%c1] : memref<98xf32, #tpu.memory_space<smem>>
    %c2 = arith.constant 2 : index
    %3 = memref.load %arg1[%c2] : memref<98xf32, #tpu.memory_space<smem>>
    %c3 = arith.constant 3 : index
    %4 = memref.load %arg1[%c3] : memref<98xf32, #tpu.memory_space<smem>>
    %c4 = arith.constant 4 : index
    %5 = memref.load %arg1[%c4] : memref<98xf32, #tpu.memory_space<smem>>
    %c5 = arith.constant 5 : index
    %6 = memref.load %arg1[%c5] : memref<98xf32, #tpu.memory_space<smem>>
    %c6 = arith.constant 6 : index
    %7 = memref.load %arg1[%c6] : memref<98xf32, #tpu.memory_space<smem>>
    %c7 = arith.constant 7 : index
    %8 = memref.load %arg1[%c7] : memref<98xf32, #tpu.memory_space<smem>>
    %c8 = arith.constant 8 : index
    %9 = memref.load %arg1[%c8] : memref<98xf32, #tpu.memory_space<smem>>
    %c9 = arith.constant 9 : index
    %10 = memref.load %arg1[%c9] : memref<98xf32, #tpu.memory_space<smem>>
    %c10 = arith.constant 10 : index
    %11 = memref.load %arg1[%c10] : memref<98xf32, #tpu.memory_space<smem>>
    %c11 = arith.constant 11 : index
    %12 = memref.load %arg1[%c11] : memref<98xf32, #tpu.memory_space<smem>>
    %c12 = arith.constant 12 : index
    %13 = memref.load %arg1[%c12] : memref<98xf32, #tpu.memory_space<smem>>
    %c13 = arith.constant 13 : index
    %14 = memref.load %arg1[%c13] : memref<98xf32, #tpu.memory_space<smem>>
    %c14 = arith.constant 14 : index
    %15 = memref.load %arg1[%c14] : memref<98xf32, #tpu.memory_space<smem>>
    %c15 = arith.constant 15 : index
    %16 = memref.load %arg1[%c15] : memref<98xf32, #tpu.memory_space<smem>>
    %c16 = arith.constant 16 : index
    %17 = memref.load %arg1[%c16] : memref<98xf32, #tpu.memory_space<smem>>
    %c17 = arith.constant 17 : index
    %18 = memref.load %arg1[%c17] : memref<98xf32, #tpu.memory_space<smem>>
    %c18 = arith.constant 18 : index
    %19 = memref.load %arg1[%c18] : memref<98xf32, #tpu.memory_space<smem>>
    %c19 = arith.constant 19 : index
    %20 = memref.load %arg1[%c19] : memref<98xf32, #tpu.memory_space<smem>>
    %c20 = arith.constant 20 : index
    %21 = memref.load %arg1[%c20] : memref<98xf32, #tpu.memory_space<smem>>
    %c21 = arith.constant 21 : index
    %22 = memref.load %arg1[%c21] : memref<98xf32, #tpu.memory_space<smem>>
    %c22 = arith.constant 22 : index
    %23 = memref.load %arg1[%c22] : memref<98xf32, #tpu.memory_space<smem>>
    %c23 = arith.constant 23 : index
    %24 = memref.load %arg1[%c23] : memref<98xf32, #tpu.memory_space<smem>>
    %c24 = arith.constant 24 : index
    %25 = memref.load %arg1[%c24] : memref<98xf32, #tpu.memory_space<smem>>
    %c25 = arith.constant 25 : index
    %26 = memref.load %arg1[%c25] : memref<98xf32, #tpu.memory_space<smem>>
    %c26 = arith.constant 26 : index
    %27 = memref.load %arg1[%c26] : memref<98xf32, #tpu.memory_space<smem>>
    %c27 = arith.constant 27 : index
    %28 = memref.load %arg1[%c27] : memref<98xf32, #tpu.memory_space<smem>>
    %c28 = arith.constant 28 : index
    %29 = memref.load %arg1[%c28] : memref<98xf32, #tpu.memory_space<smem>>
    %c29 = arith.constant 29 : index
    %30 = memref.load %arg1[%c29] : memref<98xf32, #tpu.memory_space<smem>>
    %c30 = arith.constant 30 : index
    %31 = memref.load %arg1[%c30] : memref<98xf32, #tpu.memory_space<smem>>
    %c31 = arith.constant 31 : index
    %32 = memref.load %arg1[%c31] : memref<98xf32, #tpu.memory_space<smem>>
    %c32 = arith.constant 32 : index
    %33 = memref.load %arg1[%c32] : memref<98xf32, #tpu.memory_space<smem>>
    %c33 = arith.constant 33 : index
    %34 = memref.load %arg1[%c33] : memref<98xf32, #tpu.memory_space<smem>>
    %c34 = arith.constant 34 : index
    %35 = memref.load %arg1[%c34] : memref<98xf32, #tpu.memory_space<smem>>
    %c35 = arith.constant 35 : index
    %36 = memref.load %arg1[%c35] : memref<98xf32, #tpu.memory_space<smem>>
    %c36 = arith.constant 36 : index
    %37 = memref.load %arg1[%c36] : memref<98xf32, #tpu.memory_space<smem>>
    %c37 = arith.constant 37 : index
    %38 = memref.load %arg1[%c37] : memref<98xf32, #tpu.memory_space<smem>>
    %c38 = arith.constant 38 : index
    %39 = memref.load %arg1[%c38] : memref<98xf32, #tpu.memory_space<smem>>
    %c39 = arith.constant 39 : index
    %40 = memref.load %arg1[%c39] : memref<98xf32, #tpu.memory_space<smem>>
    %c40 = arith.constant 40 : index
    %41 = memref.load %arg1[%c40] : memref<98xf32, #tpu.memory_space<smem>>
    %c41 = arith.constant 41 : index
    %42 = memref.load %arg1[%c41] : memref<98xf32, #tpu.memory_space<smem>>
    %c42 = arith.constant 42 : index
    %43 = memref.load %arg1[%c42] : memref<98xf32, #tpu.memory_space<smem>>
    %c43 = arith.constant 43 : index
    %44 = memref.load %arg1[%c43] : memref<98xf32, #tpu.memory_space<smem>>
    %c44 = arith.constant 44 : index
    %45 = memref.load %arg1[%c44] : memref<98xf32, #tpu.memory_space<smem>>
    %c45 = arith.constant 45 : index
    %46 = memref.load %arg1[%c45] : memref<98xf32, #tpu.memory_space<smem>>
    %c46 = arith.constant 46 : index
    %47 = memref.load %arg1[%c46] : memref<98xf32, #tpu.memory_space<smem>>
    %c47 = arith.constant 47 : index
    %48 = memref.load %arg1[%c47] : memref<98xf32, #tpu.memory_space<smem>>
    %c48 = arith.constant 48 : index
    %49 = memref.load %arg1[%c48] : memref<98xf32, #tpu.memory_space<smem>>
    %c49 = arith.constant 49 : index
    %50 = memref.load %arg1[%c49] : memref<98xf32, #tpu.memory_space<smem>>
    %c50 = arith.constant 50 : index
    %51 = memref.load %arg1[%c50] : memref<98xf32, #tpu.memory_space<smem>>
    %c51 = arith.constant 51 : index
    %52 = memref.load %arg1[%c51] : memref<98xf32, #tpu.memory_space<smem>>
    %c52 = arith.constant 52 : index
    %53 = memref.load %arg1[%c52] : memref<98xf32, #tpu.memory_space<smem>>
    %c53 = arith.constant 53 : index
    %54 = memref.load %arg1[%c53] : memref<98xf32, #tpu.memory_space<smem>>
    %c54 = arith.constant 54 : index
    %55 = memref.load %arg1[%c54] : memref<98xf32, #tpu.memory_space<smem>>
    %c55 = arith.constant 55 : index
    %56 = memref.load %arg1[%c55] : memref<98xf32, #tpu.memory_space<smem>>
    %c56 = arith.constant 56 : index
    %57 = memref.load %arg1[%c56] : memref<98xf32, #tpu.memory_space<smem>>
    %c57 = arith.constant 57 : index
    %58 = memref.load %arg1[%c57] : memref<98xf32, #tpu.memory_space<smem>>
    %c58 = arith.constant 58 : index
    %59 = memref.load %arg1[%c58] : memref<98xf32, #tpu.memory_space<smem>>
    %c59 = arith.constant 59 : index
    %60 = memref.load %arg1[%c59] : memref<98xf32, #tpu.memory_space<smem>>
    %c60 = arith.constant 60 : index
    %61 = memref.load %arg1[%c60] : memref<98xf32, #tpu.memory_space<smem>>
    %c61 = arith.constant 61 : index
    %62 = memref.load %arg1[%c61] : memref<98xf32, #tpu.memory_space<smem>>
    %c62 = arith.constant 62 : index
    %63 = memref.load %arg1[%c62] : memref<98xf32, #tpu.memory_space<smem>>
    %c63 = arith.constant 63 : index
    %64 = memref.load %arg1[%c63] : memref<98xf32, #tpu.memory_space<smem>>
    %c64 = arith.constant 64 : index
    %65 = memref.load %arg1[%c64] : memref<98xf32, #tpu.memory_space<smem>>
    %c65 = arith.constant 65 : index
    %66 = memref.load %arg1[%c65] : memref<98xf32, #tpu.memory_space<smem>>
    %c66 = arith.constant 66 : index
    %67 = memref.load %arg1[%c66] : memref<98xf32, #tpu.memory_space<smem>>
    %c67 = arith.constant 67 : index
    %68 = memref.load %arg1[%c67] : memref<98xf32, #tpu.memory_space<smem>>
    %c68 = arith.constant 68 : index
    %69 = memref.load %arg1[%c68] : memref<98xf32, #tpu.memory_space<smem>>
    %c69 = arith.constant 69 : index
    %70 = memref.load %arg1[%c69] : memref<98xf32, #tpu.memory_space<smem>>
    %c70 = arith.constant 70 : index
    %71 = memref.load %arg1[%c70] : memref<98xf32, #tpu.memory_space<smem>>
    %c71 = arith.constant 71 : index
    %72 = memref.load %arg1[%c71] : memref<98xf32, #tpu.memory_space<smem>>
    %c72 = arith.constant 72 : index
    %73 = memref.load %arg1[%c72] : memref<98xf32, #tpu.memory_space<smem>>
    %c73 = arith.constant 73 : index
    %74 = memref.load %arg1[%c73] : memref<98xf32, #tpu.memory_space<smem>>
    %c74 = arith.constant 74 : index
    %75 = memref.load %arg1[%c74] : memref<98xf32, #tpu.memory_space<smem>>
    %c75 = arith.constant 75 : index
    %76 = memref.load %arg1[%c75] : memref<98xf32, #tpu.memory_space<smem>>
    %c76 = arith.constant 76 : index
    %77 = memref.load %arg1[%c76] : memref<98xf32, #tpu.memory_space<smem>>
    %c77 = arith.constant 77 : index
    %78 = memref.load %arg1[%c77] : memref<98xf32, #tpu.memory_space<smem>>
    %c78 = arith.constant 78 : index
    %79 = memref.load %arg1[%c78] : memref<98xf32, #tpu.memory_space<smem>>
    %c79 = arith.constant 79 : index
    %80 = memref.load %arg1[%c79] : memref<98xf32, #tpu.memory_space<smem>>
    %c80 = arith.constant 80 : index
    %81 = memref.load %arg1[%c80] : memref<98xf32, #tpu.memory_space<smem>>
    %c81 = arith.constant 81 : index
    %82 = memref.load %arg1[%c81] : memref<98xf32, #tpu.memory_space<smem>>
    %c82 = arith.constant 82 : index
    %83 = memref.load %arg1[%c82] : memref<98xf32, #tpu.memory_space<smem>>
    %c83 = arith.constant 83 : index
    %84 = memref.load %arg1[%c83] : memref<98xf32, #tpu.memory_space<smem>>
    %c84 = arith.constant 84 : index
    %85 = memref.load %arg1[%c84] : memref<98xf32, #tpu.memory_space<smem>>
    %c85 = arith.constant 85 : index
    %86 = memref.load %arg1[%c85] : memref<98xf32, #tpu.memory_space<smem>>
    %c86 = arith.constant 86 : index
    %87 = memref.load %arg1[%c86] : memref<98xf32, #tpu.memory_space<smem>>
    %c87 = arith.constant 87 : index
    %88 = memref.load %arg1[%c87] : memref<98xf32, #tpu.memory_space<smem>>
    %c88 = arith.constant 88 : index
    %89 = memref.load %arg1[%c88] : memref<98xf32, #tpu.memory_space<smem>>
    %c89 = arith.constant 89 : index
    %90 = memref.load %arg1[%c89] : memref<98xf32, #tpu.memory_space<smem>>
    %c90 = arith.constant 90 : index
    %91 = memref.load %arg1[%c90] : memref<98xf32, #tpu.memory_space<smem>>
    %c91 = arith.constant 91 : index
    %92 = memref.load %arg1[%c91] : memref<98xf32, #tpu.memory_space<smem>>
    %c92 = arith.constant 92 : index
    %93 = memref.load %arg1[%c92] : memref<98xf32, #tpu.memory_space<smem>>
    %c93 = arith.constant 93 : index
    %94 = memref.load %arg1[%c93] : memref<98xf32, #tpu.memory_space<smem>>
    %c94 = arith.constant 94 : index
    %95 = memref.load %arg1[%c94] : memref<98xf32, #tpu.memory_space<smem>>
    %c95 = arith.constant 95 : index
    %96 = memref.load %arg1[%c95] : memref<98xf32, #tpu.memory_space<smem>>
    %c96 = arith.constant 96 : index
    %97 = memref.load %arg1[%c96] : memref<98xf32, #tpu.memory_space<smem>>
    %c97 = arith.constant 97 : index
    %98 = memref.load %arg1[%c97] : memref<98xf32, #tpu.memory_space<smem>>
    %99 = tpu.iota {dimensions = array<i32: 1>} : vector<1x256xi32>
    %100 = arith.sitofp %99 : vector<1x256xi32> to vector<1x256xf32>
    %cst = arith.constant 5.000000e-01 : f32
    %101 = vector.broadcast %cst : f32 to vector<1x256xf32>
    %102 = arith.addf %100, %101 : vector<1x256xf32>
    %cst_1 = arith.constant 1.600000e+01 : f32
    %103 = vector.broadcast %cst_1 : f32 to vector<1x256xf32>
    %104 = arith.divf %102, %103 : vector<1x256xf32>
    %105 = math.floor %104 : vector<1x256xf32>
    %106 = arith.fptosi %105 : vector<1x256xf32> to vector<1x256xi32>
    %c16_i32 = arith.constant 16 : i32
    %107 = vector.broadcast %c16_i32 : i32 to vector<1x256xi32>
    %108 = arith.muli %106, %107 : vector<1x256xi32>
    %109 = arith.subi %99, %108 : vector<1x256xi32>
    %c-3_i32 = arith.constant -3 : i32
    %110 = vector.broadcast %c-3_i32 : i32 to vector<1x256xi32>
    %111 = arith.addi %106, %110 : vector<1x256xi32>
    %c0_i32 = arith.constant 0 : i32
    %112 = vector.broadcast %c0_i32 : i32 to vector<1x256xi32>
    %113 = arith.cmpi sge, %111, %112 : vector<1x256xi32>
    %c-3_i32_2 = arith.constant -3 : i32
    %114 = vector.broadcast %c-3_i32_2 : i32 to vector<1x256xi32>
    %115 = arith.addi %106, %114 : vector<1x256xi32>
    %c16_i32_3 = arith.constant 16 : i32
    %116 = vector.broadcast %c16_i32_3 : i32 to vector<1x256xi32>
    %117 = arith.cmpi slt, %115, %116 : vector<1x256xi32>
    %118 = arith.andi %113, %117 : vector<1x256xi1>
    %c-2_i32 = arith.constant -2 : i32
    %119 = vector.broadcast %c-2_i32 : i32 to vector<1x256xi32>
    %120 = arith.addi %106, %119 : vector<1x256xi32>
    %c0_i32_4 = arith.constant 0 : i32
    %121 = vector.broadcast %c0_i32_4 : i32 to vector<1x256xi32>
    %122 = arith.cmpi sge, %120, %121 : vector<1x256xi32>
    %c-2_i32_5 = arith.constant -2 : i32
    %123 = vector.broadcast %c-2_i32_5 : i32 to vector<1x256xi32>
    %124 = arith.addi %106, %123 : vector<1x256xi32>
    %c16_i32_6 = arith.constant 16 : i32
    %125 = vector.broadcast %c16_i32_6 : i32 to vector<1x256xi32>
    %126 = arith.cmpi slt, %124, %125 : vector<1x256xi32>
    %127 = arith.andi %122, %126 : vector<1x256xi1>
    %c-1_i32 = arith.constant -1 : i32
    %128 = vector.broadcast %c-1_i32 : i32 to vector<1x256xi32>
    %129 = arith.addi %106, %128 : vector<1x256xi32>
    %c0_i32_7 = arith.constant 0 : i32
    %130 = vector.broadcast %c0_i32_7 : i32 to vector<1x256xi32>
    %131 = arith.cmpi sge, %129, %130 : vector<1x256xi32>
    %c-1_i32_8 = arith.constant -1 : i32
    %132 = vector.broadcast %c-1_i32_8 : i32 to vector<1x256xi32>
    %133 = arith.addi %106, %132 : vector<1x256xi32>
    %c16_i32_9 = arith.constant 16 : i32
    %134 = vector.broadcast %c16_i32_9 : i32 to vector<1x256xi32>
    %135 = arith.cmpi slt, %133, %134 : vector<1x256xi32>
    %136 = arith.andi %131, %135 : vector<1x256xi1>
    %c0_i32_10 = arith.constant 0 : i32
    %137 = vector.broadcast %c0_i32_10 : i32 to vector<1x256xi32>
    %138 = arith.addi %106, %137 : vector<1x256xi32>
    %c0_i32_11 = arith.constant 0 : i32
    %139 = vector.broadcast %c0_i32_11 : i32 to vector<1x256xi32>
    %140 = arith.cmpi sge, %138, %139 : vector<1x256xi32>
    %c0_i32_12 = arith.constant 0 : i32
    %141 = vector.broadcast %c0_i32_12 : i32 to vector<1x256xi32>
    %142 = arith.addi %106, %141 : vector<1x256xi32>
    %c16_i32_13 = arith.constant 16 : i32
    %143 = vector.broadcast %c16_i32_13 : i32 to vector<1x256xi32>
    %144 = arith.cmpi slt, %142, %143 : vector<1x256xi32>
    %145 = arith.andi %140, %144 : vector<1x256xi1>
    %c1_i32 = arith.constant 1 : i32
    %146 = vector.broadcast %c1_i32 : i32 to vector<1x256xi32>
    %147 = arith.addi %106, %146 : vector<1x256xi32>
    %c0_i32_14 = arith.constant 0 : i32
    %148 = vector.broadcast %c0_i32_14 : i32 to vector<1x256xi32>
    %149 = arith.cmpi sge, %147, %148 : vector<1x256xi32>
    %c1_i32_15 = arith.constant 1 : i32
    %150 = vector.broadcast %c1_i32_15 : i32 to vector<1x256xi32>
    %151 = arith.addi %106, %150 : vector<1x256xi32>
    %c16_i32_16 = arith.constant 16 : i32
    %152 = vector.broadcast %c16_i32_16 : i32 to vector<1x256xi32>
    %153 = arith.cmpi slt, %151, %152 : vector<1x256xi32>
    %154 = arith.andi %149, %153 : vector<1x256xi1>
    %c2_i32 = arith.constant 2 : i32
    %155 = vector.broadcast %c2_i32 : i32 to vector<1x256xi32>
    %156 = arith.addi %106, %155 : vector<1x256xi32>
    %c0_i32_17 = arith.constant 0 : i32
    %157 = vector.broadcast %c0_i32_17 : i32 to vector<1x256xi32>
    %158 = arith.cmpi sge, %156, %157 : vector<1x256xi32>
    %c2_i32_18 = arith.constant 2 : i32
    %159 = vector.broadcast %c2_i32_18 : i32 to vector<1x256xi32>
    %160 = arith.addi %106, %159 : vector<1x256xi32>
    %c16_i32_19 = arith.constant 16 : i32
    %161 = vector.broadcast %c16_i32_19 : i32 to vector<1x256xi32>
    %162 = arith.cmpi slt, %160, %161 : vector<1x256xi32>
    %163 = arith.andi %158, %162 : vector<1x256xi1>
    %c3_i32 = arith.constant 3 : i32
    %164 = vector.broadcast %c3_i32 : i32 to vector<1x256xi32>
    %165 = arith.addi %106, %164 : vector<1x256xi32>
    %c0_i32_20 = arith.constant 0 : i32
    %166 = vector.broadcast %c0_i32_20 : i32 to vector<1x256xi32>
    %167 = arith.cmpi sge, %165, %166 : vector<1x256xi32>
    %c3_i32_21 = arith.constant 3 : i32
    %168 = vector.broadcast %c3_i32_21 : i32 to vector<1x256xi32>
    %169 = arith.addi %106, %168 : vector<1x256xi32>
    %c16_i32_22 = arith.constant 16 : i32
    %170 = vector.broadcast %c16_i32_22 : i32 to vector<1x256xi32>
    %171 = arith.cmpi slt, %169, %170 : vector<1x256xi32>
    %172 = arith.andi %167, %171 : vector<1x256xi1>
    %c-3_i32_23 = arith.constant -3 : i32
    %173 = vector.broadcast %c-3_i32_23 : i32 to vector<1x256xi32>
    %174 = arith.addi %109, %173 : vector<1x256xi32>
    %c0_i32_24 = arith.constant 0 : i32
    %175 = vector.broadcast %c0_i32_24 : i32 to vector<1x256xi32>
    %176 = arith.cmpi sge, %174, %175 : vector<1x256xi32>
    %c-3_i32_25 = arith.constant -3 : i32
    %177 = vector.broadcast %c-3_i32_25 : i32 to vector<1x256xi32>
    %178 = arith.addi %109, %177 : vector<1x256xi32>
    %c16_i32_26 = arith.constant 16 : i32
    %179 = vector.broadcast %c16_i32_26 : i32 to vector<1x256xi32>
    %180 = arith.cmpi slt, %178, %179 : vector<1x256xi32>
    %181 = arith.andi %176, %180 : vector<1x256xi1>
    %c-2_i32_27 = arith.constant -2 : i32
    %182 = vector.broadcast %c-2_i32_27 : i32 to vector<1x256xi32>
    %183 = arith.addi %109, %182 : vector<1x256xi32>
    %c0_i32_28 = arith.constant 0 : i32
    %184 = vector.broadcast %c0_i32_28 : i32 to vector<1x256xi32>
    %185 = arith.cmpi sge, %183, %184 : vector<1x256xi32>
    %c-2_i32_29 = arith.constant -2 : i32
    %186 = vector.broadcast %c-2_i32_29 : i32 to vector<1x256xi32>
    %187 = arith.addi %109, %186 : vector<1x256xi32>
    %c16_i32_30 = arith.constant 16 : i32
    %188 = vector.broadcast %c16_i32_30 : i32 to vector<1x256xi32>
    %189 = arith.cmpi slt, %187, %188 : vector<1x256xi32>
    %190 = arith.andi %185, %189 : vector<1x256xi1>
    %c-1_i32_31 = arith.constant -1 : i32
    %191 = vector.broadcast %c-1_i32_31 : i32 to vector<1x256xi32>
    %192 = arith.addi %109, %191 : vector<1x256xi32>
    %c0_i32_32 = arith.constant 0 : i32
    %193 = vector.broadcast %c0_i32_32 : i32 to vector<1x256xi32>
    %194 = arith.cmpi sge, %192, %193 : vector<1x256xi32>
    %c-1_i32_33 = arith.constant -1 : i32
    %195 = vector.broadcast %c-1_i32_33 : i32 to vector<1x256xi32>
    %196 = arith.addi %109, %195 : vector<1x256xi32>
    %c16_i32_34 = arith.constant 16 : i32
    %197 = vector.broadcast %c16_i32_34 : i32 to vector<1x256xi32>
    %198 = arith.cmpi slt, %196, %197 : vector<1x256xi32>
    %199 = arith.andi %194, %198 : vector<1x256xi1>
    %c0_i32_35 = arith.constant 0 : i32
    %200 = vector.broadcast %c0_i32_35 : i32 to vector<1x256xi32>
    %201 = arith.addi %109, %200 : vector<1x256xi32>
    %c0_i32_36 = arith.constant 0 : i32
    %202 = vector.broadcast %c0_i32_36 : i32 to vector<1x256xi32>
    %203 = arith.cmpi sge, %201, %202 : vector<1x256xi32>
    %c0_i32_37 = arith.constant 0 : i32
    %204 = vector.broadcast %c0_i32_37 : i32 to vector<1x256xi32>
    %205 = arith.addi %109, %204 : vector<1x256xi32>
    %c16_i32_38 = arith.constant 16 : i32
    %206 = vector.broadcast %c16_i32_38 : i32 to vector<1x256xi32>
    %207 = arith.cmpi slt, %205, %206 : vector<1x256xi32>
    %208 = arith.andi %203, %207 : vector<1x256xi1>
    %c1_i32_39 = arith.constant 1 : i32
    %209 = vector.broadcast %c1_i32_39 : i32 to vector<1x256xi32>
    %210 = arith.addi %109, %209 : vector<1x256xi32>
    %c0_i32_40 = arith.constant 0 : i32
    %211 = vector.broadcast %c0_i32_40 : i32 to vector<1x256xi32>
    %212 = arith.cmpi sge, %210, %211 : vector<1x256xi32>
    %c1_i32_41 = arith.constant 1 : i32
    %213 = vector.broadcast %c1_i32_41 : i32 to vector<1x256xi32>
    %214 = arith.addi %109, %213 : vector<1x256xi32>
    %c16_i32_42 = arith.constant 16 : i32
    %215 = vector.broadcast %c16_i32_42 : i32 to vector<1x256xi32>
    %216 = arith.cmpi slt, %214, %215 : vector<1x256xi32>
    %217 = arith.andi %212, %216 : vector<1x256xi1>
    %c2_i32_43 = arith.constant 2 : i32
    %218 = vector.broadcast %c2_i32_43 : i32 to vector<1x256xi32>
    %219 = arith.addi %109, %218 : vector<1x256xi32>
    %c0_i32_44 = arith.constant 0 : i32
    %220 = vector.broadcast %c0_i32_44 : i32 to vector<1x256xi32>
    %221 = arith.cmpi sge, %219, %220 : vector<1x256xi32>
    %c2_i32_45 = arith.constant 2 : i32
    %222 = vector.broadcast %c2_i32_45 : i32 to vector<1x256xi32>
    %223 = arith.addi %109, %222 : vector<1x256xi32>
    %c16_i32_46 = arith.constant 16 : i32
    %224 = vector.broadcast %c16_i32_46 : i32 to vector<1x256xi32>
    %225 = arith.cmpi slt, %223, %224 : vector<1x256xi32>
    %226 = arith.andi %221, %225 : vector<1x256xi1>
    %c3_i32_47 = arith.constant 3 : i32
    %227 = vector.broadcast %c3_i32_47 : i32 to vector<1x256xi32>
    %228 = arith.addi %109, %227 : vector<1x256xi32>
    %c0_i32_48 = arith.constant 0 : i32
    %229 = vector.broadcast %c0_i32_48 : i32 to vector<1x256xi32>
    %230 = arith.cmpi sge, %228, %229 : vector<1x256xi32>
    %c3_i32_49 = arith.constant 3 : i32
    %231 = vector.broadcast %c3_i32_49 : i32 to vector<1x256xi32>
    %232 = arith.addi %109, %231 : vector<1x256xi32>
    %c16_i32_50 = arith.constant 16 : i32
    %233 = vector.broadcast %c16_i32_50 : i32 to vector<1x256xi32>
    %234 = arith.cmpi slt, %232, %233 : vector<1x256xi32>
    %235 = arith.andi %230, %234 : vector<1x256xi1>
    %c0_51 = arith.constant 0 : index
    %c0_52 = arith.constant 0 : index
    %c0_53 = arith.constant 0 : index
    %236 = vector.load %arg3[%c0_51, %c0_52, %c0_53] : memref<1x4x256xf32, #tpu.memory_space<vmem>>, vector<1x4x256xf32>
    %cst_54 = arith.constant dense<0.000000e+00> : vector<1x256xf32>
    %237 = vector.multi_reduction <add>, %236, %cst_54 [1] : vector<1x4x256xf32> to vector<1x256xf32>
    %cst_55 = arith.constant 4.000000e+00 : f32
    %238 = vector.broadcast %cst_55 : f32 to vector<1x256xf32>
    %239 = arith.divf %237, %238 : vector<1x256xf32>
    %cst_56 = arith.constant dense<0xFF800000> : vector<1x256xf32>
    %240 = vector.multi_reduction <maximumf>, %236, %cst_56 [1] : vector<1x4x256xf32> to vector<1x256xf32>
    %241 = vector.broadcast %0 : f32 to vector<1x256xf32>
    %242 = arith.andi %118, %181 : vector<1x256xi1>
    %243 = vector.extract_strided_slice %239 {offsets = [0, 205], sizes = [1, 51], strides = [1, 1]} : vector<1x256xf32> to vector<1x51xf32>
    %244 = vector.extract_strided_slice %239 {offsets = [0, 0], sizes = [1, 205], strides = [1, 1]} : vector<1x256xf32> to vector<1x205xf32>
    %245 = tpu.concatenate %243, %244 in 1 : vector<1x51xf32>, vector<1x205xf32> -> vector<1x256xf32>
    %246 = vector.extract_strided_slice %240 {offsets = [0, 205], sizes = [1, 51], strides = [1, 1]} : vector<1x256xf32> to vector<1x51xf32>
    %247 = vector.extract_strided_slice %240 {offsets = [0, 0], sizes = [1, 205], strides = [1, 1]} : vector<1x256xf32> to vector<1x205xf32>
    %248 = tpu.concatenate %246, %247 in 1 : vector<1x51xf32>, vector<1x205xf32> -> vector<1x256xf32>
    %249 = vector.broadcast %1 : f32 to vector<1x256xf32>
    %250 = arith.mulf %249, %245 : vector<1x256xf32>
    %251 = vector.broadcast %50 : f32 to vector<1x256xf32>
    %252 = arith.mulf %251, %248 : vector<1x256xf32>
    %253 = arith.addf %250, %252 : vector<1x256xf32>
    %cst_57 = arith.constant 0.000000e+00 : f32
    %254 = vector.broadcast %cst_57 : f32 to vector<1x256xf32>
    %255 = arith.select %242, %253, %254 : vector<1x256xi1>, vector<1x256xf32>
    %256 = arith.addf %241, %255 : vector<1x256xf32>
    %257 = arith.andi %118, %190 : vector<1x256xi1>
    %258 = vector.extract_strided_slice %239 {offsets = [0, 206], sizes = [1, 50], strides = [1, 1]} : vector<1x256xf32> to vector<1x50xf32>
    %259 = vector.extract_strided_slice %239 {offsets = [0, 0], sizes = [1, 206], strides = [1, 1]} : vector<1x256xf32> to vector<1x206xf32>
    %260 = tpu.concatenate %258, %259 in 1 : vector<1x50xf32>, vector<1x206xf32> -> vector<1x256xf32>
    %261 = vector.extract_strided_slice %240 {offsets = [0, 206], sizes = [1, 50], strides = [1, 1]} : vector<1x256xf32> to vector<1x50xf32>
    %262 = vector.extract_strided_slice %240 {offsets = [0, 0], sizes = [1, 206], strides = [1, 1]} : vector<1x256xf32> to vector<1x206xf32>
    %263 = tpu.concatenate %261, %262 in 1 : vector<1x50xf32>, vector<1x206xf32> -> vector<1x256xf32>
    %264 = vector.broadcast %2 : f32 to vector<1x256xf32>
    %265 = arith.mulf %264, %260 : vector<1x256xf32>
    %266 = vector.broadcast %51 : f32 to vector<1x256xf32>
    %267 = arith.mulf %266, %263 : vector<1x256xf32>
    %268 = arith.addf %265, %267 : vector<1x256xf32>
    %cst_58 = arith.constant 0.000000e+00 : f32
    %269 = vector.broadcast %cst_58 : f32 to vector<1x256xf32>
    %270 = arith.select %257, %268, %269 : vector<1x256xi1>, vector<1x256xf32>
    %271 = arith.addf %256, %270 : vector<1x256xf32>
    %272 = arith.andi %118, %199 : vector<1x256xi1>
    %273 = vector.extract_strided_slice %239 {offsets = [0, 207], sizes = [1, 49], strides = [1, 1]} : vector<1x256xf32> to vector<1x49xf32>
    %274 = vector.extract_strided_slice %239 {offsets = [0, 0], sizes = [1, 207], strides = [1, 1]} : vector<1x256xf32> to vector<1x207xf32>
    %275 = tpu.concatenate %273, %274 in 1 : vector<1x49xf32>, vector<1x207xf32> -> vector<1x256xf32>
    %276 = vector.extract_strided_slice %240 {offsets = [0, 207], sizes = [1, 49], strides = [1, 1]} : vector<1x256xf32> to vector<1x49xf32>
    %277 = vector.extract_strided_slice %240 {offsets = [0, 0], sizes = [1, 207], strides = [1, 1]} : vector<1x256xf32> to vector<1x207xf32>
    %278 = tpu.concatenate %276, %277 in 1 : vector<1x49xf32>, vector<1x207xf32> -> vector<1x256xf32>
    %279 = vector.broadcast %3 : f32 to vector<1x256xf32>
    %280 = arith.mulf %279, %275 : vector<1x256xf32>
    %281 = vector.broadcast %52 : f32 to vector<1x256xf32>
    %282 = arith.mulf %281, %278 : vector<1x256xf32>
    %283 = arith.addf %280, %282 : vector<1x256xf32>
    %cst_59 = arith.constant 0.000000e+00 : f32
    %284 = vector.broadcast %cst_59 : f32 to vector<1x256xf32>
    %285 = arith.select %272, %283, %284 : vector<1x256xi1>, vector<1x256xf32>
    %286 = arith.addf %271, %285 : vector<1x256xf32>
    %287 = arith.andi %118, %208 : vector<1x256xi1>
    %288 = vector.extract_strided_slice %239 {offsets = [0, 208], sizes = [1, 48], strides = [1, 1]} : vector<1x256xf32> to vector<1x48xf32>
    %289 = vector.extract_strided_slice %239 {offsets = [0, 0], sizes = [1, 208], strides = [1, 1]} : vector<1x256xf32> to vector<1x208xf32>
    %290 = tpu.concatenate %288, %289 in 1 : vector<1x48xf32>, vector<1x208xf32> -> vector<1x256xf32>
    %291 = vector.extract_strided_slice %240 {offsets = [0, 208], sizes = [1, 48], strides = [1, 1]} : vector<1x256xf32> to vector<1x48xf32>
    %292 = vector.extract_strided_slice %240 {offsets = [0, 0], sizes = [1, 208], strides = [1, 1]} : vector<1x256xf32> to vector<1x208xf32>
    %293 = tpu.concatenate %291, %292 in 1 : vector<1x48xf32>, vector<1x208xf32> -> vector<1x256xf32>
    %294 = vector.broadcast %4 : f32 to vector<1x256xf32>
    %295 = arith.mulf %294, %290 : vector<1x256xf32>
    %296 = vector.broadcast %53 : f32 to vector<1x256xf32>
    %297 = arith.mulf %296, %293 : vector<1x256xf32>
    %298 = arith.addf %295, %297 : vector<1x256xf32>
    %cst_60 = arith.constant 0.000000e+00 : f32
    %299 = vector.broadcast %cst_60 : f32 to vector<1x256xf32>
    %300 = arith.select %287, %298, %299 : vector<1x256xi1>, vector<1x256xf32>
    %301 = arith.addf %286, %300 : vector<1x256xf32>
    %302 = arith.andi %118, %217 : vector<1x256xi1>
    %303 = vector.extract_strided_slice %239 {offsets = [0, 209], sizes = [1, 47], strides = [1, 1]} : vector<1x256xf32> to vector<1x47xf32>
    %304 = vector.extract_strided_slice %239 {offsets = [0, 0], sizes = [1, 209], strides = [1, 1]} : vector<1x256xf32> to vector<1x209xf32>
    %305 = tpu.concatenate %303, %304 in 1 : vector<1x47xf32>, vector<1x209xf32> -> vector<1x256xf32>
    %306 = vector.extract_strided_slice %240 {offsets = [0, 209], sizes = [1, 47], strides = [1, 1]} : vector<1x256xf32> to vector<1x47xf32>
    %307 = vector.extract_strided_slice %240 {offsets = [0, 0], sizes = [1, 209], strides = [1, 1]} : vector<1x256xf32> to vector<1x209xf32>
    %308 = tpu.concatenate %306, %307 in 1 : vector<1x47xf32>, vector<1x209xf32> -> vector<1x256xf32>
    %309 = vector.broadcast %5 : f32 to vector<1x256xf32>
    %310 = arith.mulf %309, %305 : vector<1x256xf32>
    %311 = vector.broadcast %54 : f32 to vector<1x256xf32>
    %312 = arith.mulf %311, %308 : vector<1x256xf32>
    %313 = arith.addf %310, %312 : vector<1x256xf32>
    %cst_61 = arith.constant 0.000000e+00 : f32
    %314 = vector.broadcast %cst_61 : f32 to vector<1x256xf32>
    %315 = arith.select %302, %313, %314 : vector<1x256xi1>, vector<1x256xf32>
    %316 = arith.addf %301, %315 : vector<1x256xf32>
    %317 = arith.andi %118, %226 : vector<1x256xi1>
    %318 = vector.extract_strided_slice %239 {offsets = [0, 210], sizes = [1, 46], strides = [1, 1]} : vector<1x256xf32> to vector<1x46xf32>
    %319 = vector.extract_strided_slice %239 {offsets = [0, 0], sizes = [1, 210], strides = [1, 1]} : vector<1x256xf32> to vector<1x210xf32>
    %320 = tpu.concatenate %318, %319 in 1 : vector<1x46xf32>, vector<1x210xf32> -> vector<1x256xf32>
    %321 = vector.extract_strided_slice %240 {offsets = [0, 210], sizes = [1, 46], strides = [1, 1]} : vector<1x256xf32> to vector<1x46xf32>
    %322 = vector.extract_strided_slice %240 {offsets = [0, 0], sizes = [1, 210], strides = [1, 1]} : vector<1x256xf32> to vector<1x210xf32>
    %323 = tpu.concatenate %321, %322 in 1 : vector<1x46xf32>, vector<1x210xf32> -> vector<1x256xf32>
    %324 = vector.broadcast %6 : f32 to vector<1x256xf32>
    %325 = arith.mulf %324, %320 : vector<1x256xf32>
    %326 = vector.broadcast %55 : f32 to vector<1x256xf32>
    %327 = arith.mulf %326, %323 : vector<1x256xf32>
    %328 = arith.addf %325, %327 : vector<1x256xf32>
    %cst_62 = arith.constant 0.000000e+00 : f32
    %329 = vector.broadcast %cst_62 : f32 to vector<1x256xf32>
    %330 = arith.select %317, %328, %329 : vector<1x256xi1>, vector<1x256xf32>
    %331 = arith.addf %316, %330 : vector<1x256xf32>
    %332 = arith.andi %118, %235 : vector<1x256xi1>
    %333 = vector.extract_strided_slice %239 {offsets = [0, 211], sizes = [1, 45], strides = [1, 1]} : vector<1x256xf32> to vector<1x45xf32>
    %334 = vector.extract_strided_slice %239 {offsets = [0, 0], sizes = [1, 211], strides = [1, 1]} : vector<1x256xf32> to vector<1x211xf32>
    %335 = tpu.concatenate %333, %334 in 1 : vector<1x45xf32>, vector<1x211xf32> -> vector<1x256xf32>
    %336 = vector.extract_strided_slice %240 {offsets = [0, 211], sizes = [1, 45], strides = [1, 1]} : vector<1x256xf32> to vector<1x45xf32>
    %337 = vector.extract_strided_slice %240 {offsets = [0, 0], sizes = [1, 211], strides = [1, 1]} : vector<1x256xf32> to vector<1x211xf32>
    %338 = tpu.concatenate %336, %337 in 1 : vector<1x45xf32>, vector<1x211xf32> -> vector<1x256xf32>
    %339 = vector.broadcast %7 : f32 to vector<1x256xf32>
    %340 = arith.mulf %339, %335 : vector<1x256xf32>
    %341 = vector.broadcast %56 : f32 to vector<1x256xf32>
    %342 = arith.mulf %341, %338 : vector<1x256xf32>
    %343 = arith.addf %340, %342 : vector<1x256xf32>
    %cst_63 = arith.constant 0.000000e+00 : f32
    %344 = vector.broadcast %cst_63 : f32 to vector<1x256xf32>
    %345 = arith.select %332, %343, %344 : vector<1x256xi1>, vector<1x256xf32>
    %346 = arith.addf %331, %345 : vector<1x256xf32>
    %347 = arith.andi %127, %181 : vector<1x256xi1>
    %348 = vector.extract_strided_slice %239 {offsets = [0, 221], sizes = [1, 35], strides = [1, 1]} : vector<1x256xf32> to vector<1x35xf32>
    %349 = vector.extract_strided_slice %239 {offsets = [0, 0], sizes = [1, 221], strides = [1, 1]} : vector<1x256xf32> to vector<1x221xf32>
    %350 = tpu.concatenate %348, %349 in 1 : vector<1x35xf32>, vector<1x221xf32> -> vector<1x256xf32>
    %351 = vector.extract_strided_slice %240 {offsets = [0, 221], sizes = [1, 35], strides = [1, 1]} : vector<1x256xf32> to vector<1x35xf32>
    %352 = vector.extract_strided_slice %240 {offsets = [0, 0], sizes = [1, 221], strides = [1, 1]} : vector<1x256xf32> to vector<1x221xf32>
    %353 = tpu.concatenate %351, %352 in 1 : vector<1x35xf32>, vector<1x221xf32> -> vector<1x256xf32>
    %354 = vector.broadcast %8 : f32 to vector<1x256xf32>
    %355 = arith.mulf %354, %350 : vector<1x256xf32>
    %356 = vector.broadcast %57 : f32 to vector<1x256xf32>
    %357 = arith.mulf %356, %353 : vector<1x256xf32>
    %358 = arith.addf %355, %357 : vector<1x256xf32>
    %cst_64 = arith.constant 0.000000e+00 : f32
    %359 = vector.broadcast %cst_64 : f32 to vector<1x256xf32>
    %360 = arith.select %347, %358, %359 : vector<1x256xi1>, vector<1x256xf32>
    %361 = arith.addf %346, %360 : vector<1x256xf32>
    %362 = arith.andi %127, %190 : vector<1x256xi1>
    %363 = vector.extract_strided_slice %239 {offsets = [0, 222], sizes = [1, 34], strides = [1, 1]} : vector<1x256xf32> to vector<1x34xf32>
    %364 = vector.extract_strided_slice %239 {offsets = [0, 0], sizes = [1, 222], strides = [1, 1]} : vector<1x256xf32> to vector<1x222xf32>
    %365 = tpu.concatenate %363, %364 in 1 : vector<1x34xf32>, vector<1x222xf32> -> vector<1x256xf32>
    %366 = vector.extract_strided_slice %240 {offsets = [0, 222], sizes = [1, 34], strides = [1, 1]} : vector<1x256xf32> to vector<1x34xf32>
    %367 = vector.extract_strided_slice %240 {offsets = [0, 0], sizes = [1, 222], strides = [1, 1]} : vector<1x256xf32> to vector<1x222xf32>
    %368 = tpu.concatenate %366, %367 in 1 : vector<1x34xf32>, vector<1x222xf32> -> vector<1x256xf32>
    %369 = vector.broadcast %9 : f32 to vector<1x256xf32>
    %370 = arith.mulf %369, %365 : vector<1x256xf32>
    %371 = vector.broadcast %58 : f32 to vector<1x256xf32>
    %372 = arith.mulf %371, %368 : vector<1x256xf32>
    %373 = arith.addf %370, %372 : vector<1x256xf32>
    %cst_65 = arith.constant 0.000000e+00 : f32
    %374 = vector.broadcast %cst_65 : f32 to vector<1x256xf32>
    %375 = arith.select %362, %373, %374 : vector<1x256xi1>, vector<1x256xf32>
    %376 = arith.addf %361, %375 : vector<1x256xf32>
    %377 = arith.andi %127, %199 : vector<1x256xi1>
    %378 = vector.extract_strided_slice %239 {offsets = [0, 223], sizes = [1, 33], strides = [1, 1]} : vector<1x256xf32> to vector<1x33xf32>
    %379 = vector.extract_strided_slice %239 {offsets = [0, 0], sizes = [1, 223], strides = [1, 1]} : vector<1x256xf32> to vector<1x223xf32>
    %380 = tpu.concatenate %378, %379 in 1 : vector<1x33xf32>, vector<1x223xf32> -> vector<1x256xf32>
    %381 = vector.extract_strided_slice %240 {offsets = [0, 223], sizes = [1, 33], strides = [1, 1]} : vector<1x256xf32> to vector<1x33xf32>
    %382 = vector.extract_strided_slice %240 {offsets = [0, 0], sizes = [1, 223], strides = [1, 1]} : vector<1x256xf32> to vector<1x223xf32>
    %383 = tpu.concatenate %381, %382 in 1 : vector<1x33xf32>, vector<1x223xf32> -> vector<1x256xf32>
    %384 = vector.broadcast %10 : f32 to vector<1x256xf32>
    %385 = arith.mulf %384, %380 : vector<1x256xf32>
    %386 = vector.broadcast %59 : f32 to vector<1x256xf32>
    %387 = arith.mulf %386, %383 : vector<1x256xf32>
    %388 = arith.addf %385, %387 : vector<1x256xf32>
    %cst_66 = arith.constant 0.000000e+00 : f32
    %389 = vector.broadcast %cst_66 : f32 to vector<1x256xf32>
    %390 = arith.select %377, %388, %389 : vector<1x256xi1>, vector<1x256xf32>
    %391 = arith.addf %376, %390 : vector<1x256xf32>
    %392 = arith.andi %127, %208 : vector<1x256xi1>
    %393 = vector.extract_strided_slice %239 {offsets = [0, 224], sizes = [1, 32], strides = [1, 1]} : vector<1x256xf32> to vector<1x32xf32>
    %394 = vector.extract_strided_slice %239 {offsets = [0, 0], sizes = [1, 224], strides = [1, 1]} : vector<1x256xf32> to vector<1x224xf32>
    %395 = tpu.concatenate %393, %394 in 1 : vector<1x32xf32>, vector<1x224xf32> -> vector<1x256xf32>
    %396 = vector.extract_strided_slice %240 {offsets = [0, 224], sizes = [1, 32], strides = [1, 1]} : vector<1x256xf32> to vector<1x32xf32>
    %397 = vector.extract_strided_slice %240 {offsets = [0, 0], sizes = [1, 224], strides = [1, 1]} : vector<1x256xf32> to vector<1x224xf32>
    %398 = tpu.concatenate %396, %397 in 1 : vector<1x32xf32>, vector<1x224xf32> -> vector<1x256xf32>
    %399 = vector.broadcast %11 : f32 to vector<1x256xf32>
    %400 = arith.mulf %399, %395 : vector<1x256xf32>
    %401 = vector.broadcast %60 : f32 to vector<1x256xf32>
    %402 = arith.mulf %401, %398 : vector<1x256xf32>
    %403 = arith.addf %400, %402 : vector<1x256xf32>
    %cst_67 = arith.constant 0.000000e+00 : f32
    %404 = vector.broadcast %cst_67 : f32 to vector<1x256xf32>
    %405 = arith.select %392, %403, %404 : vector<1x256xi1>, vector<1x256xf32>
    %406 = arith.addf %391, %405 : vector<1x256xf32>
    %407 = arith.andi %127, %217 : vector<1x256xi1>
    %408 = vector.extract_strided_slice %239 {offsets = [0, 225], sizes = [1, 31], strides = [1, 1]} : vector<1x256xf32> to vector<1x31xf32>
    %409 = vector.extract_strided_slice %239 {offsets = [0, 0], sizes = [1, 225], strides = [1, 1]} : vector<1x256xf32> to vector<1x225xf32>
    %410 = tpu.concatenate %408, %409 in 1 : vector<1x31xf32>, vector<1x225xf32> -> vector<1x256xf32>
    %411 = vector.extract_strided_slice %240 {offsets = [0, 225], sizes = [1, 31], strides = [1, 1]} : vector<1x256xf32> to vector<1x31xf32>
    %412 = vector.extract_strided_slice %240 {offsets = [0, 0], sizes = [1, 225], strides = [1, 1]} : vector<1x256xf32> to vector<1x225xf32>
    %413 = tpu.concatenate %411, %412 in 1 : vector<1x31xf32>, vector<1x225xf32> -> vector<1x256xf32>
    %414 = vector.broadcast %12 : f32 to vector<1x256xf32>
    %415 = arith.mulf %414, %410 : vector<1x256xf32>
    %416 = vector.broadcast %61 : f32 to vector<1x256xf32>
    %417 = arith.mulf %416, %413 : vector<1x256xf32>
    %418 = arith.addf %415, %417 : vector<1x256xf32>
    %cst_68 = arith.constant 0.000000e+00 : f32
    %419 = vector.broadcast %cst_68 : f32 to vector<1x256xf32>
    %420 = arith.select %407, %418, %419 : vector<1x256xi1>, vector<1x256xf32>
    %421 = arith.addf %406, %420 : vector<1x256xf32>
    %422 = arith.andi %127, %226 : vector<1x256xi1>
    %423 = vector.extract_strided_slice %239 {offsets = [0, 226], sizes = [1, 30], strides = [1, 1]} : vector<1x256xf32> to vector<1x30xf32>
    %424 = vector.extract_strided_slice %239 {offsets = [0, 0], sizes = [1, 226], strides = [1, 1]} : vector<1x256xf32> to vector<1x226xf32>
    %425 = tpu.concatenate %423, %424 in 1 : vector<1x30xf32>, vector<1x226xf32> -> vector<1x256xf32>
    %426 = vector.extract_strided_slice %240 {offsets = [0, 226], sizes = [1, 30], strides = [1, 1]} : vector<1x256xf32> to vector<1x30xf32>
    %427 = vector.extract_strided_slice %240 {offsets = [0, 0], sizes = [1, 226], strides = [1, 1]} : vector<1x256xf32> to vector<1x226xf32>
    %428 = tpu.concatenate %426, %427 in 1 : vector<1x30xf32>, vector<1x226xf32> -> vector<1x256xf32>
    %429 = vector.broadcast %13 : f32 to vector<1x256xf32>
    %430 = arith.mulf %429, %425 : vector<1x256xf32>
    %431 = vector.broadcast %62 : f32 to vector<1x256xf32>
    %432 = arith.mulf %431, %428 : vector<1x256xf32>
    %433 = arith.addf %430, %432 : vector<1x256xf32>
    %cst_69 = arith.constant 0.000000e+00 : f32
    %434 = vector.broadcast %cst_69 : f32 to vector<1x256xf32>
    %435 = arith.select %422, %433, %434 : vector<1x256xi1>, vector<1x256xf32>
    %436 = arith.addf %421, %435 : vector<1x256xf32>
    %437 = arith.andi %127, %235 : vector<1x256xi1>
    %438 = vector.extract_strided_slice %239 {offsets = [0, 227], sizes = [1, 29], strides = [1, 1]} : vector<1x256xf32> to vector<1x29xf32>
    %439 = vector.extract_strided_slice %239 {offsets = [0, 0], sizes = [1, 227], strides = [1, 1]} : vector<1x256xf32> to vector<1x227xf32>
    %440 = tpu.concatenate %438, %439 in 1 : vector<1x29xf32>, vector<1x227xf32> -> vector<1x256xf32>
    %441 = vector.extract_strided_slice %240 {offsets = [0, 227], sizes = [1, 29], strides = [1, 1]} : vector<1x256xf32> to vector<1x29xf32>
    %442 = vector.extract_strided_slice %240 {offsets = [0, 0], sizes = [1, 227], strides = [1, 1]} : vector<1x256xf32> to vector<1x227xf32>
    %443 = tpu.concatenate %441, %442 in 1 : vector<1x29xf32>, vector<1x227xf32> -> vector<1x256xf32>
    %444 = vector.broadcast %14 : f32 to vector<1x256xf32>
    %445 = arith.mulf %444, %440 : vector<1x256xf32>
    %446 = vector.broadcast %63 : f32 to vector<1x256xf32>
    %447 = arith.mulf %446, %443 : vector<1x256xf32>
    %448 = arith.addf %445, %447 : vector<1x256xf32>
    %cst_70 = arith.constant 0.000000e+00 : f32
    %449 = vector.broadcast %cst_70 : f32 to vector<1x256xf32>
    %450 = arith.select %437, %448, %449 : vector<1x256xi1>, vector<1x256xf32>
    %451 = arith.addf %436, %450 : vector<1x256xf32>
    %452 = arith.andi %136, %181 : vector<1x256xi1>
    %453 = vector.extract_strided_slice %239 {offsets = [0, 237], sizes = [1, 19], strides = [1, 1]} : vector<1x256xf32> to vector<1x19xf32>
    %454 = vector.extract_strided_slice %239 {offsets = [0, 0], sizes = [1, 237], strides = [1, 1]} : vector<1x256xf32> to vector<1x237xf32>
    %455 = tpu.concatenate %453, %454 in 1 : vector<1x19xf32>, vector<1x237xf32> -> vector<1x256xf32>
    %456 = vector.extract_strided_slice %240 {offsets = [0, 237], sizes = [1, 19], strides = [1, 1]} : vector<1x256xf32> to vector<1x19xf32>
    %457 = vector.extract_strided_slice %240 {offsets = [0, 0], sizes = [1, 237], strides = [1, 1]} : vector<1x256xf32> to vector<1x237xf32>
    %458 = tpu.concatenate %456, %457 in 1 : vector<1x19xf32>, vector<1x237xf32> -> vector<1x256xf32>
    %459 = vector.broadcast %15 : f32 to vector<1x256xf32>
    %460 = arith.mulf %459, %455 : vector<1x256xf32>
    %461 = vector.broadcast %64 : f32 to vector<1x256xf32>
    %462 = arith.mulf %461, %458 : vector<1x256xf32>
    %463 = arith.addf %460, %462 : vector<1x256xf32>
    %cst_71 = arith.constant 0.000000e+00 : f32
    %464 = vector.broadcast %cst_71 : f32 to vector<1x256xf32>
    %465 = arith.select %452, %463, %464 : vector<1x256xi1>, vector<1x256xf32>
    %466 = arith.addf %451, %465 : vector<1x256xf32>
    %467 = arith.andi %136, %190 : vector<1x256xi1>
    %468 = vector.extract_strided_slice %239 {offsets = [0, 238], sizes = [1, 18], strides = [1, 1]} : vector<1x256xf32> to vector<1x18xf32>
    %469 = vector.extract_strided_slice %239 {offsets = [0, 0], sizes = [1, 238], strides = [1, 1]} : vector<1x256xf32> to vector<1x238xf32>
    %470 = tpu.concatenate %468, %469 in 1 : vector<1x18xf32>, vector<1x238xf32> -> vector<1x256xf32>
    %471 = vector.extract_strided_slice %240 {offsets = [0, 238], sizes = [1, 18], strides = [1, 1]} : vector<1x256xf32> to vector<1x18xf32>
    %472 = vector.extract_strided_slice %240 {offsets = [0, 0], sizes = [1, 238], strides = [1, 1]} : vector<1x256xf32> to vector<1x238xf32>
    %473 = tpu.concatenate %471, %472 in 1 : vector<1x18xf32>, vector<1x238xf32> -> vector<1x256xf32>
    %474 = vector.broadcast %16 : f32 to vector<1x256xf32>
    %475 = arith.mulf %474, %470 : vector<1x256xf32>
    %476 = vector.broadcast %65 : f32 to vector<1x256xf32>
    %477 = arith.mulf %476, %473 : vector<1x256xf32>
    %478 = arith.addf %475, %477 : vector<1x256xf32>
    %cst_72 = arith.constant 0.000000e+00 : f32
    %479 = vector.broadcast %cst_72 : f32 to vector<1x256xf32>
    %480 = arith.select %467, %478, %479 : vector<1x256xi1>, vector<1x256xf32>
    %481 = arith.addf %466, %480 : vector<1x256xf32>
    %482 = arith.andi %136, %199 : vector<1x256xi1>
    %483 = vector.extract_strided_slice %239 {offsets = [0, 239], sizes = [1, 17], strides = [1, 1]} : vector<1x256xf32> to vector<1x17xf32>
    %484 = vector.extract_strided_slice %239 {offsets = [0, 0], sizes = [1, 239], strides = [1, 1]} : vector<1x256xf32> to vector<1x239xf32>
    %485 = tpu.concatenate %483, %484 in 1 : vector<1x17xf32>, vector<1x239xf32> -> vector<1x256xf32>
    %486 = vector.extract_strided_slice %240 {offsets = [0, 239], sizes = [1, 17], strides = [1, 1]} : vector<1x256xf32> to vector<1x17xf32>
    %487 = vector.extract_strided_slice %240 {offsets = [0, 0], sizes = [1, 239], strides = [1, 1]} : vector<1x256xf32> to vector<1x239xf32>
    %488 = tpu.concatenate %486, %487 in 1 : vector<1x17xf32>, vector<1x239xf32> -> vector<1x256xf32>
    %489 = vector.broadcast %17 : f32 to vector<1x256xf32>
    %490 = arith.mulf %489, %485 : vector<1x256xf32>
    %491 = vector.broadcast %66 : f32 to vector<1x256xf32>
    %492 = arith.mulf %491, %488 : vector<1x256xf32>
    %493 = arith.addf %490, %492 : vector<1x256xf32>
    %cst_73 = arith.constant 0.000000e+00 : f32
    %494 = vector.broadcast %cst_73 : f32 to vector<1x256xf32>
    %495 = arith.select %482, %493, %494 : vector<1x256xi1>, vector<1x256xf32>
    %496 = arith.addf %481, %495 : vector<1x256xf32>
    %497 = arith.andi %136, %208 : vector<1x256xi1>
    %498 = vector.extract_strided_slice %239 {offsets = [0, 240], sizes = [1, 16], strides = [1, 1]} : vector<1x256xf32> to vector<1x16xf32>
    %499 = vector.extract_strided_slice %239 {offsets = [0, 0], sizes = [1, 240], strides = [1, 1]} : vector<1x256xf32> to vector<1x240xf32>
    %500 = tpu.concatenate %498, %499 in 1 : vector<1x16xf32>, vector<1x240xf32> -> vector<1x256xf32>
    %501 = vector.extract_strided_slice %240 {offsets = [0, 240], sizes = [1, 16], strides = [1, 1]} : vector<1x256xf32> to vector<1x16xf32>
    %502 = vector.extract_strided_slice %240 {offsets = [0, 0], sizes = [1, 240], strides = [1, 1]} : vector<1x256xf32> to vector<1x240xf32>
    %503 = tpu.concatenate %501, %502 in 1 : vector<1x16xf32>, vector<1x240xf32> -> vector<1x256xf32>
    %504 = vector.broadcast %18 : f32 to vector<1x256xf32>
    %505 = arith.mulf %504, %500 : vector<1x256xf32>
    %506 = vector.broadcast %67 : f32 to vector<1x256xf32>
    %507 = arith.mulf %506, %503 : vector<1x256xf32>
    %508 = arith.addf %505, %507 : vector<1x256xf32>
    %cst_74 = arith.constant 0.000000e+00 : f32
    %509 = vector.broadcast %cst_74 : f32 to vector<1x256xf32>
    %510 = arith.select %497, %508, %509 : vector<1x256xi1>, vector<1x256xf32>
    %511 = arith.addf %496, %510 : vector<1x256xf32>
    %512 = arith.andi %136, %217 : vector<1x256xi1>
    %513 = vector.extract_strided_slice %239 {offsets = [0, 241], sizes = [1, 15], strides = [1, 1]} : vector<1x256xf32> to vector<1x15xf32>
    %514 = vector.extract_strided_slice %239 {offsets = [0, 0], sizes = [1, 241], strides = [1, 1]} : vector<1x256xf32> to vector<1x241xf32>
    %515 = tpu.concatenate %513, %514 in 1 : vector<1x15xf32>, vector<1x241xf32> -> vector<1x256xf32>
    %516 = vector.extract_strided_slice %240 {offsets = [0, 241], sizes = [1, 15], strides = [1, 1]} : vector<1x256xf32> to vector<1x15xf32>
    %517 = vector.extract_strided_slice %240 {offsets = [0, 0], sizes = [1, 241], strides = [1, 1]} : vector<1x256xf32> to vector<1x241xf32>
    %518 = tpu.concatenate %516, %517 in 1 : vector<1x15xf32>, vector<1x241xf32> -> vector<1x256xf32>
    %519 = vector.broadcast %19 : f32 to vector<1x256xf32>
    %520 = arith.mulf %519, %515 : vector<1x256xf32>
    %521 = vector.broadcast %68 : f32 to vector<1x256xf32>
    %522 = arith.mulf %521, %518 : vector<1x256xf32>
    %523 = arith.addf %520, %522 : vector<1x256xf32>
    %cst_75 = arith.constant 0.000000e+00 : f32
    %524 = vector.broadcast %cst_75 : f32 to vector<1x256xf32>
    %525 = arith.select %512, %523, %524 : vector<1x256xi1>, vector<1x256xf32>
    %526 = arith.addf %511, %525 : vector<1x256xf32>
    %527 = arith.andi %136, %226 : vector<1x256xi1>
    %528 = vector.extract_strided_slice %239 {offsets = [0, 242], sizes = [1, 14], strides = [1, 1]} : vector<1x256xf32> to vector<1x14xf32>
    %529 = vector.extract_strided_slice %239 {offsets = [0, 0], sizes = [1, 242], strides = [1, 1]} : vector<1x256xf32> to vector<1x242xf32>
    %530 = tpu.concatenate %528, %529 in 1 : vector<1x14xf32>, vector<1x242xf32> -> vector<1x256xf32>
    %531 = vector.extract_strided_slice %240 {offsets = [0, 242], sizes = [1, 14], strides = [1, 1]} : vector<1x256xf32> to vector<1x14xf32>
    %532 = vector.extract_strided_slice %240 {offsets = [0, 0], sizes = [1, 242], strides = [1, 1]} : vector<1x256xf32> to vector<1x242xf32>
    %533 = tpu.concatenate %531, %532 in 1 : vector<1x14xf32>, vector<1x242xf32> -> vector<1x256xf32>
    %534 = vector.broadcast %20 : f32 to vector<1x256xf32>
    %535 = arith.mulf %534, %530 : vector<1x256xf32>
    %536 = vector.broadcast %69 : f32 to vector<1x256xf32>
    %537 = arith.mulf %536, %533 : vector<1x256xf32>
    %538 = arith.addf %535, %537 : vector<1x256xf32>
    %cst_76 = arith.constant 0.000000e+00 : f32
    %539 = vector.broadcast %cst_76 : f32 to vector<1x256xf32>
    %540 = arith.select %527, %538, %539 : vector<1x256xi1>, vector<1x256xf32>
    %541 = arith.addf %526, %540 : vector<1x256xf32>
    %542 = arith.andi %136, %235 : vector<1x256xi1>
    %543 = vector.extract_strided_slice %239 {offsets = [0, 243], sizes = [1, 13], strides = [1, 1]} : vector<1x256xf32> to vector<1x13xf32>
    %544 = vector.extract_strided_slice %239 {offsets = [0, 0], sizes = [1, 243], strides = [1, 1]} : vector<1x256xf32> to vector<1x243xf32>
    %545 = tpu.concatenate %543, %544 in 1 : vector<1x13xf32>, vector<1x243xf32> -> vector<1x256xf32>
    %546 = vector.extract_strided_slice %240 {offsets = [0, 243], sizes = [1, 13], strides = [1, 1]} : vector<1x256xf32> to vector<1x13xf32>
    %547 = vector.extract_strided_slice %240 {offsets = [0, 0], sizes = [1, 243], strides = [1, 1]} : vector<1x256xf32> to vector<1x243xf32>
    %548 = tpu.concatenate %546, %547 in 1 : vector<1x13xf32>, vector<1x243xf32> -> vector<1x256xf32>
    %549 = vector.broadcast %21 : f32 to vector<1x256xf32>
    %550 = arith.mulf %549, %545 : vector<1x256xf32>
    %551 = vector.broadcast %70 : f32 to vector<1x256xf32>
    %552 = arith.mulf %551, %548 : vector<1x256xf32>
    %553 = arith.addf %550, %552 : vector<1x256xf32>
    %cst_77 = arith.constant 0.000000e+00 : f32
    %554 = vector.broadcast %cst_77 : f32 to vector<1x256xf32>
    %555 = arith.select %542, %553, %554 : vector<1x256xi1>, vector<1x256xf32>
    %556 = arith.addf %541, %555 : vector<1x256xf32>
    %557 = arith.andi %145, %181 : vector<1x256xi1>
    %558 = vector.extract_strided_slice %239 {offsets = [0, 253], sizes = [1, 3], strides = [1, 1]} : vector<1x256xf32> to vector<1x3xf32>
    %559 = vector.extract_strided_slice %239 {offsets = [0, 0], sizes = [1, 253], strides = [1, 1]} : vector<1x256xf32> to vector<1x253xf32>
    %560 = tpu.concatenate %558, %559 in 1 : vector<1x3xf32>, vector<1x253xf32> -> vector<1x256xf32>
    %561 = vector.extract_strided_slice %240 {offsets = [0, 253], sizes = [1, 3], strides = [1, 1]} : vector<1x256xf32> to vector<1x3xf32>
    %562 = vector.extract_strided_slice %240 {offsets = [0, 0], sizes = [1, 253], strides = [1, 1]} : vector<1x256xf32> to vector<1x253xf32>
    %563 = tpu.concatenate %561, %562 in 1 : vector<1x3xf32>, vector<1x253xf32> -> vector<1x256xf32>
    %564 = vector.broadcast %22 : f32 to vector<1x256xf32>
    %565 = arith.mulf %564, %560 : vector<1x256xf32>
    %566 = vector.broadcast %71 : f32 to vector<1x256xf32>
    %567 = arith.mulf %566, %563 : vector<1x256xf32>
    %568 = arith.addf %565, %567 : vector<1x256xf32>
    %cst_78 = arith.constant 0.000000e+00 : f32
    %569 = vector.broadcast %cst_78 : f32 to vector<1x256xf32>
    %570 = arith.select %557, %568, %569 : vector<1x256xi1>, vector<1x256xf32>
    %571 = arith.addf %556, %570 : vector<1x256xf32>
    %572 = arith.andi %145, %190 : vector<1x256xi1>
    %573 = vector.extract_strided_slice %239 {offsets = [0, 254], sizes = [1, 2], strides = [1, 1]} : vector<1x256xf32> to vector<1x2xf32>
    %574 = vector.extract_strided_slice %239 {offsets = [0, 0], sizes = [1, 254], strides = [1, 1]} : vector<1x256xf32> to vector<1x254xf32>
    %575 = tpu.concatenate %573, %574 in 1 : vector<1x2xf32>, vector<1x254xf32> -> vector<1x256xf32>
    %576 = vector.extract_strided_slice %240 {offsets = [0, 254], sizes = [1, 2], strides = [1, 1]} : vector<1x256xf32> to vector<1x2xf32>
    %577 = vector.extract_strided_slice %240 {offsets = [0, 0], sizes = [1, 254], strides = [1, 1]} : vector<1x256xf32> to vector<1x254xf32>
    %578 = tpu.concatenate %576, %577 in 1 : vector<1x2xf32>, vector<1x254xf32> -> vector<1x256xf32>
    %579 = vector.broadcast %23 : f32 to vector<1x256xf32>
    %580 = arith.mulf %579, %575 : vector<1x256xf32>
    %581 = vector.broadcast %72 : f32 to vector<1x256xf32>
    %582 = arith.mulf %581, %578 : vector<1x256xf32>
    %583 = arith.addf %580, %582 : vector<1x256xf32>
    %cst_79 = arith.constant 0.000000e+00 : f32
    %584 = vector.broadcast %cst_79 : f32 to vector<1x256xf32>
    %585 = arith.select %572, %583, %584 : vector<1x256xi1>, vector<1x256xf32>
    %586 = arith.addf %571, %585 : vector<1x256xf32>
    %587 = arith.andi %145, %199 : vector<1x256xi1>
    %588 = vector.extract_strided_slice %239 {offsets = [0, 255], sizes = [1, 1], strides = [1, 1]} : vector<1x256xf32> to vector<1x1xf32>
    %589 = vector.extract_strided_slice %239 {offsets = [0, 0], sizes = [1, 255], strides = [1, 1]} : vector<1x256xf32> to vector<1x255xf32>
    %590 = tpu.concatenate %588, %589 in 1 : vector<1x1xf32>, vector<1x255xf32> -> vector<1x256xf32>
    %591 = vector.extract_strided_slice %240 {offsets = [0, 255], sizes = [1, 1], strides = [1, 1]} : vector<1x256xf32> to vector<1x1xf32>
    %592 = vector.extract_strided_slice %240 {offsets = [0, 0], sizes = [1, 255], strides = [1, 1]} : vector<1x256xf32> to vector<1x255xf32>
    %593 = tpu.concatenate %591, %592 in 1 : vector<1x1xf32>, vector<1x255xf32> -> vector<1x256xf32>
    %594 = vector.broadcast %24 : f32 to vector<1x256xf32>
    %595 = arith.mulf %594, %590 : vector<1x256xf32>
    %596 = vector.broadcast %73 : f32 to vector<1x256xf32>
    %597 = arith.mulf %596, %593 : vector<1x256xf32>
    %598 = arith.addf %595, %597 : vector<1x256xf32>
    %cst_80 = arith.constant 0.000000e+00 : f32
    %599 = vector.broadcast %cst_80 : f32 to vector<1x256xf32>
    %600 = arith.select %587, %598, %599 : vector<1x256xi1>, vector<1x256xf32>
    %601 = arith.addf %586, %600 : vector<1x256xf32>
    %602 = arith.andi %145, %208 : vector<1x256xi1>
    %603 = vector.broadcast %25 : f32 to vector<1x256xf32>
    %604 = arith.mulf %603, %239 : vector<1x256xf32>
    %605 = vector.broadcast %74 : f32 to vector<1x256xf32>
    %606 = arith.mulf %605, %240 : vector<1x256xf32>
    %607 = arith.addf %604, %606 : vector<1x256xf32>
    %cst_81 = arith.constant 0.000000e+00 : f32
    %608 = vector.broadcast %cst_81 : f32 to vector<1x256xf32>
    %609 = arith.select %602, %607, %608 : vector<1x256xi1>, vector<1x256xf32>
    %610 = arith.addf %601, %609 : vector<1x256xf32>
    %611 = arith.andi %145, %217 : vector<1x256xi1>
    %612 = vector.extract_strided_slice %239 {offsets = [0, 1], sizes = [1, 255], strides = [1, 1]} : vector<1x256xf32> to vector<1x255xf32>
    %613 = vector.extract_strided_slice %239 {offsets = [0, 0], sizes = [1, 1], strides = [1, 1]} : vector<1x256xf32> to vector<1x1xf32>
    %614 = tpu.concatenate %612, %613 in 1 : vector<1x255xf32>, vector<1x1xf32> -> vector<1x256xf32>
    %615 = vector.extract_strided_slice %240 {offsets = [0, 1], sizes = [1, 255], strides = [1, 1]} : vector<1x256xf32> to vector<1x255xf32>
    %616 = vector.extract_strided_slice %240 {offsets = [0, 0], sizes = [1, 1], strides = [1, 1]} : vector<1x256xf32> to vector<1x1xf32>
    %617 = tpu.concatenate %615, %616 in 1 : vector<1x255xf32>, vector<1x1xf32> -> vector<1x256xf32>
    %618 = vector.broadcast %26 : f32 to vector<1x256xf32>
    %619 = arith.mulf %618, %614 : vector<1x256xf32>
    %620 = vector.broadcast %75 : f32 to vector<1x256xf32>
    %621 = arith.mulf %620, %617 : vector<1x256xf32>
    %622 = arith.addf %619, %621 : vector<1x256xf32>
    %cst_82 = arith.constant 0.000000e+00 : f32
    %623 = vector.broadcast %cst_82 : f32 to vector<1x256xf32>
    %624 = arith.select %611, %622, %623 : vector<1x256xi1>, vector<1x256xf32>
    %625 = arith.addf %610, %624 : vector<1x256xf32>
    %626 = arith.andi %145, %226 : vector<1x256xi1>
    %627 = vector.extract_strided_slice %239 {offsets = [0, 2], sizes = [1, 254], strides = [1, 1]} : vector<1x256xf32> to vector<1x254xf32>
    %628 = vector.extract_strided_slice %239 {offsets = [0, 0], sizes = [1, 2], strides = [1, 1]} : vector<1x256xf32> to vector<1x2xf32>
    %629 = tpu.concatenate %627, %628 in 1 : vector<1x254xf32>, vector<1x2xf32> -> vector<1x256xf32>
    %630 = vector.extract_strided_slice %240 {offsets = [0, 2], sizes = [1, 254], strides = [1, 1]} : vector<1x256xf32> to vector<1x254xf32>
    %631 = vector.extract_strided_slice %240 {offsets = [0, 0], sizes = [1, 2], strides = [1, 1]} : vector<1x256xf32> to vector<1x2xf32>
    %632 = tpu.concatenate %630, %631 in 1 : vector<1x254xf32>, vector<1x2xf32> -> vector<1x256xf32>
    %633 = vector.broadcast %27 : f32 to vector<1x256xf32>
    %634 = arith.mulf %633, %629 : vector<1x256xf32>
    %635 = vector.broadcast %76 : f32 to vector<1x256xf32>
    %636 = arith.mulf %635, %632 : vector<1x256xf32>
    %637 = arith.addf %634, %636 : vector<1x256xf32>
    %cst_83 = arith.constant 0.000000e+00 : f32
    %638 = vector.broadcast %cst_83 : f32 to vector<1x256xf32>
    %639 = arith.select %626, %637, %638 : vector<1x256xi1>, vector<1x256xf32>
    %640 = arith.addf %625, %639 : vector<1x256xf32>
    %641 = arith.andi %145, %235 : vector<1x256xi1>
    %642 = vector.extract_strided_slice %239 {offsets = [0, 3], sizes = [1, 253], strides = [1, 1]} : vector<1x256xf32> to vector<1x253xf32>
    %643 = vector.extract_strided_slice %239 {offsets = [0, 0], sizes = [1, 3], strides = [1, 1]} : vector<1x256xf32> to vector<1x3xf32>
    %644 = tpu.concatenate %642, %643 in 1 : vector<1x253xf32>, vector<1x3xf32> -> vector<1x256xf32>
    %645 = vector.extract_strided_slice %240 {offsets = [0, 3], sizes = [1, 253], strides = [1, 1]} : vector<1x256xf32> to vector<1x253xf32>
    %646 = vector.extract_strided_slice %240 {offsets = [0, 0], sizes = [1, 3], strides = [1, 1]} : vector<1x256xf32> to vector<1x3xf32>
    %647 = tpu.concatenate %645, %646 in 1 : vector<1x253xf32>, vector<1x3xf32> -> vector<1x256xf32>
    %648 = vector.broadcast %28 : f32 to vector<1x256xf32>
    %649 = arith.mulf %648, %644 : vector<1x256xf32>
    %650 = vector.broadcast %77 : f32 to vector<1x256xf32>
    %651 = arith.mulf %650, %647 : vector<1x256xf32>
    %652 = arith.addf %649, %651 : vector<1x256xf32>
    %cst_84 = arith.constant 0.000000e+00 : f32
    %653 = vector.broadcast %cst_84 : f32 to vector<1x256xf32>
    %654 = arith.select %641, %652, %653 : vector<1x256xi1>, vector<1x256xf32>
    %655 = arith.addf %640, %654 : vector<1x256xf32>
    %656 = arith.andi %154, %181 : vector<1x256xi1>
    %657 = vector.extract_strided_slice %239 {offsets = [0, 13], sizes = [1, 243], strides = [1, 1]} : vector<1x256xf32> to vector<1x243xf32>
    %658 = vector.extract_strided_slice %239 {offsets = [0, 0], sizes = [1, 13], strides = [1, 1]} : vector<1x256xf32> to vector<1x13xf32>
    %659 = tpu.concatenate %657, %658 in 1 : vector<1x243xf32>, vector<1x13xf32> -> vector<1x256xf32>
    %660 = vector.extract_strided_slice %240 {offsets = [0, 13], sizes = [1, 243], strides = [1, 1]} : vector<1x256xf32> to vector<1x243xf32>
    %661 = vector.extract_strided_slice %240 {offsets = [0, 0], sizes = [1, 13], strides = [1, 1]} : vector<1x256xf32> to vector<1x13xf32>
    %662 = tpu.concatenate %660, %661 in 1 : vector<1x243xf32>, vector<1x13xf32> -> vector<1x256xf32>
    %663 = vector.broadcast %29 : f32 to vector<1x256xf32>
    %664 = arith.mulf %663, %659 : vector<1x256xf32>
    %665 = vector.broadcast %78 : f32 to vector<1x256xf32>
    %666 = arith.mulf %665, %662 : vector<1x256xf32>
    %667 = arith.addf %664, %666 : vector<1x256xf32>
    %cst_85 = arith.constant 0.000000e+00 : f32
    %668 = vector.broadcast %cst_85 : f32 to vector<1x256xf32>
    %669 = arith.select %656, %667, %668 : vector<1x256xi1>, vector<1x256xf32>
    %670 = arith.addf %655, %669 : vector<1x256xf32>
    %671 = arith.andi %154, %190 : vector<1x256xi1>
    %672 = vector.extract_strided_slice %239 {offsets = [0, 14], sizes = [1, 242], strides = [1, 1]} : vector<1x256xf32> to vector<1x242xf32>
    %673 = vector.extract_strided_slice %239 {offsets = [0, 0], sizes = [1, 14], strides = [1, 1]} : vector<1x256xf32> to vector<1x14xf32>
    %674 = tpu.concatenate %672, %673 in 1 : vector<1x242xf32>, vector<1x14xf32> -> vector<1x256xf32>
    %675 = vector.extract_strided_slice %240 {offsets = [0, 14], sizes = [1, 242], strides = [1, 1]} : vector<1x256xf32> to vector<1x242xf32>
    %676 = vector.extract_strided_slice %240 {offsets = [0, 0], sizes = [1, 14], strides = [1, 1]} : vector<1x256xf32> to vector<1x14xf32>
    %677 = tpu.concatenate %675, %676 in 1 : vector<1x242xf32>, vector<1x14xf32> -> vector<1x256xf32>
    %678 = vector.broadcast %30 : f32 to vector<1x256xf32>
    %679 = arith.mulf %678, %674 : vector<1x256xf32>
    %680 = vector.broadcast %79 : f32 to vector<1x256xf32>
    %681 = arith.mulf %680, %677 : vector<1x256xf32>
    %682 = arith.addf %679, %681 : vector<1x256xf32>
    %cst_86 = arith.constant 0.000000e+00 : f32
    %683 = vector.broadcast %cst_86 : f32 to vector<1x256xf32>
    %684 = arith.select %671, %682, %683 : vector<1x256xi1>, vector<1x256xf32>
    %685 = arith.addf %670, %684 : vector<1x256xf32>
    %686 = arith.andi %154, %199 : vector<1x256xi1>
    %687 = vector.extract_strided_slice %239 {offsets = [0, 15], sizes = [1, 241], strides = [1, 1]} : vector<1x256xf32> to vector<1x241xf32>
    %688 = vector.extract_strided_slice %239 {offsets = [0, 0], sizes = [1, 15], strides = [1, 1]} : vector<1x256xf32> to vector<1x15xf32>
    %689 = tpu.concatenate %687, %688 in 1 : vector<1x241xf32>, vector<1x15xf32> -> vector<1x256xf32>
    %690 = vector.extract_strided_slice %240 {offsets = [0, 15], sizes = [1, 241], strides = [1, 1]} : vector<1x256xf32> to vector<1x241xf32>
    %691 = vector.extract_strided_slice %240 {offsets = [0, 0], sizes = [1, 15], strides = [1, 1]} : vector<1x256xf32> to vector<1x15xf32>
    %692 = tpu.concatenate %690, %691 in 1 : vector<1x241xf32>, vector<1x15xf32> -> vector<1x256xf32>
    %693 = vector.broadcast %31 : f32 to vector<1x256xf32>
    %694 = arith.mulf %693, %689 : vector<1x256xf32>
    %695 = vector.broadcast %80 : f32 to vector<1x256xf32>
    %696 = arith.mulf %695, %692 : vector<1x256xf32>
    %697 = arith.addf %694, %696 : vector<1x256xf32>
    %cst_87 = arith.constant 0.000000e+00 : f32
    %698 = vector.broadcast %cst_87 : f32 to vector<1x256xf32>
    %699 = arith.select %686, %697, %698 : vector<1x256xi1>, vector<1x256xf32>
    %700 = arith.addf %685, %699 : vector<1x256xf32>
    %701 = arith.andi %154, %208 : vector<1x256xi1>
    %702 = vector.extract_strided_slice %239 {offsets = [0, 16], sizes = [1, 240], strides = [1, 1]} : vector<1x256xf32> to vector<1x240xf32>
    %703 = vector.extract_strided_slice %239 {offsets = [0, 0], sizes = [1, 16], strides = [1, 1]} : vector<1x256xf32> to vector<1x16xf32>
    %704 = tpu.concatenate %702, %703 in 1 : vector<1x240xf32>, vector<1x16xf32> -> vector<1x256xf32>
    %705 = vector.extract_strided_slice %240 {offsets = [0, 16], sizes = [1, 240], strides = [1, 1]} : vector<1x256xf32> to vector<1x240xf32>
    %706 = vector.extract_strided_slice %240 {offsets = [0, 0], sizes = [1, 16], strides = [1, 1]} : vector<1x256xf32> to vector<1x16xf32>
    %707 = tpu.concatenate %705, %706 in 1 : vector<1x240xf32>, vector<1x16xf32> -> vector<1x256xf32>
    %708 = vector.broadcast %32 : f32 to vector<1x256xf32>
    %709 = arith.mulf %708, %704 : vector<1x256xf32>
    %710 = vector.broadcast %81 : f32 to vector<1x256xf32>
    %711 = arith.mulf %710, %707 : vector<1x256xf32>
    %712 = arith.addf %709, %711 : vector<1x256xf32>
    %cst_88 = arith.constant 0.000000e+00 : f32
    %713 = vector.broadcast %cst_88 : f32 to vector<1x256xf32>
    %714 = arith.select %701, %712, %713 : vector<1x256xi1>, vector<1x256xf32>
    %715 = arith.addf %700, %714 : vector<1x256xf32>
    %716 = arith.andi %154, %217 : vector<1x256xi1>
    %717 = vector.extract_strided_slice %239 {offsets = [0, 17], sizes = [1, 239], strides = [1, 1]} : vector<1x256xf32> to vector<1x239xf32>
    %718 = vector.extract_strided_slice %239 {offsets = [0, 0], sizes = [1, 17], strides = [1, 1]} : vector<1x256xf32> to vector<1x17xf32>
    %719 = tpu.concatenate %717, %718 in 1 : vector<1x239xf32>, vector<1x17xf32> -> vector<1x256xf32>
    %720 = vector.extract_strided_slice %240 {offsets = [0, 17], sizes = [1, 239], strides = [1, 1]} : vector<1x256xf32> to vector<1x239xf32>
    %721 = vector.extract_strided_slice %240 {offsets = [0, 0], sizes = [1, 17], strides = [1, 1]} : vector<1x256xf32> to vector<1x17xf32>
    %722 = tpu.concatenate %720, %721 in 1 : vector<1x239xf32>, vector<1x17xf32> -> vector<1x256xf32>
    %723 = vector.broadcast %33 : f32 to vector<1x256xf32>
    %724 = arith.mulf %723, %719 : vector<1x256xf32>
    %725 = vector.broadcast %82 : f32 to vector<1x256xf32>
    %726 = arith.mulf %725, %722 : vector<1x256xf32>
    %727 = arith.addf %724, %726 : vector<1x256xf32>
    %cst_89 = arith.constant 0.000000e+00 : f32
    %728 = vector.broadcast %cst_89 : f32 to vector<1x256xf32>
    %729 = arith.select %716, %727, %728 : vector<1x256xi1>, vector<1x256xf32>
    %730 = arith.addf %715, %729 : vector<1x256xf32>
    %731 = arith.andi %154, %226 : vector<1x256xi1>
    %732 = vector.extract_strided_slice %239 {offsets = [0, 18], sizes = [1, 238], strides = [1, 1]} : vector<1x256xf32> to vector<1x238xf32>
    %733 = vector.extract_strided_slice %239 {offsets = [0, 0], sizes = [1, 18], strides = [1, 1]} : vector<1x256xf32> to vector<1x18xf32>
    %734 = tpu.concatenate %732, %733 in 1 : vector<1x238xf32>, vector<1x18xf32> -> vector<1x256xf32>
    %735 = vector.extract_strided_slice %240 {offsets = [0, 18], sizes = [1, 238], strides = [1, 1]} : vector<1x256xf32> to vector<1x238xf32>
    %736 = vector.extract_strided_slice %240 {offsets = [0, 0], sizes = [1, 18], strides = [1, 1]} : vector<1x256xf32> to vector<1x18xf32>
    %737 = tpu.concatenate %735, %736 in 1 : vector<1x238xf32>, vector<1x18xf32> -> vector<1x256xf32>
    %738 = vector.broadcast %34 : f32 to vector<1x256xf32>
    %739 = arith.mulf %738, %734 : vector<1x256xf32>
    %740 = vector.broadcast %83 : f32 to vector<1x256xf32>
    %741 = arith.mulf %740, %737 : vector<1x256xf32>
    %742 = arith.addf %739, %741 : vector<1x256xf32>
    %cst_90 = arith.constant 0.000000e+00 : f32
    %743 = vector.broadcast %cst_90 : f32 to vector<1x256xf32>
    %744 = arith.select %731, %742, %743 : vector<1x256xi1>, vector<1x256xf32>
    %745 = arith.addf %730, %744 : vector<1x256xf32>
    %746 = arith.andi %154, %235 : vector<1x256xi1>
    %747 = vector.extract_strided_slice %239 {offsets = [0, 19], sizes = [1, 237], strides = [1, 1]} : vector<1x256xf32> to vector<1x237xf32>
    %748 = vector.extract_strided_slice %239 {offsets = [0, 0], sizes = [1, 19], strides = [1, 1]} : vector<1x256xf32> to vector<1x19xf32>
    %749 = tpu.concatenate %747, %748 in 1 : vector<1x237xf32>, vector<1x19xf32> -> vector<1x256xf32>
    %750 = vector.extract_strided_slice %240 {offsets = [0, 19], sizes = [1, 237], strides = [1, 1]} : vector<1x256xf32> to vector<1x237xf32>
    %751 = vector.extract_strided_slice %240 {offsets = [0, 0], sizes = [1, 19], strides = [1, 1]} : vector<1x256xf32> to vector<1x19xf32>
    %752 = tpu.concatenate %750, %751 in 1 : vector<1x237xf32>, vector<1x19xf32> -> vector<1x256xf32>
    %753 = vector.broadcast %35 : f32 to vector<1x256xf32>
    %754 = arith.mulf %753, %749 : vector<1x256xf32>
    %755 = vector.broadcast %84 : f32 to vector<1x256xf32>
    %756 = arith.mulf %755, %752 : vector<1x256xf32>
    %757 = arith.addf %754, %756 : vector<1x256xf32>
    %cst_91 = arith.constant 0.000000e+00 : f32
    %758 = vector.broadcast %cst_91 : f32 to vector<1x256xf32>
    %759 = arith.select %746, %757, %758 : vector<1x256xi1>, vector<1x256xf32>
    %760 = arith.addf %745, %759 : vector<1x256xf32>
    %761 = arith.andi %163, %181 : vector<1x256xi1>
    %762 = vector.extract_strided_slice %239 {offsets = [0, 29], sizes = [1, 227], strides = [1, 1]} : vector<1x256xf32> to vector<1x227xf32>
    %763 = vector.extract_strided_slice %239 {offsets = [0, 0], sizes = [1, 29], strides = [1, 1]} : vector<1x256xf32> to vector<1x29xf32>
    %764 = tpu.concatenate %762, %763 in 1 : vector<1x227xf32>, vector<1x29xf32> -> vector<1x256xf32>
    %765 = vector.extract_strided_slice %240 {offsets = [0, 29], sizes = [1, 227], strides = [1, 1]} : vector<1x256xf32> to vector<1x227xf32>
    %766 = vector.extract_strided_slice %240 {offsets = [0, 0], sizes = [1, 29], strides = [1, 1]} : vector<1x256xf32> to vector<1x29xf32>
    %767 = tpu.concatenate %765, %766 in 1 : vector<1x227xf32>, vector<1x29xf32> -> vector<1x256xf32>
    %768 = vector.broadcast %36 : f32 to vector<1x256xf32>
    %769 = arith.mulf %768, %764 : vector<1x256xf32>
    %770 = vector.broadcast %85 : f32 to vector<1x256xf32>
    %771 = arith.mulf %770, %767 : vector<1x256xf32>
    %772 = arith.addf %769, %771 : vector<1x256xf32>
    %cst_92 = arith.constant 0.000000e+00 : f32
    %773 = vector.broadcast %cst_92 : f32 to vector<1x256xf32>
    %774 = arith.select %761, %772, %773 : vector<1x256xi1>, vector<1x256xf32>
    %775 = arith.addf %760, %774 : vector<1x256xf32>
    %776 = arith.andi %163, %190 : vector<1x256xi1>
    %777 = vector.extract_strided_slice %239 {offsets = [0, 30], sizes = [1, 226], strides = [1, 1]} : vector<1x256xf32> to vector<1x226xf32>
    %778 = vector.extract_strided_slice %239 {offsets = [0, 0], sizes = [1, 30], strides = [1, 1]} : vector<1x256xf32> to vector<1x30xf32>
    %779 = tpu.concatenate %777, %778 in 1 : vector<1x226xf32>, vector<1x30xf32> -> vector<1x256xf32>
    %780 = vector.extract_strided_slice %240 {offsets = [0, 30], sizes = [1, 226], strides = [1, 1]} : vector<1x256xf32> to vector<1x226xf32>
    %781 = vector.extract_strided_slice %240 {offsets = [0, 0], sizes = [1, 30], strides = [1, 1]} : vector<1x256xf32> to vector<1x30xf32>
    %782 = tpu.concatenate %780, %781 in 1 : vector<1x226xf32>, vector<1x30xf32> -> vector<1x256xf32>
    %783 = vector.broadcast %37 : f32 to vector<1x256xf32>
    %784 = arith.mulf %783, %779 : vector<1x256xf32>
    %785 = vector.broadcast %86 : f32 to vector<1x256xf32>
    %786 = arith.mulf %785, %782 : vector<1x256xf32>
    %787 = arith.addf %784, %786 : vector<1x256xf32>
    %cst_93 = arith.constant 0.000000e+00 : f32
    %788 = vector.broadcast %cst_93 : f32 to vector<1x256xf32>
    %789 = arith.select %776, %787, %788 : vector<1x256xi1>, vector<1x256xf32>
    %790 = arith.addf %775, %789 : vector<1x256xf32>
    %791 = arith.andi %163, %199 : vector<1x256xi1>
    %792 = vector.extract_strided_slice %239 {offsets = [0, 31], sizes = [1, 225], strides = [1, 1]} : vector<1x256xf32> to vector<1x225xf32>
    %793 = vector.extract_strided_slice %239 {offsets = [0, 0], sizes = [1, 31], strides = [1, 1]} : vector<1x256xf32> to vector<1x31xf32>
    %794 = tpu.concatenate %792, %793 in 1 : vector<1x225xf32>, vector<1x31xf32> -> vector<1x256xf32>
    %795 = vector.extract_strided_slice %240 {offsets = [0, 31], sizes = [1, 225], strides = [1, 1]} : vector<1x256xf32> to vector<1x225xf32>
    %796 = vector.extract_strided_slice %240 {offsets = [0, 0], sizes = [1, 31], strides = [1, 1]} : vector<1x256xf32> to vector<1x31xf32>
    %797 = tpu.concatenate %795, %796 in 1 : vector<1x225xf32>, vector<1x31xf32> -> vector<1x256xf32>
    %798 = vector.broadcast %38 : f32 to vector<1x256xf32>
    %799 = arith.mulf %798, %794 : vector<1x256xf32>
    %800 = vector.broadcast %87 : f32 to vector<1x256xf32>
    %801 = arith.mulf %800, %797 : vector<1x256xf32>
    %802 = arith.addf %799, %801 : vector<1x256xf32>
    %cst_94 = arith.constant 0.000000e+00 : f32
    %803 = vector.broadcast %cst_94 : f32 to vector<1x256xf32>
    %804 = arith.select %791, %802, %803 : vector<1x256xi1>, vector<1x256xf32>
    %805 = arith.addf %790, %804 : vector<1x256xf32>
    %806 = arith.andi %163, %208 : vector<1x256xi1>
    %807 = vector.extract_strided_slice %239 {offsets = [0, 32], sizes = [1, 224], strides = [1, 1]} : vector<1x256xf32> to vector<1x224xf32>
    %808 = vector.extract_strided_slice %239 {offsets = [0, 0], sizes = [1, 32], strides = [1, 1]} : vector<1x256xf32> to vector<1x32xf32>
    %809 = tpu.concatenate %807, %808 in 1 : vector<1x224xf32>, vector<1x32xf32> -> vector<1x256xf32>
    %810 = vector.extract_strided_slice %240 {offsets = [0, 32], sizes = [1, 224], strides = [1, 1]} : vector<1x256xf32> to vector<1x224xf32>
    %811 = vector.extract_strided_slice %240 {offsets = [0, 0], sizes = [1, 32], strides = [1, 1]} : vector<1x256xf32> to vector<1x32xf32>
    %812 = tpu.concatenate %810, %811 in 1 : vector<1x224xf32>, vector<1x32xf32> -> vector<1x256xf32>
    %813 = vector.broadcast %39 : f32 to vector<1x256xf32>
    %814 = arith.mulf %813, %809 : vector<1x256xf32>
    %815 = vector.broadcast %88 : f32 to vector<1x256xf32>
    %816 = arith.mulf %815, %812 : vector<1x256xf32>
    %817 = arith.addf %814, %816 : vector<1x256xf32>
    %cst_95 = arith.constant 0.000000e+00 : f32
    %818 = vector.broadcast %cst_95 : f32 to vector<1x256xf32>
    %819 = arith.select %806, %817, %818 : vector<1x256xi1>, vector<1x256xf32>
    %820 = arith.addf %805, %819 : vector<1x256xf32>
    %821 = arith.andi %163, %217 : vector<1x256xi1>
    %822 = vector.extract_strided_slice %239 {offsets = [0, 33], sizes = [1, 223], strides = [1, 1]} : vector<1x256xf32> to vector<1x223xf32>
    %823 = vector.extract_strided_slice %239 {offsets = [0, 0], sizes = [1, 33], strides = [1, 1]} : vector<1x256xf32> to vector<1x33xf32>
    %824 = tpu.concatenate %822, %823 in 1 : vector<1x223xf32>, vector<1x33xf32> -> vector<1x256xf32>
    %825 = vector.extract_strided_slice %240 {offsets = [0, 33], sizes = [1, 223], strides = [1, 1]} : vector<1x256xf32> to vector<1x223xf32>
    %826 = vector.extract_strided_slice %240 {offsets = [0, 0], sizes = [1, 33], strides = [1, 1]} : vector<1x256xf32> to vector<1x33xf32>
    %827 = tpu.concatenate %825, %826 in 1 : vector<1x223xf32>, vector<1x33xf32> -> vector<1x256xf32>
    %828 = vector.broadcast %40 : f32 to vector<1x256xf32>
    %829 = arith.mulf %828, %824 : vector<1x256xf32>
    %830 = vector.broadcast %89 : f32 to vector<1x256xf32>
    %831 = arith.mulf %830, %827 : vector<1x256xf32>
    %832 = arith.addf %829, %831 : vector<1x256xf32>
    %cst_96 = arith.constant 0.000000e+00 : f32
    %833 = vector.broadcast %cst_96 : f32 to vector<1x256xf32>
    %834 = arith.select %821, %832, %833 : vector<1x256xi1>, vector<1x256xf32>
    %835 = arith.addf %820, %834 : vector<1x256xf32>
    %836 = arith.andi %163, %226 : vector<1x256xi1>
    %837 = vector.extract_strided_slice %239 {offsets = [0, 34], sizes = [1, 222], strides = [1, 1]} : vector<1x256xf32> to vector<1x222xf32>
    %838 = vector.extract_strided_slice %239 {offsets = [0, 0], sizes = [1, 34], strides = [1, 1]} : vector<1x256xf32> to vector<1x34xf32>
    %839 = tpu.concatenate %837, %838 in 1 : vector<1x222xf32>, vector<1x34xf32> -> vector<1x256xf32>
    %840 = vector.extract_strided_slice %240 {offsets = [0, 34], sizes = [1, 222], strides = [1, 1]} : vector<1x256xf32> to vector<1x222xf32>
    %841 = vector.extract_strided_slice %240 {offsets = [0, 0], sizes = [1, 34], strides = [1, 1]} : vector<1x256xf32> to vector<1x34xf32>
    %842 = tpu.concatenate %840, %841 in 1 : vector<1x222xf32>, vector<1x34xf32> -> vector<1x256xf32>
    %843 = vector.broadcast %41 : f32 to vector<1x256xf32>
    %844 = arith.mulf %843, %839 : vector<1x256xf32>
    %845 = vector.broadcast %90 : f32 to vector<1x256xf32>
    %846 = arith.mulf %845, %842 : vector<1x256xf32>
    %847 = arith.addf %844, %846 : vector<1x256xf32>
    %cst_97 = arith.constant 0.000000e+00 : f32
    %848 = vector.broadcast %cst_97 : f32 to vector<1x256xf32>
    %849 = arith.select %836, %847, %848 : vector<1x256xi1>, vector<1x256xf32>
    %850 = arith.addf %835, %849 : vector<1x256xf32>
    %851 = arith.andi %163, %235 : vector<1x256xi1>
    %852 = vector.extract_strided_slice %239 {offsets = [0, 35], sizes = [1, 221], strides = [1, 1]} : vector<1x256xf32> to vector<1x221xf32>
    %853 = vector.extract_strided_slice %239 {offsets = [0, 0], sizes = [1, 35], strides = [1, 1]} : vector<1x256xf32> to vector<1x35xf32>
    %854 = tpu.concatenate %852, %853 in 1 : vector<1x221xf32>, vector<1x35xf32> -> vector<1x256xf32>
    %855 = vector.extract_strided_slice %240 {offsets = [0, 35], sizes = [1, 221], strides = [1, 1]} : vector<1x256xf32> to vector<1x221xf32>
    %856 = vector.extract_strided_slice %240 {offsets = [0, 0], sizes = [1, 35], strides = [1, 1]} : vector<1x256xf32> to vector<1x35xf32>
    %857 = tpu.concatenate %855, %856 in 1 : vector<1x221xf32>, vector<1x35xf32> -> vector<1x256xf32>
    %858 = vector.broadcast %42 : f32 to vector<1x256xf32>
    %859 = arith.mulf %858, %854 : vector<1x256xf32>
    %860 = vector.broadcast %91 : f32 to vector<1x256xf32>
    %861 = arith.mulf %860, %857 : vector<1x256xf32>
    %862 = arith.addf %859, %861 : vector<1x256xf32>
    %cst_98 = arith.constant 0.000000e+00 : f32
    %863 = vector.broadcast %cst_98 : f32 to vector<1x256xf32>
    %864 = arith.select %851, %862, %863 : vector<1x256xi1>, vector<1x256xf32>
    %865 = arith.addf %850, %864 : vector<1x256xf32>
    %866 = arith.andi %172, %181 : vector<1x256xi1>
    %867 = vector.extract_strided_slice %239 {offsets = [0, 45], sizes = [1, 211], strides = [1, 1]} : vector<1x256xf32> to vector<1x211xf32>
    %868 = vector.extract_strided_slice %239 {offsets = [0, 0], sizes = [1, 45], strides = [1, 1]} : vector<1x256xf32> to vector<1x45xf32>
    %869 = tpu.concatenate %867, %868 in 1 : vector<1x211xf32>, vector<1x45xf32> -> vector<1x256xf32>
    %870 = vector.extract_strided_slice %240 {offsets = [0, 45], sizes = [1, 211], strides = [1, 1]} : vector<1x256xf32> to vector<1x211xf32>
    %871 = vector.extract_strided_slice %240 {offsets = [0, 0], sizes = [1, 45], strides = [1, 1]} : vector<1x256xf32> to vector<1x45xf32>
    %872 = tpu.concatenate %870, %871 in 1 : vector<1x211xf32>, vector<1x45xf32> -> vector<1x256xf32>
    %873 = vector.broadcast %43 : f32 to vector<1x256xf32>
    %874 = arith.mulf %873, %869 : vector<1x256xf32>
    %875 = vector.broadcast %92 : f32 to vector<1x256xf32>
    %876 = arith.mulf %875, %872 : vector<1x256xf32>
    %877 = arith.addf %874, %876 : vector<1x256xf32>
    %cst_99 = arith.constant 0.000000e+00 : f32
    %878 = vector.broadcast %cst_99 : f32 to vector<1x256xf32>
    %879 = arith.select %866, %877, %878 : vector<1x256xi1>, vector<1x256xf32>
    %880 = arith.addf %865, %879 : vector<1x256xf32>
    %881 = arith.andi %172, %190 : vector<1x256xi1>
    %882 = vector.extract_strided_slice %239 {offsets = [0, 46], sizes = [1, 210], strides = [1, 1]} : vector<1x256xf32> to vector<1x210xf32>
    %883 = vector.extract_strided_slice %239 {offsets = [0, 0], sizes = [1, 46], strides = [1, 1]} : vector<1x256xf32> to vector<1x46xf32>
    %884 = tpu.concatenate %882, %883 in 1 : vector<1x210xf32>, vector<1x46xf32> -> vector<1x256xf32>
    %885 = vector.extract_strided_slice %240 {offsets = [0, 46], sizes = [1, 210], strides = [1, 1]} : vector<1x256xf32> to vector<1x210xf32>
    %886 = vector.extract_strided_slice %240 {offsets = [0, 0], sizes = [1, 46], strides = [1, 1]} : vector<1x256xf32> to vector<1x46xf32>
    %887 = tpu.concatenate %885, %886 in 1 : vector<1x210xf32>, vector<1x46xf32> -> vector<1x256xf32>
    %888 = vector.broadcast %44 : f32 to vector<1x256xf32>
    %889 = arith.mulf %888, %884 : vector<1x256xf32>
    %890 = vector.broadcast %93 : f32 to vector<1x256xf32>
    %891 = arith.mulf %890, %887 : vector<1x256xf32>
    %892 = arith.addf %889, %891 : vector<1x256xf32>
    %cst_100 = arith.constant 0.000000e+00 : f32
    %893 = vector.broadcast %cst_100 : f32 to vector<1x256xf32>
    %894 = arith.select %881, %892, %893 : vector<1x256xi1>, vector<1x256xf32>
    %895 = arith.addf %880, %894 : vector<1x256xf32>
    %896 = arith.andi %172, %199 : vector<1x256xi1>
    %897 = vector.extract_strided_slice %239 {offsets = [0, 47], sizes = [1, 209], strides = [1, 1]} : vector<1x256xf32> to vector<1x209xf32>
    %898 = vector.extract_strided_slice %239 {offsets = [0, 0], sizes = [1, 47], strides = [1, 1]} : vector<1x256xf32> to vector<1x47xf32>
    %899 = tpu.concatenate %897, %898 in 1 : vector<1x209xf32>, vector<1x47xf32> -> vector<1x256xf32>
    %900 = vector.extract_strided_slice %240 {offsets = [0, 47], sizes = [1, 209], strides = [1, 1]} : vector<1x256xf32> to vector<1x209xf32>
    %901 = vector.extract_strided_slice %240 {offsets = [0, 0], sizes = [1, 47], strides = [1, 1]} : vector<1x256xf32> to vector<1x47xf32>
    %902 = tpu.concatenate %900, %901 in 1 : vector<1x209xf32>, vector<1x47xf32> -> vector<1x256xf32>
    %903 = vector.broadcast %45 : f32 to vector<1x256xf32>
    %904 = arith.mulf %903, %899 : vector<1x256xf32>
    %905 = vector.broadcast %94 : f32 to vector<1x256xf32>
    %906 = arith.mulf %905, %902 : vector<1x256xf32>
    %907 = arith.addf %904, %906 : vector<1x256xf32>
    %cst_101 = arith.constant 0.000000e+00 : f32
    %908 = vector.broadcast %cst_101 : f32 to vector<1x256xf32>
    %909 = arith.select %896, %907, %908 : vector<1x256xi1>, vector<1x256xf32>
    %910 = arith.addf %895, %909 : vector<1x256xf32>
    %911 = arith.andi %172, %208 : vector<1x256xi1>
    %912 = vector.extract_strided_slice %239 {offsets = [0, 48], sizes = [1, 208], strides = [1, 1]} : vector<1x256xf32> to vector<1x208xf32>
    %913 = vector.extract_strided_slice %239 {offsets = [0, 0], sizes = [1, 48], strides = [1, 1]} : vector<1x256xf32> to vector<1x48xf32>
    %914 = tpu.concatenate %912, %913 in 1 : vector<1x208xf32>, vector<1x48xf32> -> vector<1x256xf32>
    %915 = vector.extract_strided_slice %240 {offsets = [0, 48], sizes = [1, 208], strides = [1, 1]} : vector<1x256xf32> to vector<1x208xf32>
    %916 = vector.extract_strided_slice %240 {offsets = [0, 0], sizes = [1, 48], strides = [1, 1]} : vector<1x256xf32> to vector<1x48xf32>
    %917 = tpu.concatenate %915, %916 in 1 : vector<1x208xf32>, vector<1x48xf32> -> vector<1x256xf32>
    %918 = vector.broadcast %46 : f32 to vector<1x256xf32>
    %919 = arith.mulf %918, %914 : vector<1x256xf32>
    %920 = vector.broadcast %95 : f32 to vector<1x256xf32>
    %921 = arith.mulf %920, %917 : vector<1x256xf32>
    %922 = arith.addf %919, %921 : vector<1x256xf32>
    %cst_102 = arith.constant 0.000000e+00 : f32
    %923 = vector.broadcast %cst_102 : f32 to vector<1x256xf32>
    %924 = arith.select %911, %922, %923 : vector<1x256xi1>, vector<1x256xf32>
    %925 = arith.addf %910, %924 : vector<1x256xf32>
    %926 = arith.andi %172, %217 : vector<1x256xi1>
    %927 = vector.extract_strided_slice %239 {offsets = [0, 49], sizes = [1, 207], strides = [1, 1]} : vector<1x256xf32> to vector<1x207xf32>
    %928 = vector.extract_strided_slice %239 {offsets = [0, 0], sizes = [1, 49], strides = [1, 1]} : vector<1x256xf32> to vector<1x49xf32>
    %929 = tpu.concatenate %927, %928 in 1 : vector<1x207xf32>, vector<1x49xf32> -> vector<1x256xf32>
    %930 = vector.extract_strided_slice %240 {offsets = [0, 49], sizes = [1, 207], strides = [1, 1]} : vector<1x256xf32> to vector<1x207xf32>
    %931 = vector.extract_strided_slice %240 {offsets = [0, 0], sizes = [1, 49], strides = [1, 1]} : vector<1x256xf32> to vector<1x49xf32>
    %932 = tpu.concatenate %930, %931 in 1 : vector<1x207xf32>, vector<1x49xf32> -> vector<1x256xf32>
    %933 = vector.broadcast %47 : f32 to vector<1x256xf32>
    %934 = arith.mulf %933, %929 : vector<1x256xf32>
    %935 = vector.broadcast %96 : f32 to vector<1x256xf32>
    %936 = arith.mulf %935, %932 : vector<1x256xf32>
    %937 = arith.addf %934, %936 : vector<1x256xf32>
    %cst_103 = arith.constant 0.000000e+00 : f32
    %938 = vector.broadcast %cst_103 : f32 to vector<1x256xf32>
    %939 = arith.select %926, %937, %938 : vector<1x256xi1>, vector<1x256xf32>
    %940 = arith.addf %925, %939 : vector<1x256xf32>
    %941 = arith.andi %172, %226 : vector<1x256xi1>
    %942 = vector.extract_strided_slice %239 {offsets = [0, 50], sizes = [1, 206], strides = [1, 1]} : vector<1x256xf32> to vector<1x206xf32>
    %943 = vector.extract_strided_slice %239 {offsets = [0, 0], sizes = [1, 50], strides = [1, 1]} : vector<1x256xf32> to vector<1x50xf32>
    %944 = tpu.concatenate %942, %943 in 1 : vector<1x206xf32>, vector<1x50xf32> -> vector<1x256xf32>
    %945 = vector.extract_strided_slice %240 {offsets = [0, 50], sizes = [1, 206], strides = [1, 1]} : vector<1x256xf32> to vector<1x206xf32>
    %946 = vector.extract_strided_slice %240 {offsets = [0, 0], sizes = [1, 50], strides = [1, 1]} : vector<1x256xf32> to vector<1x50xf32>
    %947 = tpu.concatenate %945, %946 in 1 : vector<1x206xf32>, vector<1x50xf32> -> vector<1x256xf32>
    %948 = vector.broadcast %48 : f32 to vector<1x256xf32>
    %949 = arith.mulf %948, %944 : vector<1x256xf32>
    %950 = vector.broadcast %97 : f32 to vector<1x256xf32>
    %951 = arith.mulf %950, %947 : vector<1x256xf32>
    %952 = arith.addf %949, %951 : vector<1x256xf32>
    %cst_104 = arith.constant 0.000000e+00 : f32
    %953 = vector.broadcast %cst_104 : f32 to vector<1x256xf32>
    %954 = arith.select %941, %952, %953 : vector<1x256xi1>, vector<1x256xf32>
    %955 = arith.addf %940, %954 : vector<1x256xf32>
    %956 = arith.andi %172, %235 : vector<1x256xi1>
    %957 = vector.extract_strided_slice %239 {offsets = [0, 51], sizes = [1, 205], strides = [1, 1]} : vector<1x256xf32> to vector<1x205xf32>
    %958 = vector.extract_strided_slice %239 {offsets = [0, 0], sizes = [1, 51], strides = [1, 1]} : vector<1x256xf32> to vector<1x51xf32>
    %959 = tpu.concatenate %957, %958 in 1 : vector<1x205xf32>, vector<1x51xf32> -> vector<1x256xf32>
    %960 = vector.extract_strided_slice %240 {offsets = [0, 51], sizes = [1, 205], strides = [1, 1]} : vector<1x256xf32> to vector<1x205xf32>
    %961 = vector.extract_strided_slice %240 {offsets = [0, 0], sizes = [1, 51], strides = [1, 1]} : vector<1x256xf32> to vector<1x51xf32>
    %962 = tpu.concatenate %960, %961 in 1 : vector<1x205xf32>, vector<1x51xf32> -> vector<1x256xf32>
    %963 = vector.broadcast %49 : f32 to vector<1x256xf32>
    %964 = arith.mulf %963, %959 : vector<1x256xf32>
    %965 = vector.broadcast %98 : f32 to vector<1x256xf32>
    %966 = arith.mulf %965, %962 : vector<1x256xf32>
    %967 = arith.addf %964, %966 : vector<1x256xf32>
    %cst_105 = arith.constant 0.000000e+00 : f32
    %968 = vector.broadcast %cst_105 : f32 to vector<1x256xf32>
    %969 = arith.select %956, %967, %968 : vector<1x256xi1>, vector<1x256xf32>
    %970 = arith.addf %955, %969 : vector<1x256xf32>
    %971 = arith.negf %970 : vector<1x256xf32>
    %972 = math.exp %971 : vector<1x256xf32>
    %cst_106 = arith.constant 1.000000e+00 : f32
    %973 = vector.broadcast %cst_106 : f32 to vector<1x256xf32>
    %974 = arith.addf %973, %972 : vector<1x256xf32>
    %975 = arith.divf %973, %974 : vector<1x256xf32>
    %c0_107 = arith.constant 0 : index
    %c0_108 = arith.constant 0 : index
    %c0_109 = arith.constant 0 : index
    %976 = vector.load %arg3[%c0_107, %c0_108, %c0_109] : memref<1x4x256xf32, #tpu.memory_space<vmem>>, vector<1x4x256xf32>
    %977 = vector.shape_cast %975 : vector<1x256xf32> to vector<1x1x256xf32>
    %978 = vector.broadcast %977 : vector<1x1x256xf32> to vector<1x4x256xf32>
    %979 = arith.mulf %976, %978 : vector<1x4x256xf32>
    %c0_110 = arith.constant 0 : index
    %c0_111 = arith.constant 0 : index
    %c0_112 = arith.constant 0 : index
    %980 = vector.load %arg4[%c0_110, %c0_111, %c0_112] : memref<1x4x256xf32, #tpu.memory_space<vmem>>, vector<1x4x256xf32>
    tpu.vector_store %arg4[%c0_110, %c0_111, %c0_112], %979 {strides = array<i32>} : memref<1x4x256xf32, #tpu.memory_space<vmem>>, vector<1x4x256xf32>,
    return
  }
  func.func @transform_0(%arg0: i32) -> i32 {
    %c0_i32 = arith.constant 0 : i32
    %c0_i32_0 = arith.constant 0 : i32
    return %c0_i32 : i32
  }
  func.func @transform_1(%arg0: i32) -> i32 {
    %c0_i32 = arith.constant 0 : i32
    %c0_i32_0 = arith.constant 0 : i32
    return %c0_i32 : i32
  }
  func.func @transform_2(%arg0: i32) -> (i32, i32, i32) {
    %c0_i32 = arith.constant 0 : i32
    %c0_i32_0 = arith.constant 0 : i32
    %c0_i32_1 = arith.constant 0 : i32
    return %arg0, %c0_i32, %c0_i32_0 : i32, i32, i32
  }
  func.func @transform_3(%arg0: i32) -> (i32, i32, i32) {
    %c0_i32 = arith.constant 0 : i32
    %c0_i32_0 = arith.constant 0 : i32
    %c0_i32_1 = arith.constant 0 : i32
    return %arg0, %c0_i32, %c0_i32_0 : i32, i32, i32
  }
}

</mosaic_0001>

<bundles_post_ra>
// kernel: spatial_attention.1
= control target key start
LH: loop header
LB: loop body
LE: loop exit
PB: predicated region body
PF: predicated region fallthrough
CT: control target
= control target key end

     0   :  { %s4394_s0 = inlined_call_operand.vmem [shape: f32[98], index: 0, kind: input, shape index: {}]   ;;  %s4395_s1 = inlined_call_operand.<no memory space> [shape: f32[1], index: 1, kind: input, shape index: {}]   ;;  %s4396_s2 = inlined_call_operand.vmem [shape: f32[2,4,256], index: 2, kind: input, shape index: {}]   ;;  %s4397_s3 = inlined_call_operand.vmem [shape: f32[2,4,256], index: 3, kind: output, shape index: {}]  }
   0x1   :  { %8 = sst [smem:[#allocation2]] %s4395_s1 }
   0x2   :  { %9 = vsyncpa [#allocation4], 0  ;;  %s2484_s14 = smov 0  }
   0x3 LB: > { %s2184_s15 = sadd.s32 4294967295, %s2408_s14   ;;  %p2186_p0 = scmp.ge.s32.totalorder %s2408_s14, 1  ;;  %s2408_s14 = sphi %s2484_s14, %s15_s14  }
   0x4   : > { %p114_p1 = scmp.lt.s32.totalorder %s2408_s14, 3  ;;  %s126_s18 = sshll.u32 %s4394_s0, 4  ;;  %s127_s18 = int_to_ptr.vmem [resolvable:$true] %s126_s18 }
   0x5   : > { %p2310_p3 = scmp.eq.s32.totalorder %s2184_s15, 0  ;;  %s2410_s1 = smov [#allocation3]  }
   0x6   : > { %p115_p2 = pnand %p2186_p0, %p114_p1 }
   0x8   : > { %p2306_p4 = pneg %p115_p2  ;;  %150 = sbr.rel (%p115_p2) target bundleno = 710 (0x2c6), region = 32 }
   0xa   : > { %p2307_p5 = pnand %p2310_p3, %p2306_p4 }
   0xc   : > { %2309 = dma.vmem_to_smem (!%p2307_p5), %s127_s18, 16, %s2410_s1, [#allocation4]  }
   0xd   : > { %2403 = dma.done.wait (%p2310_p3), [#allocation4], 16  }
   0xe   : > { %2405 = vsyncadd (%p2310_p3), [#allocation4], 4294967280 }
   0xf   : > { %157 = sfence }
  0x10   : > { %p176_p6 = scmp.lt.s32.totalorder %s2184_s15, 1  ;;  %v2411_v0 = vmov 4.0   ;;  %vm4398_vm0 = vcmask 1043456   ;;  %s2412_s23 = smov 51   ;;  %v2426_v56 = vmov 16.0   ;;  %v285_v61 = vlaneseq }
  0x11   : > { %2371 = vrcp.f32 %v2411_v0  ;;  %s2413_s24 = smov 48   ;;  %s2414_s25 = smov 50   ;;  %vm512_vm3 = vcmask 408576   ;;  %vm477_vm4 = vcmask 416768   ;;  %vm545_vm9 = vcmask 400384  }
  0x12   : > { %s4639_s15 = smov (!%p176_p6, %s2184_s15), 1  ;;  %s2415_s26 = smov 49   ;;  %2373 = vrcp.f32 %v2426_v56  ;;  %v286_v0 = vand.u32 127, %v285_v61 }
  0x13   : > { %s2296_s19 = sshll.u32 %s4639_s15, 3  ;;  %s2416_s27 = smov 47  }
  0x14   : > { %s180_s22 = scalar_lea.vmem %s4396_s2, %s2296_s19  ;;  %s2417_s28 = smov 46  }
  0x15   : > { %v2503_v1 = vld [vmem:[%s180_s22] sm:$0xff]  ;;  %s2418_s29 = smov 45   ;;  %s2419_s30 = smov 35  }
  0x16   : > { %4445 = vst [vmem:[#allocation6_spill] sm:$0xff] %v2503_v1  ;;  %s2420_s4 = smov 34   ;;  %s2421_s5 = smov 33  }
  0x17   : > { %v2372_v2 = vpop.eup %2371  ;;  %419 = vst [vmem:[#allocation1] ss:$2 sm:$0xff] %v2503_v1  ;;  %s2422_s6 = smov 32   ;;  %s2423_s7 = smov 31  }
  0x18   : > { %v440_v3 = vmul.f32 4.0, %v2372_v2  ;;  %vm444_vm1 = vweird.f32 %v2372_v2  ;;  %s2424_s8 = smov 30   ;;  %s2425_s9 = smov 29   ;;  %v2374_v58 = vpop.eup %2373 }
  0x19   : > { %s2427_s10 = smov 19   ;;  %v293_v63 = vmul.f32 16.0, %v2374_v58  ;;  %s2428_s11 = smov 18   ;;  %vm297_vm2 = vweird.f32 %v2374_v58 }
  0x1a   : > { %v441_v4 = vsub.f32 1.0, %v440_v3  ;;  %s2429_s12 = smov 17   ;;  %s2645_s13 = sld [smem:[#allocation3 + $0x1]] }
  0x1b   : > { %s2430_s16 = smov 16   ;;  %s2648_s17 = sld [smem:[#allocation3]] }
  0x1c   : > { %v442_v11 = vmul.f32 %v2372_v2, %v441_v4  ;;  %s2654_s18 = sld [smem:[#allocation3 + $0x31]] }
  0x1d   : > { %s2660_s1 = sld [smem:[#allocation2]] }
  0x1e   : > { %v421_v5 = vld.sshfl [vmem:[#allocation1 + $0x8] sm:$0xff pattern:$0x75316420]  ;;  %v420_v6 = vld.sshfl [vmem:[#allocation1] sm:$0xff pattern:$0x75316420]  ;;  %v443_v16 = vadd.f32 %v2372_v2, %v442_v11 }
  0x1f   : > { %v432_v7 = vsel %vm4398_vm0, %v421_v5, 0.0  ;;  %v425_v8 = vsel %vm4398_vm0, %v420_v6, 0.0  ;;  %448 = vst [vmem:[#allocation1] ss:$2 sm:$0xff] %v2503_v1  ;;  %v287_v5 = vadd.s32 128, %v286_v0  ;;  %s2662_s20 = sld [smem:[#allocation3 + $0x2]] }
  0x20   : > { %v433_v9 = vrot.slane %v432_v7, 4  ;;  %v426_v10 = vrot.slane %v425_v8, 4  ;;  %v445_v27 = vsel %vm444_vm1, %v2372_v2, %v443_v16  ;;  %v294_v2 = vsub.f32 1.0, %v293_v63  ;;  %s2672_s21 = sld [smem:[#allocation3 + $0x3]] }
  0x21   : > { %s2676_s22 = sld [smem:[#allocation3 + $0x33]] }
  0x22   : > { %v434_v12 = vadd.f32 %v433_v9, %v432_v7  ;;  %v427_v13 = vadd.f32 %v426_v10, %v425_v8  ;;  %v295_v7 = vmul.f32 %v2374_v58, %v294_v2  ;;  %v288_v8 = vcvt.s32.f32 %v286_v0 }
  0x23   : > { %v289_v9 = vcvt.s32.f32 %v287_v5  ;;  %v493_v2 = vstv %s2648_s17  ;;  %s3162_s17 = sld [smem:[#allocation3 + $0x3c]] }
  0x24   : > { %v435_v14 = vrot.slane %v434_v12, 2  ;;  %v428_v15 = vrot.slane %v427_v13, 2  ;;  %v296_v10 = vadd.f32 %v2374_v58, %v295_v7  ;;  %v496_v7 = vstv %s2654_s18  ;;  %s3184_s18 = sld [smem:[#allocation3 + $0xb]] }
  0x26   : > { %v436_v17 = vadd.f32 %v435_v14, %v434_v12  ;;  %v429_v18 = vadd.f32 %v428_v15, %v427_v13  ;;  %v450_v19 = vld.sshfl [vmem:[#allocation1 + $0x8] sm:$0xff pattern:$0x75316420]  ;;  %v449_v20 = vld.sshfl [vmem:[#allocation1] sm:$0xff pattern:$0x75316420]  ;;  %v298_v16 = vsel %vm297_vm2, %v2374_v58, %v296_v10 }
  0x27   : > { %v460_v21 = vsel %vm4398_vm0, %v450_v19, -inf  ;;  %v453_v22 = vsel %vm4398_vm0, %v449_v20, -inf  ;;  %v290_v13 = vadd.f32 0.5, %v288_v8  ;;  %v291_v14 = vadd.f32 0.5, %v289_v9 }
  0x28   : > { %v437_v23 = vrot.slane %v436_v17, 1  ;;  %v430_v24 = vrot.slane %v429_v18, 1  ;;  %v461_v25 = vrot.slane %v460_v21, 4  ;;  %v454_v26 = vrot.slane %v453_v22, 4 }
  0x29   : > { %v559_v9 = vstv %s2662_s20  ;;  %s2435_s20 = smov 2  }
  0x2a   : > { %v438_v28 = vadd.f32 %v437_v23, %v436_v17  ;;  %v431_v29 = vadd.f32 %v430_v24, %v429_v18  ;;  %v462_v30 = vmax.f32 %v460_v21, %v461_v25  ;;  %v455_v31 = vmax.f32 %v453_v22, %v454_v26 }
  0x2b   : > { %v299_v17 = vmul.f32 %v298_v16, %v290_v13  ;;  %v300_v18 = vmul.f32 %v298_v16, %v291_v14 }
  0x2c   : > { %v2511_v32 = vmul.f32 %v445_v27, %v438_v28  ;;  %v2513_v33 = vmul.f32 %v445_v27, %v431_v29  ;;  %v463_v34 = vrot.slane %v462_v30, 2  ;;  %v456_v36 = vrot.slane %v455_v31, 2 }
  0x2d   : > { %v301_v21 = vfloor.f32 %v299_v17  ;;  %v302_v22 = vfloor.f32 %v300_v18 }
  0x2e   : > { %471 = vrot.lane.b32.xlu0 %v2511_v32, %s2412_s23  ;;  %576 = vrot.lane.b32.xlu1 %v2513_v33, %s2413_s24  ;;  %v464_v35 = vmax.f32 %v462_v30, %v463_v34  ;;  %v457_v39 = vmax.f32 %v455_v31, %v456_v36 }
  0x2f   : > { %507 = vrot.lane.b32.xlu2 %v2511_v32, %s2414_s25  ;;  %v2639_v24 = vcvt.f32.s32 %v301_v21  ;;  %v2641_v25 = vcvt.f32.s32 %v302_v22  ;;  %v562_v22 = vstv %s2676_s22  ;;  %s3350_s22 = sld [smem:[#allocation3 + $0x3d]] }
  0x30   : > { %v465_v37 = vrot.slane %v464_v35, 1  ;;  %v458_v40 = vrot.slane %v457_v39, 1 }
  0x31   : > { %v305_v28 = vmul.u32 16, %v2639_v24  ;;  %v306_v29 = vmul.u32 16, %v2641_v25  ;;  %v310_v36 = vadd.s32 4294967293, %v2641_v25 }
  0x32   : > { %v2518_v38 = vmax.f32 %v464_v35, %v465_v37  ;;  %v2523_v41 = vmax.f32 %v457_v39, %v458_v40  ;;  %v309_v35 = vadd.s32 4294967293, %v2639_v24  ;;  %v526_v37 = vstv %s2645_s13  ;;  %s3153_s13 = sld [smem:[#allocation3 + $0x3a]] }
  0x33   : > { %v2664_v31 = vsub.s32 %v286_v0, %v305_v28  ;;  %v2666_v34 = vsub.s32 %v287_v5, %v306_v29  ;;  %vm312_vm6 = vcmp.ge.s32.totalorder %v310_v36, 0  ;;  %vm314_vm8 = vcmp.lt.s32.totalorder %v310_v36, 16 }
  0x34   : > { %vm311_vm5 = vcmp.ge.s32.totalorder %v309_v35, 0  ;;  %vm313_vm7 = vcmp.lt.s32.totalorder %v309_v35, 16  ;;  %vm2750_vm2 = vmand %vm312_vm6, %vm314_vm8 }
  0x35   : > { %v363_v58 = vadd.s32 4294967293, %v2664_v31  ;;  %v364_v61 = vadd.s32 4294967293, %v2666_v34  ;;  %v379_v10 = vadd.s32 4294967295, %v2664_v31  ;;  %v2715_v16 = vadd.s32 4294967294, %v2664_v31  ;;  %vm2737_vm15 = vmand %vm311_vm5, %vm313_vm7 }
  0x36   : > { %483 = vrot.lane.b32.xlu1 %v2518_v38, %s2412_s23  ;;  %475 = vrot.lane.b32.xlu0 %v2513_v33, %s2412_s23  ;;  %v2718_v17 = vadd.s32 4294967294, %v2666_v34  ;;  %vm389_vm8 = vcmp.lt.s32.totalorder %v2664_v31, 16 }
  0x37   : > { %510 = vrot.lane.b32.xlu2 %v2513_v33, %s2414_s25  ;;  %vm365_vm10 = vcmp.ge.s32.totalorder %v363_v58, 0  ;;  %vm366_vm11 = vcmp.ge.s32.totalorder %v364_v61, 0  ;;  %vm367_vm12 = vcmp.lt.s32.totalorder %v363_v58, 16  ;;  %vm368_vm13 = vcmp.lt.s32.totalorder %v364_v61, 16 }
  0x38   : > { %vm381_vm1 = vcmp.ge.s32.totalorder %v379_v10, 0  ;;  %vm383_vm5 = vcmp.lt.s32.totalorder %v379_v10, 16  ;;  %vm2759_vm7 = vmand %vm365_vm10, %vm367_vm12  ;;  %vm373_vm6 = vcmp.ge.s32.totalorder %v2715_v16, 0  ;;  %vm375_vm10 = vcmp.lt.s32.totalorder %v2715_v16, 16 }
  0x39   : > { %vm376_vm12 = vcmp.lt.s32.totalorder %v2718_v17, 16  ;;  %v2783_v61 = vadd.s32 1, %v2664_v31  ;;  %vm2812_vm0 = vmand %vm381_vm1, %vm383_vm5  ;;  %vm4461_vm5 = vcmp.ge.s32.totalorder %v2718_v17, 0  ;;  %v4468_v17 = vmov 0 }
  0x3e   : > { %487 = vrot.lane.b32.xlu1 %v2523_v41, %s2412_s23  ;;  %543 = vrot.lane.b32.xlu0 %v2513_v33, %s2415_s26  ;;  %s2695_s23 = sld [smem:[#allocation3 + $0x32]] }
  0x3f   : > { %540 = vrot.lane.b32.xlu2 %v2511_v32, %s2415_s26 }
  0x44   : > { %v529_v36 = vstv %s2695_s23  ;;  %s2436_s23 = smov 1  }
  0x46   : > { %520 = vrot.lane.b32.xlu1 %v2523_v41, %s2414_s25  ;;  %573 = vrot.lane.b32.xlu0 %v2511_v32, %s2413_s24 }
  0x47   : > { %553 = vrot.lane.b32.xlu2 %v2523_v41, %s2415_s26 }
  0x4e   : > { %550 = vrot.lane.b32.xlu1 %v2518_v38, %s2415_s26  ;;  %517 = vrot.lane.b32.xlu0 %v2518_v38, %s2414_s25  ;;  %s2720_s25 = sld [smem:[#allocation3 + $0x34]]  ;;  %s2431_s26 = smov 15  }
  0x4f   : > { %583 = vrot.lane.b32.xlu2 %v2518_v38, %s2413_s24 }
  0x56   : > { %606 = vrot.lane.b32.xlu1 %v2511_v32, %s2416_s27  ;;  %586 = vrot.lane.b32.xlu0 %v2523_v41, %s2413_s24  ;;  %s2701_s24 = sld [smem:[#allocation3 + $0x4]] }
  0x57   : > { %609 = vrot.lane.b32.xlu2 %v2513_v33, %s2416_s27 }
  0x5e   : > { %619 = vrot.lane.b32.xlu1 %v2523_v41, %s2416_s27  ;;  %616 = vrot.lane.b32.xlu0 %v2518_v38, %s2416_s27  ;;  %s2742_s27 = sld [smem:[#allocation3 + $0x35]] }
  0x5f   : > { %639 = vrot.lane.b32.xlu2 %v2511_v32, %s2417_s28 }
  0x66   : > { %649 = vrot.lane.b32.xlu1 %v2518_v38, %s2417_s28  ;;  %642 = vrot.lane.b32.xlu0 %v2513_v33, %s2417_s28 }
  0x67   : > { %652 = vrot.lane.b32.xlu2 %v2523_v41, %s2417_s28  ;;  %s2795_s28 = sld [smem:[#allocation3 + $0x36]] }
  0x6e   : > { %675 = vrot.lane.b32.xlu1 %v2513_v33, %s2418_s29  ;;  %672 = vrot.lane.b32.xlu0 %v2511_v32, %s2418_s29 }
  0x6f   : > { %682 = vrot.lane.b32.xlu2 %v2518_v38, %s2418_s29 }
  0x76   : > { %705 = vrot.lane.b32.xlu1 %v2511_v32, %s2419_s30  ;;  %685 = vrot.lane.b32.xlu0 %v2523_v41, %s2418_s29  ;;  %s2432_s29 = smov 14  }
  0x77   : > { %708 = vrot.lane.b32.xlu2 %v2513_v33, %s2419_s30 }
  0x7e   : > { %718 = vrot.lane.b32.xlu1 %v2523_v41, %s2419_s30  ;;  %715 = vrot.lane.b32.xlu0 %v2518_v38, %s2419_s30  ;;  %s2824_s30 = sld [smem:[#allocation3 + $0x5]] }
  0x7f   : > { %738 = vrot.lane.b32.xlu2 %v2511_v32, %s2420_s4 }
  0x86   : > { %748 = vrot.lane.b32.xlu1 %v2518_v38, %s2420_s4  ;;  %741 = vrot.lane.b32.xlu0 %v2513_v33, %s2420_s4 }
  0x87   : > { %751 = vrot.lane.b32.xlu2 %v2523_v41, %s2420_s4  ;;  %s2867_s4 = sld [smem:[#allocation3 + $0x6]] }
  0x89   : > { %v2555_v42 = vpop.permute.xlu2 %507 }
  0x8e   : > { %774 = vrot.lane.b32.xlu1 %v2513_v33, %s2421_s5  ;;  %771 = vrot.lane.b32.xlu0 %v2511_v32, %s2421_s5 }
  0x8f   : > { %781 = vrot.lane.b32.xlu2 %v2518_v38, %s2421_s5 }
  0x91   : > { %v2560_v43 = vpop.permute.xlu2 %510 }
  0x92   : > { %v516_v56 = vsel %vm512_vm3, %v2555_v42, %v2560_v43  ;;  %v513_v0 = vsel %vm512_vm3, %v2560_v43, %v2555_v42  ;;  %v2706_v42 = vadd.s32 4294967295, %v2666_v34 }
  0x93   : > { %v2697_v8 = vmul.f32 %v526_v37, %v516_v56  ;;  %v2703_v13 = vmul.f32 %v526_v37, %v513_v0 }
  0x94   : > { %vm4467_vm14 = vcmp.ge.s32.totalorder %v2706_v42, 0 }
  0x96   : > { %804 = vrot.lane.b32.xlu1 %v2511_v32, %s2422_s6  ;;  %784 = vrot.lane.b32.xlu0 %v2523_v41, %s2421_s5  ;;  %s2930_s5 = sld [smem:[#allocation3 + $0x7]] }
  0x97   : > { %807 = vrot.lane.b32.xlu2 %v2513_v33, %s2422_s6 }
  0x99   : > { %v2565_v44 = vpop.permute.xlu2 %540 }
  0x9e   : > { %817 = vrot.lane.b32.xlu1 %v2523_v41, %s2422_s6  ;;  %814 = vrot.lane.b32.xlu0 %v2518_v38, %s2422_s6  ;;  %s2433_s6 = smov 13  }
  0x9f   : > { %837 = vrot.lane.b32.xlu2 %v2511_v32, %s2423_s7 }
  0xa0   : > { %v2570_v45 = vpop.permute.xlu0 %471  ;;  %v2572_v46 = vpop.permute.xlu1 %576 }
  0xa1   : > { %v2574_v47 = vpop.permute.xlu2 %553 }
  0xa6   : > { %847 = vrot.lane.b32.xlu1 %v2518_v38, %s2423_s7  ;;  %840 = vrot.lane.b32.xlu0 %v2513_v33, %s2423_s7 }
  0xa7   : > { %850 = vrot.lane.b32.xlu2 %v2523_v41, %s2423_s7  ;;  %s2965_s7 = sld [smem:[#allocation3 + $0x37]] }
  0xa8   : > { %v2579_v48 = vpop.permute.xlu1 %483  ;;  %v2581_v49 = vpop.permute.xlu0 %475 }
  0xa9   : > { %v2583_v50 = vpop.permute.xlu2 %583  ;;  %v481_v18 = vsel %vm477_vm4, %v2570_v45, %v2581_v49 }
  0xaa   : > { %v494_v0 = vmul.f32 %v493_v2, %v481_v18 }
  0xae   : > { %873 = vrot.lane.b32.xlu1 %v2513_v33, %s2424_s8  ;;  %870 = vrot.lane.b32.xlu0 %v2511_v32, %s2424_s8 }
  0xaf   : > { %880 = vrot.lane.b32.xlu2 %v2518_v38, %s2424_s8 }
  0xb0   : > { %v2588_v51 = vpop.permute.xlu1 %487  ;;  %v2590_v52 = vpop.permute.xlu0 %543 }
  0xb1   : > { %v2592_v53 = vpop.permute.xlu2 %609  ;;  %v489_v43 = vsel %vm477_vm4, %v2588_v51, %v2579_v48  ;;  %v492_v14 = vsel %vm477_vm4, %v2579_v48, %v2588_v51  ;;  %v478_v51 = vsel %vm477_vm4, %v2581_v49, %v2570_v45  ;;  %vm2769_vm4 = vmand %vm366_vm11, %vm368_vm13  ;;  %v546_v48 = vsel %vm545_vm9, %v2590_v52, %v2565_v44 }
  0xb2   : > { %v497_v45 = vmul.f32 %v496_v7, %v492_v14  ;;  %v498_v49 = vmul.f32 %v496_v7, %v489_v43  ;;  %v495_v7 = vmul.f32 %v493_v2, %v478_v51  ;;  %vm468_vm11 = vmand %vm2737_vm15, %vm2759_vm7  ;;  %v549_v5 = vsel %vm545_vm9, %v2565_v44, %v2590_v52 }
  0xb3   : > { %v4455_v44 = vmov 0  ;;  %vm611_vm13 = vcmask 384000   ;;  %v560_v10 = vmul.f32 %v559_v9, %v549_v5 }
  0xb4   : > { %v499_v51 = vadd.f32 %v497_v45, %v494_v0  ;;  %v500_v18 = vadd.f32 %v498_v49, %v495_v7  ;;  %v4456_v44 = vsel %vm2812_vm0, 4294967295, %v4455_v44  ;;  %v2822_v0 = vadd.s32 1, %v2666_v34 }
  0xb5   : > { %4457 = vst [vmem:[#allocation8_spill] sm:$0xff] %v4456_v44 }
  0xb6   : > { %903 = vrot.lane.b32.xlu1 %v2511_v32, %s2425_s9  ;;  %883 = vrot.lane.b32.xlu0 %v2523_v41, %s2424_s8  ;;  %v501_v5 = vsel %vm468_vm11, %v499_v51, 0.0  ;;  %vm4465_vm11 = vcmask 392192   ;;  %s3032_s8 = sld [smem:[#allocation3 + $0x38]] }
  0xb7   : > { %906 = vrot.lane.b32.xlu2 %v2513_v33, %s2425_s9 }
  0xb8   : > { %v2597_v54 = vpop.permute.xlu1 %520  ;;  %v2599_v55 = vpop.permute.xlu0 %573 }
  0xb9   : > { %v2601_v57 = vpop.permute.xlu2 %639  ;;  %v582_v51 = vsel %vm4465_vm11, %v2599_v55, %v2572_v46 }
  0xbe   : > { %916 = vrot.lane.b32.xlu1 %v2523_v41, %s2425_s9  ;;  %913 = vrot.lane.b32.xlu0 %v2518_v38, %s2425_s9  ;;  %s3081_s9 = sld [smem:[#allocation3 + $0x39]] }
  0xbf   : > { %936 = vrot.lane.b32.xlu2 %v2511_v32, %s2427_s10 }
  0xc0   : > { %v2606_v59 = vpop.permute.xlu1 %550  ;;  %v2608_v60 = vpop.permute.xlu0 %517 }
  0xc1   : > { %v2610_v62 = vpop.permute.xlu2 %652  ;;  %v525_v58 = vsel %vm512_vm3, %v2608_v60, %v2597_v54  ;;  %v522_v14 = vsel %vm512_vm3, %v2597_v54, %v2608_v60  ;;  %vm469_vm3 = vmand %vm2750_vm2, %vm2769_vm4  ;;  %v558_v54 = vsel %vm545_vm9, %v2606_v59, %v2574_v47  ;;  %v555_v52 = vsel %vm545_vm9, %v2574_v47, %v2606_v59 }
  0xc2   : > { %v530_v60 = vmul.f32 %v529_v36, %v525_v58  ;;  %v531_v49 = vmul.f32 %v529_v36, %v522_v14  ;;  %v561_v47 = vmul.f32 %v559_v9, %v546_v48  ;;  %vm2836_vm9 = vmand %vm373_vm6, %vm375_vm10  ;;  %v4458_v59 = vmov 0 }
  0xc3   : > { %v4459_v59 = vsel %vm2836_vm9, 4294967295, %v4458_v59  ;;  %v502_v9 = vsel %vm469_vm3, %v500_v18, 0.0  ;;  %v563_v16 = vmul.f32 %v562_v22, %v558_v54  ;;  %vm2862_vm6 = vmand %vm4461_vm5, %vm376_vm12  ;;  %v4462_v48 = vmov 0 }
  0xc4   : > { %4460 = vst [vmem:[#allocation9_spill] sm:$0xff] %v4459_v59  ;;  %v4463_v48 = vsel %vm2862_vm6, 4294967295, %v4462_v48  ;;  %vm4466_vm3 = vcmp.lt.s32.totalorder %v2706_v42, 16  ;;  %v564_v18 = vmul.f32 %v562_v22, %v555_v52  ;;  %v532_v54 = vadd.f32 %v530_v60, %v2697_v8  ;;  %vm4471_vm10 = vmmov %vm4465_vm11 }
  0xc5   : > { %4464 = vst [vmem:[#allocation10_spill] sm:$0xff] %v4463_v48  ;;  %vm2878_vm12 = vmand %vm4467_vm14, %vm4466_vm3  ;;  %v579_v2 = vsel %vm4471_vm10, %v2572_v46, %v2599_v55  ;;  %v533_v42 = vadd.f32 %v531_v49, %v2703_v13  ;;  %v2897_v8 = vadd.s32 2, %v2664_v31  ;;  %v4472_v22 = vstv %s2660_s1  ;;  %s3251_s1 = sld [smem:[#allocation3 + $0x3b]] }
  0xc6   : > { %946 = vrot.lane.b32.xlu1 %v2518_v38, %s2427_s10  ;;  %939 = vrot.lane.b32.xlu0 %v2513_v33, %s2427_s10  ;;  %v4469_v17 = vsel %vm2878_vm12, 4294967295, %v4468_v17  ;;  %vm505_vm14 = vmand %vm2737_vm15, %vm2836_vm9  ;;  %v503_v60 = vadd.f32 %v501_v5, %v4472_v22  ;;  %v4473_v52 = vmov %v4472_v22  ;;  %v2911_v55 = vadd.s32 2, %v2666_v34 }
  0xc7   : > { %949 = vrot.lane.b32.xlu2 %v2523_v41, %s2427_s10  ;;  %4470 = vst [vmem:[#allocation11_spill] sm:$0xff] %v4469_v17  ;;  %v504_v36 = vadd.f32 %v502_v9, %v4473_v52  ;;  %vm506_vm10 = vmand %vm2750_vm2, %vm2862_vm6  ;;  %v4475_v13 = vstv %s2672_s21  ;;  %v565_v45 = vadd.f32 %v563_v16, %v560_v10  ;;  %v661_v5 = vstv %s2795_s28  ;;  %s3104_s10 = sld [smem:[#allocation3 + $0x8]] }
  0xc8   : > { %v2615_v3 = vpop.permute.xlu1 %606  ;;  %v2617_v4 = vpop.permute.xlu0 %586  ;;  %vm4474_vm5 = vmmov %vm4465_vm11  ;;  %v593_v49 = vmul.f32 %v4475_v13, %v582_v51  ;;  %v4476_v9 = vmov %v4475_v13  ;;  %v566_v52 = vadd.f32 %v564_v18, %v561_v47  ;;  %v534_v1 = vsel %vm505_vm14, %v532_v54, 0.0  ;;  %s3328_s21 = sld [smem:[#allocation3 + $0xc]] }
  0xc9   : > { %v2619_v6 = vpop.permute.xlu2 %682  ;;  %v591_v46 = vsel %vm4474_vm5, %v2583_v50, %v2617_v4  ;;  %v594_v22 = vmul.f32 %v4476_v9, %v579_v2  ;;  %vm538_vm3 = vmand %vm2737_vm15, %vm2812_vm0  ;;  %v588_v10 = vsel %vm4474_vm5, %v2617_v4, %v2583_v50  ;;  %v535_v2 = vsel %vm506_vm10, %v533_v42, 0.0  ;;  %s3460_s28 = sld [smem:[#allocation3 + $0xe]] }
  0xca   : > { %v4477_v50 = vstv %s2720_s25  ;;  %v658_v47 = vstv %s2824_s30  ;;  %vm4478_vm5 = vcmp.ge.s32.totalorder %v2664_v31, 0  ;;  %v4479_v16 = vmov 0  ;;  %s3413_s25 = sld [smem:[#allocation3 + $0x3e]] }
  0xcb   : > { %v596_v4 = vmul.f32 %v4477_v50, %v591_v46  ;;  %vm2955_vm1 = vmand %vm4478_vm5, %vm389_vm8  ;;  %v567_v42 = vsel %vm538_vm3, %v565_v45, 0.0  ;;  %v536_v46 = vadd.f32 %v534_v1, %v503_v60  ;;  %v4481_v13 = vmov %v4477_v50  ;;  %s2209_s30 = sld [smem:[#allocation3 + $0xf]] }
  0xcc   : > { %v4480_v16 = vsel %vm2955_vm1, 4294967295, %v4479_v16  ;;  %v597_v9 = vmul.f32 %v4481_v13, %v588_v10  ;;  %vm4482_vm5 = vmand %vm2750_vm2, %vm2878_vm12  ;;  %v537_v59 = vadd.f32 %v535_v2, %v504_v36  ;;  %v612_v44 = vsel %vm611_vm13, %v2592_v53, %v2615_v3 }
  0xcd   : > { %v568_v48 = vsel %vm4482_vm5, %v566_v52, 0.0  ;;  %vm4483_vm3 = vcmp.lt.s32.totalorder %v2666_v34, 16  ;;  %vm4484_vm10 = vcmp.ge.s32.totalorder %v2666_v34, 0  ;;  %v4485_v1 = vmov 0 }
  0xce   : > { %972 = vrot.lane.b32.xlu1 %v2513_v33, %s2428_s11  ;;  %969 = vrot.lane.b32.xlu0 %v2511_v32, %s2428_s11  ;;  %vm2993_vm11 = vmand %vm4484_vm10, %vm4483_vm3  ;;  %v615_v36 = vsel %vm611_vm13, %v2615_v3, %v2592_v53  ;;  %v598_v60 = vadd.f32 %v596_v4, %v593_v49  ;;  %v4487_v52 = vstv %s2742_s27  ;;  %v3010_v2 = vadd.s32 3, %v2664_v31  ;;  %s3456_s27 = sld [smem:[#allocation3 + $0x3f]] }
  0xcf   : > { %979 = vrot.lane.b32.xlu2 %v2518_v38, %s2428_s11  ;;  %v4486_v1 = vsel %vm2993_vm11, 4294967295, %v4485_v1  ;;  %vm4488_vm10 = vcmp.lt.s32.totalorder %v2783_v61, 16  ;;  %vm4489_vm3 = vcmp.ge.s32.totalorder %v2783_v61, 0  ;;  %v569_v61 = vadd.f32 %v567_v42, %v536_v46 }
  0xd0   : > { %v2624_v11 = vpop.permute.xlu1 %619  ;;  %v2626_v12 = vpop.permute.xlu0 %616  ;;  %vm3016_vm8 = vmand %vm4489_vm3, %vm4488_vm10  ;;  %v599_v49 = vadd.f32 %v597_v9, %v594_v22  ;;  %v4496_v4 = vmov %v4487_v52  ;;  %v4497_v13 = vstv %s2701_s24  ;;  %vm4505_vm3 = vcmp.ge.s32.totalorder %v2897_v8, 0  ;;  %s3409_s24 = sld [smem:[#allocation3 + $0xd]] }
  0xd1   : > { %v2628_v15 = vpop.permute.xlu2 %708  ;;  %v624_v51 = vsel %vm611_vm13, %v2626_v12, %v2624_v11  ;;  %v621_v45 = vsel %vm611_vm13, %v2624_v11, %v2626_v12  ;;  %v4490_v11 = vmov 0  ;;  %vm4492_vm13 = vcmask 375808  }
  0xd2   : > { %v629_v10 = vmul.f32 %v4487_v52, %v624_v51  ;;  %v4491_v11 = vsel %vm3016_vm8, 4294967295, %v4490_v11  ;;  %vm4493_vm14 = vmmov %vm4492_vm13  ;;  %v630_v51 = vmul.f32 %v4496_v4, %v621_v45  ;;  %v626_v52 = vmul.f32 %v4497_v13, %v615_v36 }
  0xd3   : > { %vm4494_vm5 = vmmov %vm4492_vm13  ;;  %v4498_v50 = vmov %v4497_v13  ;;  %v4506_v42 = vmov 0  ;;  %v3102_v45 = vadd.s32 4294967294, %v2639_v24  ;;  %v4521_v13 = vstv %s2867_s4  ;;  %s2258_s4 = sld [smem:[#allocation3 + $0x40]] }
  0xd4   : > { %vm4495_vm12 = vmmov %vm4494_vm5  ;;  %v627_v17 = vmul.f32 %v4498_v50, %v612_v44  ;;  %v631_v22 = vadd.f32 %v629_v10, %v626_v52  ;;  %v4511_v50 = vmov 0 }
  0xd6   : > { %1002 = vrot.lane.b32.xlu1 %v2511_v32, %s2429_s12  ;;  %982 = vrot.lane.b32.xlu0 %v2523_v41, %s2428_s11  ;;  %s3120_s11 = sld [smem:[#allocation3 + $0x9]] }
  0xd7   : > { %1005 = vrot.lane.b32.xlu2 %v2513_v33, %s2429_s12 }
  0xd8   : > { %v2633_v19 = vpop.permute.xlu1 %649  ;;  %v2635_v20 = vpop.permute.xlu0 %642 }
  0xd9   : > { %v2637_v23 = vpop.permute.xlu2 %738  ;;  %v654_v53 = vsel %vm4492_vm13, %v2610_v62, %v2633_v19  ;;  %v657_v3 = vsel %vm4493_vm14, %v2633_v19, %v2610_v62  ;;  %v645_v12 = vsel %vm4494_vm5, %v2635_v20, %v2601_v57  ;;  %v648_v31 = vsel %vm4495_vm12, %v2601_v57, %v2635_v20 }
  0xda   : > { %v3041_v62 = vadd.s32 3, %v2666_v34  ;;  %v570_v19 = vadd.f32 %v568_v48, %v537_v59  ;;  %vm4499_vm12 = vcmp.lt.s32.totalorder %v2822_v0, 16  ;;  %vm4500_vm14 = vcmp.ge.s32.totalorder %v2822_v0, 0 }
  0xdb   : > { %vm3051_vm5 = vmand %vm4500_vm14, %vm4499_vm12  ;;  %v4501_v57 = vmov 0  ;;  %v724_v20 = vstv %s2930_s5  ;;  %v662_v34 = vmul.f32 %v661_v5, %v657_v3  ;;  %v663_v44 = vmul.f32 %v661_v5, %v654_v53  ;;  %s2439_s5 = smov 125  }
  0xdc   : > { %v4502_v57 = vsel %vm3051_vm5, 4294967295, %v4501_v57  ;;  %v659_v0 = vmul.f32 %v658_v47, %v648_v31  ;;  %v660_v59 = vmul.f32 %v658_v47, %v645_v12  ;;  %vm4503_vm12 = vmand %vm2737_vm15, %vm2955_vm1  ;;  %vm4504_vm14 = vcmp.lt.s32.totalorder %v2897_v8, 16 }
  0xdd   : > { %v600_v48 = vsel %vm4503_vm12, %v598_v60, 0.0  ;;  %vm3075_vm10 = vmand %vm4505_vm3, %vm4504_vm14  ;;  %v694_v5 = vstv %s2965_s7  ;;  %v632_v8 = vadd.f32 %v630_v51, %v627_v17  ;;  %vm4509_vm3 = vcmp.lt.s32.totalorder %v2911_v55, 16  ;;  %s3518_s7 = sld [smem:[#allocation3 + $0x41]] }
  0xde   : > { %1015 = vrot.lane.b32.xlu1 %v2523_v41, %s2429_s12  ;;  %1012 = vrot.lane.b32.xlu0 %v2518_v38, %s2429_s12  ;;  %v4507_v42 = vsel %vm3075_vm10, 4294967295, %v4506_v42  ;;  %vm4508_vm12 = vmand %vm2750_vm2, %vm2993_vm11  ;;  %vm4510_vm14 = vcmp.ge.s32.totalorder %v2911_v55, 0  ;;  %vm4513_vm13 = vcmask 367616   ;;  %v3118_v55 = vadd.s32 4294967294, %v2641_v25  ;;  %s3129_s12 = sld [smem:[#allocation3 + $0xa]] }
  0xdf   : > { %1035 = vrot.lane.b32.xlu2 %v2511_v32, %s2430_s16  ;;  %v601_v9 = vsel %vm4508_vm12, %v599_v49, 0.0  ;;  %vm3096_vm1 = vmand %vm4510_vm14, %vm4509_vm3  ;;  %v602_v60 = vadd.f32 %v600_v48, %v569_v61  ;;  %v664_v10 = vadd.f32 %v662_v34, %v659_v0  ;;  %v665_v53 = vadd.f32 %v663_v44, %v660_v59 }
  0xe0   : > { %v2650_v26 = vpop.permute.xlu1 %675  ;;  %v2652_v27 = vpop.permute.xlu0 %672  ;;  %v4512_v50 = vsel %vm3096_vm1, 4294967295, %v4511_v50  ;;  %vm4514_vm14 = vmmov %vm4513_vm13  ;;  %v603_v12 = vadd.f32 %v601_v9, %v570_v19  ;;  %v727_v49 = vstv %s3032_s8  ;;  %vm4523_vm11 = vcmp.ge.s32.totalorder %v3010_v2, 0  ;;  %s2440_s8 = smov 115  }
  0xe1   : > { %v2658_v30 = vpop.permute.xlu2 %751  ;;  %vm4516_vm12 = vmmov %vm4514_vm14  ;;  %v4524_v34 = vmov 0  ;;  %v4526_v0 = vmov %v4521_v13  ;;  %v4529_v48 = vmov 0 }
  0xe2   : > { %v681_v61 = vsel %vm4516_vm12, %v2652_v27, %v2650_v26 }
  0xe3   : > { %v692_v52 = vmul.f32 %v4521_v13, %v681_v61 }
  0xe6   : > { %1045 = vrot.lane.b32.xlu1 %v2518_v38, %s2430_s16  ;;  %1038 = vrot.lane.b32.xlu0 %v2513_v33, %s2430_s16 }
  0xe7   : > { %1048 = vrot.lane.b32.xlu2 %v2523_v41, %s2430_s16  ;;  %s2434_s16 = smov 3  }
  0xe8   : > { %v2678_v39 = vpop.permute.xlu1 %705  ;;  %v2680_v40 = vpop.permute.xlu0 %685 }
  0xe9   : > { %v2687_v63 = vpop.permute.xlu2 %781  ;;  %v690_v17 = vsel %vm4513_vm13, %v2619_v6, %v2680_v40  ;;  %v687_v3 = vsel %vm4514_vm14, %v2680_v40, %v2619_v6  ;;  %vm4515_vm13 = vmand %vm2737_vm15, %vm3016_vm8 }
  0xea   : > { %v633_v31 = vsel %vm4515_vm13, %v631_v22, 0.0  ;;  %vm4517_vm14 = vmand %vm2750_vm2, %vm3051_vm5  ;;  %v695_v4 = vmul.f32 %v694_v5, %v690_v17  ;;  %v696_v51 = vmul.f32 %v694_v5, %v687_v3  ;;  %v757_v17 = vstv %s3104_s10  ;;  %s3545_s10 = sld [smem:[#allocation3 + $0x11]] }
  0xeb   : > { %v634_v6 = vsel %vm4517_vm14, %v632_v8, 0.0  ;;  %vm4518_vm8 = vmmov %vm4516_vm12  ;;  %vm4522_vm12 = vcmp.lt.s32.totalorder %v3010_v2, 16  ;;  %v760_v2 = vstv %s3081_s9  ;;  %s3541_s9 = sld [smem:[#allocation3 + $0x42]] }
  0xec   : > { %v678_v40 = vsel %vm4518_vm8, %v2650_v26, %v2652_v27  ;;  %v635_v26 = vadd.f32 %v633_v31, %v602_v60  ;;  %vm4519_vm8 = vmand %vm2737_vm15, %vm3075_vm10  ;;  %v636_v44 = vadd.f32 %v634_v6, %v603_v12  ;;  %v697_v8 = vadd.f32 %v695_v4, %v692_v52 }
  0xed   : > { %v666_v27 = vsel %vm4519_vm8, %v664_v10, 0.0  ;;  %vm4520_vm14 = vmand %vm2750_vm2, %vm3096_vm1  ;;  %v693_v59 = vmul.f32 %v4526_v0, %v678_v40  ;;  %vm4527_vm8 = vcmp.lt.s32.totalorder %v3041_v62, 16  ;;  %v790_v12 = vstv %s3120_s11  ;;  %s2441_s11 = smov 114  }
  0xee   : > { %1071 = vrot.lane.b32.xlu1 %v2513_v33, %s2431_s26  ;;  %1068 = vrot.lane.b32.xlu0 %v2511_v32, %s2431_s26  ;;  %v667_v19 = vsel %vm4520_vm14, %v665_v53, 0.0  ;;  %vm3180_vm13 = vmand %vm4523_vm11, %vm4522_vm12  ;;  %vm4528_vm14 = vcmp.ge.s32.totalorder %v3041_v62, 0  ;;  %vm4531_vm12 = vcmask 285696   ;;  %v3212_v10 = vadd.f32 %v666_v27, %v635_v26 }
  0xef   : > { %1078 = vrot.lane.b32.xlu2 %v2518_v38, %s2431_s26  ;;  %v4525_v34 = vsel %vm3180_vm13, 4294967295, %v4524_v34  ;;  %vm3194_vm3 = vmand %vm4528_vm14, %vm4527_vm8  ;;  %v711_v9 = vsel %vm4531_vm12, %v2628_v15, %v2678_v39  ;;  %v3214_v53 = vadd.f32 %v667_v19, %v636_v44  ;;  %v698_v3 = vadd.f32 %v696_v51, %v693_v59 }
  0xf0   : > { %v2744_v28 = vpop.permute.xlu1 %718  ;;  %v2746_v29 = vpop.permute.xlu0 %715  ;;  %v4530_v48 = vsel %vm3194_vm3, 4294967295, %v4529_v48  ;;  %vm4532_vm1 = vmmov %vm4531_vm12  ;;  %v823_v31 = vstv %s3129_s12  ;;  %v726_v61 = vmul.f32 %v724_v20, %v711_v9  ;;  %v859_v27 = vstv %s3162_s17  ;;  %s2212_s12 = sld [smem:[#allocation3 + $0x12]] }
  0xf1   : > { %v2755_v35 = vpop.permute.xlu2 %807  ;;  %v714_v62 = vsel %vm4532_vm1, %v2678_v39, %v2628_v15  ;;  %vm670_vm8 = vmand %vm2737_vm15, %vm3180_vm13  ;;  %v720_v15 = vsel %vm4531_vm12, %v2744_v28, %v2746_v29  ;;  %vm4534_vm15 = vcmask 277504   ;;  %v856_v19 = vstv %s3184_s18  ;;  %s3588_s17 = sld [smem:[#allocation3 + $0x13]] }
  0xf2   : > { %4450 = vst [vmem:[#allocation7_spill] sm:$0xff] %v2755_v35  ;;  %vm671_vm1 = vmand %vm2750_vm2, %vm3194_vm3  ;;  %v725_v21 = vmul.f32 %v724_v20, %v714_v62  ;;  %v3242_v40 = vsel %vm670_vm8, %v697_v8, 0.0  ;;  %v793_v20 = vstv %s3153_s13  ;;  %vm4545_vm8 = vcmp.ge.s32.totalorder %v3118_v55, 0  ;;  %s2261_s13 = sld [smem:[#allocation3 + $0x43]] }
  0xf3   : > { %vm4533_vm11 = vmmov %vm4531_vm12  ;;  %v3253_v4 = vsel %vm671_vm1, %v698_v3, 0.0  ;;  %vm4539_vm1 = vcmp.ge.s32.totalorder %v3102_v45, 0  ;;  %vm4544_vm12 = vcmp.lt.s32.totalorder %v3118_v55, 16  ;;  %s3590_s18 = sld [smem:[#allocation3 + $0x44]] }
  0xf4   : > { %v723_v39 = vsel %vm4533_vm11, %v2746_v29, %v2744_v28  ;;  %vm4535_vm2 = vmmov %vm4534_vm15 }
  0xf5   : > { %vm4536_vm11 = vmmov %vm4535_vm2  ;;  %v728_v51 = vmul.f32 %v727_v49, %v723_v39 }
  0xf6   : > { %1101 = vrot.lane.b32.xlu1 %v2511_v32, %s2432_s29  ;;  %1081 = vrot.lane.b32.xlu0 %v2523_v41, %s2431_s26  ;;  %vm4537_vm14 = vmmov %vm4535_vm2  ;;  %s2437_s26 = smov 127  }
  0xf7   : > { %1104 = vrot.lane.b32.xlu2 %v2513_v33, %s2432_s29  ;;  %v730_v3 = vadd.f32 %v728_v51, %v725_v21 }
  0xf8   : > { %v2842_v7 = vpop.permute.xlu1 %748  ;;  %v2844_v58 = vpop.permute.xlu0 %741 }
  0xf9   : > { %v2869_v14 = vpop.permute.xlu2 %837  ;;  %v753_v6 = vsel %vm4534_vm15, %v2658_v30, %v2842_v7  ;;  %v756_v37 = vsel %vm4535_vm2, %v2842_v7, %v2658_v30  ;;  %v744_v28 = vsel %vm4536_vm11, %v2844_v58, %v2637_v23  ;;  %v747_v29 = vsel %vm4537_vm14, %v2637_v23, %v2844_v58 }
  0xfa   : > { %v729_v30 = vmul.f32 %v727_v49, %v720_v15  ;;  %v761_v7 = vmul.f32 %v760_v2, %v756_v37  ;;  %v762_v26 = vmul.f32 %v760_v2, %v753_v6  ;;  %vm4538_vm14 = vcmp.lt.s32.totalorder %v3102_v45, 16 }
  0xfb   : > { %vm3267_vm15 = vmand %vm4539_vm1, %vm4538_vm14  ;;  %v758_v58 = vmul.f32 %v757_v17, %v747_v29  ;;  %v759_v49 = vmul.f32 %v757_v17, %v744_v28  ;;  %vm4542_vm2 = vcmask 269312   ;;  %vm4548_vm1 = vcmask 252928  }
  0xfc   : > { %vm4543_vm11 = vmmov %vm4542_vm2 }
  0xfd   : > { %vm3281_vm14 = vmand %vm4545_vm8, %vm4544_vm12  ;;  %v763_v21 = vadd.f32 %v761_v7, %v758_v58  ;;  %v4558_v7 = vld [vmem:[#allocation7_spill] sm:$0xff] }
  0xfe   : > { %1114 = vrot.lane.b32.xlu1 %v2523_v41, %s2432_s29  ;;  %1111 = vrot.lane.b32.xlu0 %v2518_v38, %s2432_s29  ;;  %vm4549_vm3 = vmmov %vm4548_vm1  ;;  %s2438_s29 = smov 126  }
  0xff   : > { %1134 = vrot.lane.b32.xlu2 %v2511_v32, %s2433_s6  ;;  %vm703_vm12 = vmand %vm3267_vm15, %vm2759_vm7 }
 0x100   : > { %v2967_v18 = vpop.permute.xlu1 %774  ;;  %v2969_v54 = vpop.permute.xlu0 %771 }
 0x101   : > { %v2979_v35 = vpop.permute.xlu2 %850 }
 0x106   : > { %1144 = vrot.lane.b32.xlu1 %v2518_v38, %s2433_s6  ;;  %1137 = vrot.lane.b32.xlu0 %v2513_v33, %s2433_s6 }
 0x107   : > { %1147 = vrot.lane.b32.xlu2 %v2523_v41, %s2433_s6  ;;  %s3516_s6 = sld [smem:[#allocation3 + $0x10]] }
 0x108   : > { %v3083_v47 = vpop.permute.xlu1 %804  ;;  %v3085_v46 = vpop.permute.xlu0 %784 }
 0x109   : > { %v3106_v36 = vpop.permute.xlu2 %880  ;;  %v786_v13 = vsel %vm4542_vm2, %v3085_v46, %v2687_v63  ;;  %v789_v52 = vsel %vm4543_vm11, %v2687_v63, %v3085_v46  ;;  %vm4550_vm2 = vmmov %vm4548_vm1 }
 0x10a   : > { %vm4551_vm11 = vmmov %vm4548_vm1  ;;  %v794_v39 = vmul.f32 %v793_v20, %v789_v52  ;;  %v795_v6 = vmul.f32 %v793_v20, %v786_v13  ;;  %v764_v20 = vadd.f32 %v762_v26, %v759_v49 }
 0x10e   : > { %1170 = vrot.lane.b32.xlu1 %v2513_v33, %s2434_s16  ;;  %1167 = vrot.lane.b32.xlu0 %v2511_v32, %s2434_s16 }
 0x10f   : > { %1177 = vrot.lane.b32.xlu2 %v2518_v38, %s2434_s16 }
 0x110   : > { %v3199_v22 = vpop.permute.xlu1 %817  ;;  %v3201_v5 = vpop.permute.xlu0 %814 }
 0x111   : > { %v3210_v60 = vpop.permute.xlu2 %906 }
 0x116   : > { %1200 = vrot.lane.b32.xlu1 %v2511_v32, %s2435_s20  ;;  %1180 = vrot.lane.b32.xlu0 %v2523_v41, %s2434_s16  ;;  %s2442_s16 = smov 113  }
 0x117   : > { %1203 = vrot.lane.b32.xlu2 %v2513_v33, %s2435_s20 }
 0x118   : > { %v848_v44 = vpop.permute.xlu1 %847  ;;  %v841_v0 = vpop.permute.xlu0 %840 }
 0x119   : > { %v852_v59 = vsel %vm4548_vm1, %v2979_v35, %v848_v44  ;;  %v855_v2 = vsel %vm4549_vm3, %v848_v44, %v2979_v35  ;;  %v843_v9 = vsel %vm4550_vm2, %v841_v0, %v2869_v14  ;;  %v846_v63 = vsel %vm4551_vm11, %v2869_v14, %v841_v0  ;;  %v3293_v46 = vpop.permute.xlu2 %936  ;;  %vm704_vm1 = vmand %vm3281_vm14, %vm2769_vm4 }
 0x11a   : > { %v860_v55 = vmul.f32 %v859_v27, %v855_v2  ;;  %v861_v62 = vmul.f32 %v859_v27, %v852_v59  ;;  %v857_v8 = vmul.f32 %v856_v19, %v846_v63  ;;  %v858_v17 = vmul.f32 %v856_v19, %v843_v9  ;;  %v4561_v2 = vld [vmem:[#allocation11_spill] sm:$0xff] }
 0x11b   : > { %v731_v35 = vadd.f32 %v729_v30, %v726_v61  ;;  %vm4552_vm3 = vcmask 269312   ;;  %v826_v61 = vstv %s3251_s1  ;;  %vm4554_vm2 = vcmask 261120   ;;  %s2443_s1 = smov 112  }
 0x11c   : > { %v777_v15 = vsel %vm4552_vm3, %v2967_v18, %v2969_v54  ;;  %vm4553_vm8 = vmmov %vm4552_vm3  ;;  %v3309_v37 = vadd.f32 %v860_v55, %v857_v8  ;;  %v3311_v28 = vadd.f32 %v861_v62, %v858_v17  ;;  %v819_v29 = vsel %vm4554_vm2, %v3199_v22, %v3201_v5 }
 0x11d   : > { %v780_v14 = vsel %vm4553_vm8, %v2969_v54, %v2967_v18  ;;  %vm4555_vm11 = vmmov %vm4554_vm2  ;;  %v792_v30 = vmul.f32 %v790_v12, %v777_v15  ;;  %vm4421_vm8 = vcmask 244736   ;;  %v828_v52 = vmul.f32 %v826_v61, %v819_v29 }
 0x11e   : > { %v822_v18 = vsel %vm4555_vm11, %v3201_v5, %v3199_v22  ;;  %v791_v51 = vmul.f32 %v790_v12, %v780_v14  ;;  %1213 = vrot.lane.b32.xlu1 %v2523_v41, %s2435_s20  ;;  %1210 = vrot.lane.b32.xlu0 %v2518_v38, %s2435_s20  ;;  %v732_v22 = vsel %vm703_vm12, %v730_v3, 0.0  ;;  %v733_v5 = vsel %vm704_vm1, %v731_v35, 0.0  ;;  %v4557_v12 = vld [vmem:[#allocation10_spill] sm:$0xff]  ;;  %vm737_vm2 = vmand %vm3281_vm14, %vm2862_vm6  ;;  %s3613_s20 = sld [smem:[#allocation3 + $0x45]] }
 0x11f   : > { %v810_v26 = vsel %vm4555_vm11, %v4558_v7, %v3083_v47  ;;  %vm4559_vm3 = vmmov %vm4555_vm11  ;;  %1233 = vrot.lane.b32.xlu2 %v2511_v32, %s2436_s23  ;;  %v797_v49 = vadd.f32 %v795_v6, %v792_v30  ;;  %v827_v13 = vmul.f32 %v826_v61, %v822_v18  ;;  %v702_v59 = vadd.f32 %v3253_v4, %v3214_v53 }
 0x120   : > { %v813_v27 = vsel %vm4559_vm3, %v3083_v47, %v4558_v7  ;;  %v796_v58 = vadd.f32 %v794_v39, %v791_v51  ;;  %v874_v44 = vpop.permute.xlu1 %873  ;;  %v871_v0 = vpop.permute.xlu0 %870  ;;  %v701_v47 = vadd.f32 %v3242_v40, %v3212_v10  ;;  %vm4562_vm1 = vnez %v4561_v2  ;;  %vm4563_vm11 = vmand %vm3267_vm15, %vm2836_vm9 }
 0x121   : > { %vm770_vm3 = vmand %vm3281_vm14, %vm4562_vm1  ;;  %v876_v9 = vsel %vm4421_vm8, %v874_v44, %v871_v0  ;;  %v879_v63 = vsel %vm4421_vm8, %v871_v0, %v874_v44  ;;  %v3368_v55 = vpop.permute.xlu2 %949  ;;  %v765_v10 = vsel %vm4563_vm11, %v763_v21, 0.0  ;;  %v766_v53 = vsel %vm737_vm2, %v764_v20, 0.0 }
 0x122   : > { %v824_v40 = vmul.f32 %v823_v31, %v813_v27  ;;  %v825_v4 = vmul.f32 %v823_v31, %v810_v26  ;;  %vm4564_vm8 = vnez %v4480_v16  ;;  %v734_v62 = vadd.f32 %v732_v22, %v701_v47  ;;  %vm4566_vm2 = vmand %vm3267_vm15, %vm2812_vm0 }
 0x123   : > { %v735_v8 = vadd.f32 %v733_v5, %v702_v59  ;;  %vm4565_vm1 = vnez %v4486_v1  ;;  %v798_v31 = vsel %vm4566_vm2, %v796_v58, 0.0  ;;  %v799_v17 = vsel %vm770_vm3, %v797_v49, 0.0  ;;  %vm836_vm11 = vmand %vm3281_vm14, %vm3051_vm5 }
 0x124   : > { %v829_v3 = vadd.f32 %v827_v13, %v824_v40  ;;  %v830_v35 = vadd.f32 %v828_v52, %v825_v4  ;;  %vm4567_vm12 = vnez %v4491_v11  ;;  %v767_v15 = vadd.f32 %v765_v10, %v734_v62  ;;  %vm4568_vm2 = vmand %vm3267_vm15, %vm4564_vm8 }
 0x125   : > { %vm835_vm6 = vmand %vm3267_vm15, %vm4567_vm12  ;;  %v768_v14 = vadd.f32 %v766_v53, %v735_v8  ;;  %v889_v21 = vstv %s3328_s21  ;;  %v892_v61 = vstv %s3350_s22  ;;  %v865_v51 = vsel %vm836_vm11, %v3311_v28, 0.0  ;;  %s3617_s21 = sld [smem:[#allocation3 + $0x14]]  ;;  %s2444_s22 = smov 111  }
 0x126   : > { %1243 = vrot.lane.b32.xlu1 %v2518_v38, %s2436_s23  ;;  %1236 = vrot.lane.b32.xlu0 %v2513_v33, %s2436_s23  ;;  %v800_v39 = vadd.f32 %v798_v31, %v767_v15  ;;  %v831_v29 = vsel %vm4568_vm2, %v829_v3, 0.0  ;;  %vm4569_vm3 = vmand %vm3281_vm14, %vm4565_vm1  ;;  %v864_v20 = vsel %vm835_vm6, %v3309_v37, 0.0  ;;  %vm4570_vm5 = vcmask 236544  }
 0x127   : > { %v801_v6 = vadd.f32 %v799_v17, %v768_v14  ;;  %1246 = vrot.lane.b32.xlu2 %v2523_v41, %s2436_s23  ;;  %v832_v18 = vsel %vm4569_vm3, %v830_v35, 0.0  ;;  %vm4571_vm2 = vmmov %vm4570_vm5  ;;  %vm4572_vm1 = vcmask 244736   ;;  %v890_v49 = vmul.f32 %v889_v21, %v879_v63  ;;  %s3653_s23 = sld [smem:[#allocation3 + $0x15]] }
 0x128   : > { %v904_v30 = vpop.permute.xlu1 %903  ;;  %v884_v22 = vpop.permute.xlu0 %883  ;;  %vm4573_vm3 = vmmov %vm4572_vm1  ;;  %v891_v37 = vmul.f32 %v889_v21, %v876_v9  ;;  %v833_v52 = vadd.f32 %v831_v29, %v800_v39  ;;  %v922_v63 = vstv %s3409_s24  ;;  %v925_v40 = vstv %s3413_s25  ;;  %s3655_s24 = sld [smem:[#allocation3 + $0x46]]  ;;  %s2445_s25 = smov 110  }
 0x129   : > { %v909_v5 = vsel %vm4570_vm5, %v3210_v60, %v904_v30  ;;  %v912_v7 = vsel %vm4571_vm2, %v904_v30, %v3210_v60  ;;  %v885_v26 = vsel %vm4572_vm1, %v884_v22, %v3106_v36  ;;  %v888_v27 = vsel %vm4573_vm3, %v3106_v36, %v884_v22  ;;  %v3442_v58 = vpop.permute.xlu2 %979  ;;  %vm868_vm6 = vmand %vm3267_vm15, %vm3075_vm10 }
 0x12a   : > { %v893_v28 = vmul.f32 %v892_v61, %v888_v27  ;;  %v894_v13 = vmul.f32 %v892_v61, %v885_v26  ;;  %v834_v60 = vadd.f32 %v832_v18, %v801_v6  ;;  %vm4574_vm5 = vnez %v4512_v50  ;;  %vm4575_vm11 = vmmov %vm4571_vm2 }
 0x12b   : > { %vm869_vm1 = vmand %vm3281_vm14, %vm4574_vm5  ;;  %v866_v0 = vadd.f32 %v864_v20, %v833_v52  ;;  %v325_v8 = vadd.s32 4294967295, %v2639_v24  ;;  %v326_v3 = vadd.s32 4294967295, %v2641_v25  ;;  %v923_v15 = vmul.f32 %v922_v63, %v912_v7 }
 0x12c   : > { %v895_v36 = vadd.f32 %v893_v28, %v890_v49  ;;  %v896_v44 = vadd.f32 %v894_v13, %v891_v37  ;;  %v867_v47 = vadd.f32 %v865_v51, %v834_v60  ;;  %v924_v14 = vmul.f32 %v922_v63, %v909_v5  ;;  %vm901_vm3 = vmand %vm3267_vm15, %vm3180_vm13 }
 0x12d   : > { %vm328_vm5 = vcmp.ge.s32.totalorder %v326_v3, 0  ;;  %vm330_vm10 = vcmp.lt.s32.totalorder %v326_v3, 16  ;;  %vm941_vm15 = vcmask 154624   ;;  %v958_v20 = vstv %s3456_s27  ;;  %s3676_s27 = sld [smem:[#allocation3 + $0x47]] }
 0x12e   : > { %v897_v59 = vsel %vm868_vm6, %v895_v36, 0.0  ;;  %v898_v9 = vsel %vm869_vm1, %v896_v44, 0.0  ;;  %1282 = vrot.lane.b32.xlu1 %v2511_v32, %s2437_s26  ;;  %1280 = vrot.lane.b32.xlu0 %v2513_v33, %s2437_s26  ;;  %vm4576_vm6 = vnez %v4530_v48  ;;  %v955_v30 = vstv %s3460_s28  ;;  %s2446_s28 = smov 109  }
 0x12f   : > { %v899_v10 = vadd.f32 %v897_v59, %v866_v0  ;;  %v900_v53 = vadd.f32 %v898_v9, %v867_v47  ;;  %1290 = vrot.lane.b32.xlu2 %v2523_v41, %s2437_s26  ;;  %vm902_vm1 = vmand %vm3281_vm14, %vm4576_vm6 }
 0x130   : > { %v917_v4 = vpop.permute.xlu1 %916  ;;  %v914_v62 = vpop.permute.xlu0 %913 }
 0x131   : > { %v918_v31 = vsel %vm4575_vm11, %v917_v4, %v914_v62  ;;  %v921_v17 = vsel %vm4571_vm2, %v914_v62, %v917_v4  ;;  %v3468_v35 = vpop.permute.xlu2 %1005  ;;  %vm327_vm11 = vcmp.ge.s32.totalorder %v325_v8, 0  ;;  %vm329_vm2 = vcmp.lt.s32.totalorder %v325_v8, 16 }
 0x132   : > { %v926_v39 = vmul.f32 %v925_v40, %v921_v17  ;;  %v927_v6 = vmul.f32 %v925_v40, %v918_v31  ;;  %vm3482_vm14 = vmand %vm327_vm11, %vm329_vm2  ;;  %vm1007_vm11 = vcmask 138240   ;;  %v988_v4 = vstv %s2209_s30  ;;  %s3707_s30 = sld [smem:[#allocation3 + $0x17]] }
 0x133   : > { %v991_v62 = vstv %s2258_s4  ;;  %vm967_vm2 = vmand %vm3482_vm14, %vm2836_vm9  ;;  %s3722_s4 = sld [smem:[#allocation3 + $0x18]] }
 0x134   : > { %v928_v21 = vadd.f32 %v926_v39, %v923_v15  ;;  %v929_v61 = vadd.f32 %v927_v6, %v924_v14 }
 0x136   : > { %v930_v29 = vsel %vm901_vm3, %v928_v21, 0.0  ;;  %v931_v18 = vsel %vm902_vm1, %v929_v61, 0.0  ;;  %1313 = vrot.lane.b32.xlu1 %v2513_v33, %s2438_s29  ;;  %1292 = vrot.lane.b32.xlu0 %v2518_v38, %s2437_s26  ;;  %vm3489_vm3 = vmand %vm328_vm5, %vm330_vm10  ;;  %vm974_vm1 = vcmask 146432   ;;  %s3668_s26 = sld [smem:[#allocation3 + $0x16]] }
 0x137   : > { %v932_v23 = vadd.f32 %v930_v29, %v899_v10  ;;  %v933_v45 = vadd.f32 %v931_v18, %v900_v53  ;;  %1315 = vrot.lane.b32.xlu2 %v2511_v32, %s2438_s29  ;;  %vm934_vm10 = vmand %vm3482_vm14, %vm2759_vm7 }
 0x138   : > { %v947_v22 = vpop.permute.xlu1 %946  ;;  %v940_v7 = vpop.permute.xlu0 %939  ;;  %vm935_vm5 = vmand %vm3489_vm3, %vm2769_vm4 }
 0x139   : > { %v951_v26 = vsel %vm941_vm15, %v3368_v55, %v947_v22  ;;  %v954_v27 = vsel %vm941_vm15, %v947_v22, %v3368_v55  ;;  %v942_v49 = vsel %vm941_vm15, %v940_v7, %v3293_v46  ;;  %v945_v37 = vsel %vm941_vm15, %v3293_v46, %v940_v7  ;;  %v3497_v28 = vpop.permute.xlu2 %1035 }
 0x13a   : > { %v959_v13 = vmul.f32 %v958_v20, %v954_v27  ;;  %v960_v52 = vmul.f32 %v958_v20, %v951_v26  ;;  %v956_v60 = vmul.f32 %v955_v30, %v945_v37  ;;  %v957_v36 = vmul.f32 %v955_v30, %v942_v49 }
 0x13b   : > { %vm4581_vm15 = vnez %v4557_v12  ;;  %v1024_v22 = vstv %s3518_s7  ;;  %s3749_s7 = sld [smem:[#allocation3 + $0x19]] }
 0x13c   : > { %v961_v55 = vadd.f32 %v959_v13, %v956_v60  ;;  %v962_v44 = vadd.f32 %v960_v52, %v957_v36 }
 0x13e   : > { %v963_v0 = vsel %vm934_vm10, %v961_v55, 0.0  ;;  %v964_v46 = vsel %vm935_vm5, %v962_v44, 0.0  ;;  %1325 = vrot.lane.b32.xlu1 %v2518_v38, %s2438_s29  ;;  %1323 = vrot.lane.b32.xlu0 %v2523_v41, %s2438_s29  ;;  %vm968_vm10 = vmand %vm3489_vm3, %vm4581_vm15  ;;  %s3703_s29 = sld [smem:[#allocation3 + $0x48]] }
 0x13f   : > { %v965_v47 = vadd.f32 %v963_v0, %v932_v23  ;;  %v966_v59 = vadd.f32 %v964_v46, %v933_v45  ;;  %1346 = vrot.lane.b32.xlu2 %v2513_v33, %s2439_s5  ;;  %v1021_v45 = vstv %s3516_s6  ;;  %vm1000_vm5 = vmand %vm3482_vm14, %vm2812_vm0  ;;  %s2447_s6 = smov 99  }
 0x140   : > { %v973_v9 = vpop.permute.xlu1 %972  ;;  %v970_v63 = vpop.permute.xlu0 %969 }
 0x141   : > { %v975_v10 = vsel %vm974_vm1, %v973_v9, %v970_v63  ;;  %v978_v53 = vsel %vm974_vm1, %v970_v63, %v973_v9  ;;  %v3512_v40 = vpop.permute.xlu2 %1048  ;;  %v1057_v9 = vstv %s3541_s9  ;;  %v1054_v63 = vstv %s3545_s10  ;;  %s2448_s9 = smov 98   ;;  %s3772_s10 = sld [smem:[#allocation3 + $0x1a]] }
 0x142   : > { %v989_v6 = vmul.f32 %v988_v4, %v978_v53  ;;  %v990_v21 = vmul.f32 %v988_v4, %v975_v10 }
 0x146   : > { %1356 = vrot.lane.b32.xlu1 %v2523_v41, %s2439_s5  ;;  %1348 = vrot.lane.b32.xlu0 %v2511_v32, %s2439_s5 }
 0x147   : > { %1358 = vrot.lane.b32.xlu2 %v2518_v38, %s2439_s5  ;;  %s3724_s5 = sld [smem:[#allocation3 + $0x49]] }
 0x148   : > { %v1003_v8 = vpop.permute.xlu1 %1002  ;;  %v983_v31 = vpop.permute.xlu0 %982 }
 0x149   : > { %v1008_v17 = vsel %vm1007_vm11, %v3468_v35, %v1003_v8  ;;  %v1011_v3 = vsel %vm1007_vm11, %v1003_v8, %v3468_v35  ;;  %v984_v15 = vsel %vm974_vm1, %v983_v31, %v3442_v58  ;;  %v987_v14 = vsel %vm974_vm1, %v3442_v58, %v983_v31  ;;  %v3529_v39 = vpop.permute.xlu2 %1078 }
 0x14a   : > { %v992_v61 = vmul.f32 %v991_v62, %v987_v14  ;;  %v993_v29 = vmul.f32 %v991_v62, %v984_v15  ;;  %v1022_v13 = vmul.f32 %v1021_v45, %v1011_v3  ;;  %v1023_v52 = vmul.f32 %v1021_v45, %v1008_v17 }
 0x14b   : > { %vm4582_vm1 = vnez %v4561_v2 }
 0x14c   : > { %v994_v35 = vadd.f32 %v992_v61, %v989_v6  ;;  %v995_v58 = vadd.f32 %v993_v29, %v990_v21 }
 0x14e   : > { %v996_v18 = vsel %vm967_vm2, %v994_v35, 0.0  ;;  %v997_v23 = vsel %vm968_vm10, %v995_v58, 0.0  ;;  %1381 = vrot.lane.b32.xlu1 %v2511_v32, %s2440_s8  ;;  %1379 = vrot.lane.b32.xlu0 %v2513_v33, %s2440_s8  ;;  %vm1001_vm2 = vmand %vm3489_vm3, %vm4582_vm1 }
 0x14f   : > { %v998_v20 = vadd.f32 %v996_v18, %v965_v47  ;;  %v999_v30 = vadd.f32 %v997_v23, %v966_v59  ;;  %1389 = vrot.lane.b32.xlu2 %v2523_v41, %s2440_s8  ;;  %vm1033_vm10 = vmand %vm3482_vm14, %vm4564_vm8 }
 0x150   : > { %v1016_v7 = vpop.permute.xlu1 %1015  ;;  %v1013_v26 = vpop.permute.xlu0 %1012 }
 0x151   : > { %v1017_v27 = vsel %vm1007_vm11, %v1016_v7, %v1013_v26  ;;  %v1020_v49 = vsel %vm1007_vm11, %v1013_v26, %v1016_v7  ;;  %v3550_v37 = vpop.permute.xlu2 %1104  ;;  %vm1040_vm11 = vcmask 130048  }
 0x152   : > { %v1025_v60 = vmul.f32 %v1024_v22, %v1020_v49  ;;  %v1026_v36 = vmul.f32 %v1024_v22, %v1017_v27  ;;  %v1090_v22 = vstv %s2261_s13  ;;  %s3799_s13 = sld [smem:[#allocation3 + $0x4c]] }
 0x154   : > { %v1027_v55 = vadd.f32 %v1025_v60, %v1022_v13  ;;  %v1028_v44 = vadd.f32 %v1026_v36, %v1023_v52 }
 0x156   : > { %v1029_v0 = vsel %vm1000_vm5, %v1027_v55, 0.0  ;;  %v1030_v46 = vsel %vm1001_vm2, %v1028_v44, 0.0  ;;  %1412 = vrot.lane.b32.xlu1 %v2513_v33, %s2441_s11  ;;  %1391 = vrot.lane.b32.xlu0 %v2518_v38, %s2440_s8  ;;  %vm4583_vm5 = vnez %v4486_v1  ;;  %s3751_s8 = sld [smem:[#allocation3 + $0x4a]] }
 0x157   : > { %v1031_v47 = vadd.f32 %v1029_v0, %v998_v20  ;;  %v1032_v59 = vadd.f32 %v1030_v46, %v999_v30  ;;  %1414 = vrot.lane.b32.xlu2 %v2511_v32, %s2441_s11  ;;  %vm1034_vm2 = vmand %vm3489_vm3, %vm4583_vm5  ;;  %v1087_v30 = vstv %s2212_s12  ;;  %s2449_s12 = smov 97  }
 0x158   : > { %v1046_v10 = vpop.permute.xlu1 %1045  ;;  %v1039_v53 = vpop.permute.xlu0 %1038 }
 0x159   : > { %v1050_v4 = vsel %vm1040_vm11, %v3512_v40, %v1046_v10  ;;  %v1053_v62 = vsel %vm1040_vm11, %v1046_v10, %v3512_v40  ;;  %v1041_v8 = vsel %vm1040_vm11, %v1039_v53, %v3497_v28  ;;  %v1044_v31 = vsel %vm1040_vm11, %v3497_v28, %v1039_v53  ;;  %v3569_v17 = vpop.permute.xlu2 %1134 }
 0x15a   : > { %v1058_v3 = vmul.f32 %v1057_v9, %v1053_v62  ;;  %v1059_v15 = vmul.f32 %v1057_v9, %v1050_v4  ;;  %v1055_v14 = vmul.f32 %v1054_v63, %v1044_v31  ;;  %v1056_v6 = vmul.f32 %v1054_v63, %v1041_v8 }
 0x15b   : > { %vm1073_vm11 = vcmask 121856   ;;  %v1123_v10 = vstv %s3590_s18  ;;  %s3839_s18 = sld [smem:[#allocation3 + $0x1c]] }
 0x15c   : > { %v1060_v40 = vadd.f32 %v1058_v3, %v1055_v14  ;;  %v1061_v21 = vadd.f32 %v1059_v15, %v1056_v6 }
 0x15e   : > { %v1062_v61 = vsel %vm1033_vm10, %v1060_v40, 0.0  ;;  %v1063_v28 = vsel %vm1034_vm2, %v1061_v21, 0.0  ;;  %1424 = vrot.lane.b32.xlu1 %v2518_v38, %s2441_s11  ;;  %1422 = vrot.lane.b32.xlu0 %v2523_v41, %s2441_s11  ;;  %vm4429_vm10 = vcmask 113664   ;;  %vm1066_vm2 = vmand %vm3482_vm14, %vm4567_vm12  ;;  %vm4588_vm12 = vnez %v4512_v50  ;;  %s3776_s11 = sld [smem:[#allocation3 + $0x4b]] }
 0x15f   : > { %v1064_v29 = vadd.f32 %v1062_v61, %v1031_v47  ;;  %v1065_v35 = vadd.f32 %v1063_v28, %v1032_v59  ;;  %1445 = vrot.lane.b32.xlu2 %v2513_v33, %s2442_s16  ;;  %v1120_v59 = vstv %s3588_s17  ;;  %s2450_s17 = smov 96  }
 0x160   : > { %v1072_v58 = vpop.permute.xlu1 %1071  ;;  %v1069_v18 = vpop.permute.xlu0 %1068 }
 0x161   : > { %v1074_v23 = vsel %vm1073_vm11, %v1072_v58, %v1069_v18  ;;  %v1077_v45 = vsel %vm1073_vm11, %v1069_v18, %v1072_v58  ;;  %v3584_v20 = vpop.permute.xlu2 %1147  ;;  %v1156_v58 = vstv %s3613_s20  ;;  %v1153_v18 = vstv %s3617_s21  ;;  %s2451_s20 = smov 95   ;;  %s3852_s21 = sld [smem:[#allocation3 + $0x1d]] }
 0x162   : > { %v1088_v36 = vmul.f32 %v1087_v30, %v1077_v45  ;;  %v1089_v55 = vmul.f32 %v1087_v30, %v1074_v23 }
 0x166   : > { %1455 = vrot.lane.b32.xlu1 %v2523_v41, %s2442_s16  ;;  %1447 = vrot.lane.b32.xlu0 %v2511_v32, %s2442_s16 }
 0x167   : > { %1457 = vrot.lane.b32.xlu2 %v2518_v38, %s2442_s16  ;;  %s3803_s16 = sld [smem:[#allocation3 + $0x1b]] }
 0x168   : > { %v1102_v7 = vpop.permute.xlu1 %1101  ;;  %v1082_v26 = vpop.permute.xlu0 %1081 }
 0x169   : > { %v1107_v27 = vsel %vm4429_vm10, %v3550_v37, %v1102_v7  ;;  %v1110_v49 = vsel %vm4429_vm10, %v1102_v7, %v3550_v37  ;;  %v1083_v13 = vsel %vm1073_vm11, %v1082_v26, %v3529_v39  ;;  %v1086_v52 = vsel %vm1073_vm11, %v3529_v39, %v1082_v26  ;;  %v3601_v60 = vpop.permute.xlu2 %1177 }
 0x16a   : > { %v1091_v44 = vmul.f32 %v1090_v22, %v1086_v52  ;;  %v1092_v0 = vmul.f32 %v1090_v22, %v1083_v13  ;;  %vm4584_vm10 = vnez %v4502_v57  ;;  %vm4585_vm11 = vcmask 113664  }
 0x16b   : > { %vm1067_vm5 = vmand %vm3489_vm3, %vm4584_vm10  ;;  %v1121_v3 = vmul.f32 %v1120_v59, %v1110_v49  ;;  %v1122_v15 = vmul.f32 %v1120_v59, %v1107_v27  ;;  %v1186_v59 = vstv %s3653_s23  ;;  %s2452_s23 = smov 94  }
 0x16c   : > { %v1093_v37 = vadd.f32 %v1091_v44, %v1088_v36  ;;  %v1094_v39 = vadd.f32 %v1092_v0, %v1089_v55 }
 0x16e   : > { %v1095_v46 = vsel %vm1066_vm2, %v1093_v37, 0.0  ;;  %v1096_v47 = vsel %vm1067_vm5, %v1094_v39, 0.0  ;;  %1480 = vrot.lane.b32.xlu1 %v2511_v32, %s2443_s1  ;;  %1478 = vrot.lane.b32.xlu0 %v2513_v33, %s2443_s1  ;;  %vm4586_vm5 = vmmov %vm4585_vm11  ;;  %vm4587_vm2 = vnez %v4507_v42 }
 0x16f   : > { %v1097_v9 = vadd.f32 %v1095_v46, %v1064_v29  ;;  %v1098_v63 = vadd.f32 %v1096_v47, %v1065_v35  ;;  %1488 = vrot.lane.b32.xlu2 %v2523_v41, %s2443_s1  ;;  %vm1099_vm10 = vmand %vm3482_vm14, %vm4587_vm2 }
 0x170   : > { %v1115_v53 = vpop.permute.xlu1 %1114  ;;  %v1112_v4 = vpop.permute.xlu0 %1111 }
 0x171   : > { %v1116_v62 = vsel %vm4585_vm11, %v1115_v53, %v1112_v4  ;;  %v1119_v8 = vsel %vm4586_vm5, %v1112_v4, %v1115_v53  ;;  %v3622_v31 = vpop.permute.xlu2 %1203  ;;  %vm1100_vm11 = vmand %vm3489_vm3, %vm4588_vm12  ;;  %vm1139_vm5 = vcmask 105472  }
 0x172   : > { %v1124_v14 = vmul.f32 %v1123_v10, %v1119_v8  ;;  %v1125_v6 = vmul.f32 %v1123_v10, %v1116_v62 }
 0x174   : > { %v1126_v40 = vadd.f32 %v1124_v14, %v1121_v3  ;;  %v1127_v21 = vadd.f32 %v1125_v6, %v1122_v15 }
 0x176   : > { %v1128_v61 = vsel %vm1099_vm10, %v1126_v40, 0.0  ;;  %v1129_v28 = vsel %vm1100_vm11, %v1127_v21, 0.0  ;;  %1511 = vrot.lane.b32.xlu1 %v2513_v33, %s2444_s22  ;;  %1490 = vrot.lane.b32.xlu0 %v2518_v38, %s2443_s1  ;;  %vm1132_vm10 = vmand %vm3482_vm14, %vm3180_vm13  ;;  %vm333_vm14 = vcmp.ge.s32.totalorder %v2639_v24, 0  ;;  %s3841_s1 = sld [smem:[#allocation3 + $0x4d]] }
 0x177   : > { %v1130_v29 = vadd.f32 %v1128_v61, %v1097_v9  ;;  %v1131_v35 = vadd.f32 %v1129_v28, %v1098_v63  ;;  %1513 = vrot.lane.b32.xlu2 %v2511_v32, %s2444_s22  ;;  %vm1133_vm11 = vmand %vm3489_vm3, %vm4576_vm6  ;;  %vm335_vm3 = vcmp.lt.s32.totalorder %v2639_v24, 16  ;;  %vm1205_vm6 = vcmask 15360  }
 0x178   : > { %v1145_v23 = vpop.permute.xlu1 %1144  ;;  %v1138_v45 = vpop.permute.xlu0 %1137  ;;  %vm3671_vm13 = vmand %vm333_vm14, %vm335_vm3  ;;  %v1189_v63 = vstv %s3655_s24  ;;  %vm4593_vm14 = vcmask 23552   ;;  %s3887_s24 = sld [smem:[#allocation3 + $0x4f]] }
 0x179   : > { %v1149_v30 = vsel %vm1139_vm5, %v3584_v20, %v1145_v23  ;;  %v1152_v22 = vsel %vm1139_vm5, %v1145_v23, %v3584_v20  ;;  %v1140_v7 = vsel %vm1139_vm5, %v1138_v45, %v3569_v17  ;;  %v1143_v26 = vsel %vm1139_vm5, %v3569_v17, %v1138_v45  ;;  %v3641_v27 = vpop.permute.xlu2 %1233  ;;  %vm4594_vm3 = vmmov %vm4593_vm14 }
 0x17a   : > { %v1157_v49 = vmul.f32 %v1156_v58, %v1152_v22  ;;  %v1158_v13 = vmul.f32 %v1156_v58, %v1149_v30  ;;  %v1154_v52 = vmul.f32 %v1153_v18, %v1143_v26  ;;  %v1155_v36 = vmul.f32 %v1153_v18, %v1140_v7 }
 0x17b   : > { %vm4434_vm5 = vcmask 23552   ;;  %v1222_v23 = vstv %s3676_s27  ;;  %s2225_s27 = sld [smem:[#allocation3 + $0x1f]] }
 0x17c   : > { %v1159_v20 = vadd.f32 %v1157_v49, %v1154_v52  ;;  %v1160_v55 = vadd.f32 %v1158_v13, %v1155_v36 }
 0x17e   : > { %v1161_v44 = vsel %vm1132_vm10, %v1159_v20, 0.0  ;;  %v1162_v17 = vsel %vm1133_vm11, %v1160_v55, 0.0  ;;  %1523 = vrot.lane.b32.xlu1 %v2518_v38, %s2444_s22  ;;  %1521 = vrot.lane.b32.xlu0 %v2523_v41, %s2444_s22  ;;  %vm334_vm10 = vcmp.ge.s32.totalorder %v2641_v25, 0  ;;  %vm336_vm11 = vcmp.lt.s32.totalorder %v2641_v25, 16  ;;  %s3860_s22 = sld [smem:[#allocation3 + $0x4e]] }
 0x17f   : > { %v1163_v51 = vadd.f32 %v1161_v44, %v1130_v29  ;;  %v1164_v0 = vadd.f32 %v1162_v17, %v1131_v35  ;;  %1544 = vrot.lane.b32.xlu2 %v2513_v33, %s2445_s25  ;;  %v1219_v35 = vstv %s3668_s26  ;;  %s2453_s26 = smov 93  }
 0x180   : > { %v1171_v5 = vpop.permute.xlu1 %1170  ;;  %v1168_v37 = vpop.permute.xlu0 %1167 }
 0x181   : > { %v1173_v39 = vsel %vm4434_vm5, %v1171_v5, %v1168_v37  ;;  %v1176_v46 = vsel %vm4434_vm5, %v1168_v37, %v1171_v5  ;;  %v3660_v47 = vpop.permute.xlu2 %1246  ;;  %vm3679_vm5 = vmand %vm334_vm10, %vm336_vm11  ;;  %v1255_v5 = vstv %s3703_s29  ;;  %v1252_v37 = vstv %s3707_s30  ;;  %s2454_s29 = smov 83   ;;  %s3934_s30 = sld [smem:[#allocation3 + $0x20]] }
 0x182   : > { %v1187_v6 = vmul.f32 %v1186_v59, %v1176_v46  ;;  %v1188_v40 = vmul.f32 %v1186_v59, %v1173_v39  ;;  %vm1165_vm10 = vmand %vm3671_vm13, %vm2759_vm7 }
 0x183   : > { %vm1166_vm11 = vmand %vm3679_vm5, %vm2769_vm4 }
 0x186   : > { %1554 = vrot.lane.b32.xlu1 %v2523_v41, %s2445_s25  ;;  %1546 = vrot.lane.b32.xlu0 %v2511_v32, %s2445_s25 }
 0x187   : > { %1556 = vrot.lane.b32.xlu2 %v2518_v38, %s2445_s25  ;;  %s3891_s25 = sld [smem:[#allocation3 + $0x1e]] }
 0x188   : > { %v1201_v10 = vpop.permute.xlu1 %1200  ;;  %v1181_v4 = vpop.permute.xlu0 %1180 }
 0x189   : > { %v1206_v62 = vsel %vm1205_vm6, %v3622_v31, %v1201_v10  ;;  %v1209_v8 = vsel %vm1205_vm6, %v1201_v10, %v3622_v31  ;;  %v1182_v3 = vsel %vm4593_vm14, %v1181_v4, %v3601_v60  ;;  %v1185_v15 = vsel %vm4594_vm3, %v3601_v60, %v1181_v4  ;;  %v3691_v14 = vpop.permute.xlu2 %1290  ;;  %vm1198_vm14 = vmand %vm3671_vm13, %vm2836_vm9 }
 0x18a   : > { %v1190_v21 = vmul.f32 %v1189_v63, %v1185_v15  ;;  %v1191_v61 = vmul.f32 %v1189_v63, %v1182_v3  ;;  %v1220_v49 = vmul.f32 %v1219_v35, %v1209_v8  ;;  %v1221_v13 = vmul.f32 %v1219_v35, %v1206_v62  ;;  %vm1199_vm3 = vmand %vm3679_vm5, %vm4581_vm15 }
 0x18c   : > { %v1192_v31 = vadd.f32 %v1190_v21, %v1187_v6  ;;  %v1193_v60 = vadd.f32 %v1191_v61, %v1188_v40  ;;  %v1266_v21 = vstv %s3722_s4  ;;  %s3936_s4 = sld [smem:[#allocation3 + $0x51]] }
 0x18e   : > { %v1194_v28 = vsel %vm1165_vm10, %v1192_v31, 0.0  ;;  %v1195_v29 = vsel %vm1166_vm11, %v1193_v60, 0.0  ;;  %1579 = vrot.lane.b32.xlu1 %v2511_v32, %s2446_s28  ;;  %1577 = vrot.lane.b32.xlu0 %v2513_v33, %s2446_s28  ;;  %vm1231_vm10 = vmand %vm3671_vm13, %vm2812_vm0 }
 0x18f   : > { %v1196_v58 = vadd.f32 %v1194_v28, %v1163_v51  ;;  %v1197_v18 = vadd.f32 %v1195_v29, %v1164_v0  ;;  %1587 = vrot.lane.b32.xlu2 %v2523_v41, %s2446_s28  ;;  %vm1232_vm11 = vmand %vm3679_vm5, %vm4582_vm1 }
 0x190   : > { %v1214_v45 = vpop.permute.xlu1 %1213  ;;  %v1211_v30 = vpop.permute.xlu0 %1210 }
 0x191   : > { %v1215_v22 = vsel %vm1205_vm6, %v1214_v45, %v1211_v30  ;;  %v1218_v7 = vsel %vm1205_vm6, %v1211_v30, %v1214_v45  ;;  %v3712_v26 = vpop.permute.xlu2 %1315  ;;  %vm1238_vm6 = vcmask 7168   ;;  %v1267_v45 = vmul.f32 %v1266_v21, %v2513_v33 }
 0x192   : > { %v1223_v52 = vmul.f32 %v1222_v23, %v1218_v7  ;;  %v1224_v36 = vmul.f32 %v1222_v23, %v1215_v22 }
 0x194   : > { %v1225_v20 = vadd.f32 %v1223_v52, %v1220_v49  ;;  %v1226_v55 = vadd.f32 %v1224_v36, %v1221_v13  ;;  %v1299_v52 = vstv %s3749_s7  ;;  %v1302_v36 = vstv %s3751_s8  ;;  %s3963_s7 = sld [smem:[#allocation3 + $0x21]]  ;;  %s2456_s8 = smov 81  }
 0x196   : > { %v1227_v44 = vsel %vm1198_vm14, %v1225_v20, 0.0  ;;  %v1228_v17 = vsel %vm1199_vm3, %v1226_v55, 0.0  ;;  %1610 = vrot.lane.b32.xlu1 %v2513_v33, %s2447_s6  ;;  %1589 = vrot.lane.b32.xlu0 %v2518_v38, %s2446_s28  ;;  %vm1284_vm14 = vcmask 1039360   ;;  %vm1264_vm3 = vmand %vm3671_vm13, %vm4564_vm8  ;;  %s2274_s28 = sld [smem:[#allocation3 + $0x50]] }
 0x197   : > { %v1229_v51 = vadd.f32 %v1227_v44, %v1196_v58  ;;  %v1230_v0 = vadd.f32 %v1228_v17, %v1197_v18  ;;  %1612 = vrot.lane.b32.xlu2 %v2511_v32, %s2447_s6  ;;  %v1268_v58 = vmul.f32 %v1266_v21, %v2511_v32  ;;  %v1335_v21 = vstv %s3776_s11  ;;  %s2457_s11 = smov 80  }
 0x198   : > { %v1244_v39 = vpop.permute.xlu1 %1243  ;;  %v1237_v46 = vpop.permute.xlu0 %1236 }
 0x199   : > { %v1248_v59 = vsel %vm1238_vm6, %v3660_v47, %v1244_v39  ;;  %v1251_v63 = vsel %vm1238_vm6, %v1244_v39, %v3660_v47  ;;  %v1239_v10 = vsel %vm1238_vm6, %v1237_v46, %v3641_v27  ;;  %v1242_v4 = vsel %vm1238_vm6, %v3641_v27, %v1237_v46  ;;  %v3735_v62 = vpop.permute.xlu2 %1346 }
 0x19a   : > { %v1256_v8 = vmul.f32 %v1255_v5, %v1251_v63  ;;  %v1257_v3 = vmul.f32 %v1255_v5, %v1248_v59  ;;  %v1253_v15 = vmul.f32 %v1252_v37, %v1242_v4  ;;  %v1254_v6 = vmul.f32 %v1252_v37, %v1239_v10 }
 0x19b   : > { %v1269_v27 = vstv %s3724_s5  ;;  %vm4595_vm6 = vnez %v4486_v1  ;;  %s2455_s5 = smov 82  }
 0x19c   : > { %v1258_v47 = vadd.f32 %v1256_v8, %v1253_v15  ;;  %v1259_v40 = vadd.f32 %v1257_v3, %v1254_v6  ;;  %v1270_v18 = vmul.f32 %v1269_v27, %v2523_v41  ;;  %v1271_v23 = vmul.f32 %v1269_v27, %v2518_v38 }
 0x19d   : > { %v1332_v6 = vstv %s3772_s10  ;;  %s2277_s10 = sld [smem:[#allocation3 + $0x53]] }
 0x19e   : > { %v1260_v61 = vsel %vm1231_vm10, %v1258_v47, 0.0  ;;  %v1261_v31 = vsel %vm1232_vm11, %v1259_v40, 0.0  ;;  %1622 = vrot.lane.b32.xlu1 %v2518_v38, %s2447_s6  ;;  %1620 = vrot.lane.b32.xlu0 %v2523_v41, %s2447_s6  ;;  %v1273_v49 = vadd.f32 %v1271_v23, %v1268_v58  ;;  %v1272_v13 = vadd.f32 %v1270_v18, %v1267_v45  ;;  %vm1265_vm10 = vmand %vm3679_vm5, %vm4595_vm6  ;;  %s3959_s6 = sld [smem:[#allocation3 + $0x52]] }
 0x19f   : > { %v1262_v60 = vadd.f32 %v1260_v61, %v1229_v51  ;;  %v1263_v28 = vadd.f32 %v1261_v31, %v1230_v0  ;;  %1643 = vrot.lane.b32.xlu2 %v2513_v33, %s2448_s9  ;;  %vm4435_vm11 = vcmask 1031168  }
 0x1a0   : > { %v1283_v29 = vpop.permute.xlu1 %1282  ;;  %v1281_v35 = vpop.permute.xlu0 %1280  ;;  %v1275_v55 = vsel %vm1265_vm10, %v1273_v49, 0.0  ;;  %v1274_v17 = vsel %vm1264_vm3, %v1272_v13, 0.0  ;;  %vm4596_vm10 = vnez %v4491_v11 }
 0x1a1   : > { %v1285_v30 = vsel %vm1284_vm14, %v1281_v35, %v1283_v29  ;;  %v1289_v22 = vsel %vm1284_vm14, %v1283_v29, %v1281_v35  ;;  %v3760_v7 = vpop.permute.xlu2 %1358  ;;  %vm1278_vm3 = vmand %vm3671_vm13, %vm4596_vm10  ;;  %v1277_v4 = vadd.f32 %v1275_v55, %v1263_v28  ;;  %v1276_v8 = vadd.f32 %v1274_v17, %v1262_v60 }
 0x1a2   : > { %v1300_v46 = vmul.f32 %v1299_v52, %v1285_v30  ;;  %v1301_v59 = vmul.f32 %v1299_v52, %v1289_v22  ;;  %v1368_v52 = vstv %s3799_s13  ;;  %s4008_s13 = sld [smem:[#allocation3 + $0x54]] }
 0x1a6   : > { %1653 = vrot.lane.b32.xlu1 %v2523_v41, %s2448_s9  ;;  %1645 = vrot.lane.b32.xlu0 %v2511_v32, %s2448_s9 }
 0x1a7   : > { %1655 = vrot.lane.b32.xlu2 %v2518_v38, %s2448_s9  ;;  %s2228_s9 = sld [smem:[#allocation3 + $0x22]] }
 0x1a8   : > { %v1314_v20 = vpop.permute.xlu1 %1313  ;;  %v1293_v44 = vpop.permute.xlu0 %1292 }
 0x1a9   : > { %v1318_v51 = vsel %vm4435_vm11, %v1314_v20, %v3712_v26  ;;  %v1322_v0 = vsel %vm4435_vm11, %v3712_v26, %v1314_v20  ;;  %v1294_v5 = vsel %vm1284_vm14, %v3691_v14, %v1293_v44  ;;  %v1298_v37 = vsel %vm1284_vm14, %v1293_v44, %v3691_v14  ;;  %v3787_v39 = vpop.permute.xlu2 %1389 }
 0x1aa   : > { %v1303_v63 = vmul.f32 %v1302_v36, %v1294_v5  ;;  %v1304_v10 = vmul.f32 %v1302_v36, %v1298_v37  ;;  %vm4597_vm11 = vnez %v4502_v57  ;;  %vm4598_vm14 = vcmask 1031168  }
 0x1ab   : > { %vm1279_vm6 = vmand %vm3679_vm5, %vm4597_vm11  ;;  %v1333_v29 = vmul.f32 %v1332_v6, %v1318_v51  ;;  %v1334_v35 = vmul.f32 %v1332_v6, %v1322_v0  ;;  %v1365_v36 = vstv %s3803_s16  ;;  %v340_v6 = vadd.s32 1, %v2641_v25  ;;  %s2458_s16 = smov 79  }
 0x1ac   : > { %v1305_v26 = vadd.f32 %v1303_v63, %v1300_v46  ;;  %v1306_v14 = vadd.f32 %v1304_v10, %v1301_v59 }
 0x1ae   : > { %v1307_v3 = vsel %vm1278_vm3, %v1305_v26, 0.0  ;;  %v1308_v15 = vsel %vm1279_vm6, %v1306_v14, 0.0  ;;  %1678 = vrot.lane.b32.xlu1 %v2511_v32, %s2449_s12  ;;  %1676 = vrot.lane.b32.xlu0 %v2513_v33, %s2449_s12  ;;  %vm4599_vm6 = vmmov %vm4598_vm14 }
 0x1af   : > { %v1309_v47 = vadd.f32 %v1307_v3, %v1276_v8  ;;  %v1310_v40 = vadd.f32 %v1308_v15, %v1277_v4  ;;  %1686 = vrot.lane.b32.xlu2 %v2523_v41, %s2449_s12  ;;  %vm1311_vm3 = vmand %vm3671_vm13, %vm4587_vm2  ;;  %v339_v8 = vadd.s32 1, %v2639_v24 }
 0x1b0   : > { %v1326_v27 = vpop.permute.xlu1 %1325  ;;  %v1324_v61 = vpop.permute.xlu0 %1323 }
 0x1b1   : > { %v1327_v31 = vsel %vm4598_vm14, %v1324_v61, %v1326_v27  ;;  %v1331_v60 = vsel %vm4599_vm6, %v1326_v27, %v1324_v61  ;;  %v3808_v28 = vpop.permute.xlu2 %1414  ;;  %vm1312_vm14 = vmand %vm3679_vm5, %vm4588_vm12  ;;  %vm1350_vm6 = vcmask 1022976   ;;  %vm4601_vm12 = vnez %v4530_v48 }
 0x1b2   : > { %v1336_v58 = vmul.f32 %v1335_v21, %v1327_v31  ;;  %v1337_v18 = vmul.f32 %v1335_v21, %v1331_v60  ;;  %vm1345_vm2 = vmand %vm3679_vm5, %vm4601_vm12  ;;  %vm342_vm5 = vcmp.ge.s32.totalorder %v340_v6, 0  ;;  %vm1416_vm12 = vcmask 932864  }
 0x1b3   : > { %v1401_v27 = vstv %s3841_s1  ;;  %s2459_s1 = smov 78  }
 0x1b4   : > { %v1338_v23 = vadd.f32 %v1336_v58, %v1333_v29  ;;  %v1339_v45 = vadd.f32 %v1337_v18, %v1334_v35 }
 0x1b6   : > { %v1340_v30 = vsel %vm1311_vm3, %v1338_v23, 0.0  ;;  %v1341_v22 = vsel %vm1312_vm14, %v1339_v45, 0.0  ;;  %1709 = vrot.lane.b32.xlu1 %v2513_v33, %s2450_s17  ;;  %1688 = vrot.lane.b32.xlu0 %v2518_v38, %s2449_s12  ;;  %vm4600_vm3 = vnez %v4525_v34  ;;  %s4006_s12 = sld [smem:[#allocation3 + $0x23]] }
 0x1b7   : > { %v1342_v49 = vadd.f32 %v1340_v30, %v1309_v47  ;;  %v1343_v13 = vadd.f32 %v1341_v22, %v1310_v40  ;;  %1711 = vrot.lane.b32.xlu2 %v2511_v32, %s2450_s17  ;;  %vm1344_vm14 = vmand %vm3671_vm13, %vm4600_vm3  ;;  %vm341_vm13 = vcmp.ge.s32.totalorder %v339_v8, 0  ;;  %v1398_v40 = vstv %s3839_s18  ;;  %s4041_s18 = sld [smem:[#allocation3 + $0x24]] }
 0x1b8   : > { %v1357_v20 = vpop.permute.xlu1 %1356  ;;  %v1349_v55 = vpop.permute.xlu0 %1348 }
 0x1b9   : > { %v1360_v44 = vsel %vm1350_vm6, %v1357_v20, %v3760_v7  ;;  %v1364_v17 = vsel %vm1350_vm6, %v3760_v7, %v1357_v20  ;;  %v1351_v51 = vsel %vm1350_vm6, %v3735_v62, %v1349_v55  ;;  %v1355_v0 = vsel %vm1350_vm6, %v1349_v55, %v3735_v62  ;;  %v3827_v5 = vpop.permute.xlu2 %1445 }
 0x1ba   : > { %v1369_v37 = vmul.f32 %v1368_v52, %v1360_v44  ;;  %v1370_v46 = vmul.f32 %v1368_v52, %v1364_v17  ;;  %v1366_v59 = vmul.f32 %v1365_v36, %v1351_v51  ;;  %v1367_v63 = vmul.f32 %v1365_v36, %v1355_v0 }
 0x1bb   : > { %vm4438_vm6 = vcmask 941056   ;;  %v1431_v36 = vstv %s3852_s21  ;;  %v1434_v44 = vstv %s3860_s22  ;;  %s2280_s21 = sld [smem:[#allocation3 + $0x56]]  ;;  %s2460_s22 = smov 77  }
 0x1bc   : > { %v1371_v7 = vadd.f32 %v1369_v37, %v1366_v59  ;;  %v1372_v10 = vadd.f32 %v1370_v46, %v1367_v63  ;;  %v1629_v21 = vstv %s4006_s12  ;;  %s4228_s12 = sld [smem:[#allocation3 + $0x2e]] }
 0x1be   : > { %v1373_v26 = vsel %vm1344_vm14, %v1371_v7, 0.0  ;;  %v1374_v62 = vsel %vm1345_vm2, %v1372_v10, 0.0  ;;  %1721 = vrot.lane.b32.xlu1 %v2518_v38, %s2450_s17  ;;  %1719 = vrot.lane.b32.xlu0 %v2523_v41, %s2450_s17  ;;  %vm343_vm2 = vcmp.lt.s32.totalorder %v339_v8, 16  ;;  %vm344_vm14 = vcmp.lt.s32.totalorder %v340_v6, 16  ;;  %s4033_s17 = sld [smem:[#allocation3 + $0x55]] }
 0x1bf   : > { %v1375_v9 = vadd.f32 %v1373_v26, %v1342_v49  ;;  %v1376_v14 = vadd.f32 %v1374_v62, %v1343_v13  ;;  %1742 = vrot.lane.b32.xlu2 %v2513_v33, %s2451_s20  ;;  %vm3855_vm3 = vmand %vm341_vm13, %vm343_vm2  ;;  %vm4606_vm13 = vcmask 941056   ;;  %v1467_v8 = vstv %s3887_s24  ;;  %s4090_s24 = sld [smem:[#allocation3 + $0x57]] }
 0x1c0   : > { %v1382_v53 = vpop.permute.xlu1 %1381  ;;  %v1380_v4 = vpop.permute.xlu0 %1379  ;;  %vm4607_vm2 = vmmov %vm4606_vm13 }
 0x1c1   : > { %v1384_v3 = vsel %vm4438_vm6, %v1380_v4, %v1382_v53  ;;  %v1388_v15 = vsel %vm4438_vm6, %v1382_v53, %v1380_v4  ;;  %v3848_v47 = vpop.permute.xlu2 %1457  ;;  %vm3863_vm6 = vmand %vm342_vm5, %vm344_vm14 }
 0x1c2   : > { %v1399_v45 = vmul.f32 %v1398_v40, %v1384_v3  ;;  %v1400_v30 = vmul.f32 %v1398_v40, %v1388_v15  ;;  %vm1377_vm5 = vmand %vm3855_vm3, %vm2759_vm7  ;;  %v1464_v3 = vstv %s3891_s25  ;;  %s4111_s25 = sld [smem:[#allocation3 + $0x58]] }
 0x1c3   : > { %vm1378_vm14 = vmand %vm3863_vm6, %vm2769_vm4 }
 0x1c6   : > { %1752 = vrot.lane.b32.xlu1 %v2523_v41, %s2451_s20  ;;  %1744 = vrot.lane.b32.xlu0 %v2511_v32, %s2451_s20 }
 0x1c7   : > { %1754 = vrot.lane.b32.xlu2 %v2518_v38, %s2451_s20  ;;  %s2231_s20 = sld [smem:[#allocation3 + $0x25]] }
 0x1c8   : > { %v1413_v61 = vpop.permute.xlu1 %1412  ;;  %v1392_v60 = vpop.permute.xlu0 %1391 }
 0x1c9   : > { %v1417_v29 = vsel %vm1416_vm12, %v1413_v61, %v3808_v28  ;;  %v1421_v35 = vsel %vm1416_vm12, %v3808_v28, %v1413_v61  ;;  %v1393_v58 = vsel %vm4606_vm13, %v3787_v39, %v1392_v60  ;;  %v1397_v18 = vsel %vm4607_vm2, %v1392_v60, %v3787_v39  ;;  %v3875_v23 = vpop.permute.xlu2 %1488  ;;  %vm1410_vm13 = vmand %vm3855_vm3, %vm2836_vm9 }
 0x1ca   : > { %v1402_v22 = vmul.f32 %v1401_v27, %v1393_v58  ;;  %v1403_v49 = vmul.f32 %v1401_v27, %v1397_v18  ;;  %v1432_v59 = vmul.f32 %v1431_v36, %v1417_v29  ;;  %v1433_v63 = vmul.f32 %v1431_v36, %v1421_v35  ;;  %vm1411_vm2 = vmand %vm3863_vm6, %vm4581_vm15 }
 0x1cc   : > { %v1404_v28 = vadd.f32 %v1402_v22, %v1399_v45  ;;  %v1405_v39 = vadd.f32 %v1403_v49, %v1400_v30 }
 0x1ce   : > { %v1406_v13 = vsel %vm1377_vm5, %v1404_v28, 0.0  ;;  %v1407_v52 = vsel %vm1378_vm14, %v1405_v39, 0.0  ;;  %1777 = vrot.lane.b32.xlu1 %v2511_v32, %s2452_s23  ;;  %1775 = vrot.lane.b32.xlu0 %v2513_v33, %s2452_s23  ;;  %vm1443_vm5 = vmand %vm3855_vm3, %vm2812_vm0 }
 0x1cf   : > { %v1408_v20 = vadd.f32 %v1406_v13, %v1375_v9  ;;  %v1409_v55 = vadd.f32 %v1407_v52, %v1376_v14  ;;  %1785 = vrot.lane.b32.xlu2 %v2523_v41, %s2452_s23  ;;  %vm1444_vm14 = vmand %vm3863_vm6, %vm4582_vm1 }
 0x1d0   : > { %v1425_v17 = vpop.permute.xlu1 %1424  ;;  %v1423_v51 = vpop.permute.xlu0 %1422 }
 0x1d1   : > { %v1426_v0 = vsel %vm1416_vm12, %v1423_v51, %v1425_v17  ;;  %v1430_v37 = vsel %vm1416_vm12, %v1425_v17, %v1423_v51  ;;  %v3896_v46 = vpop.permute.xlu2 %1513  ;;  %vm1449_vm12 = vcmask 924672  }
 0x1d2   : > { %v1435_v7 = vmul.f32 %v1434_v44, %v1426_v0  ;;  %v1436_v10 = vmul.f32 %v1434_v44, %v1430_v37  ;;  %v1500_v44 = vstv %s2274_s28  ;;  %s2283_s28 = sld [smem:[#allocation3 + $0x59]] }
 0x1d4   : > { %v1437_v26 = vadd.f32 %v1435_v7, %v1432_v59  ;;  %v1438_v62 = vadd.f32 %v1436_v10, %v1433_v63 }
 0x1d6   : > { %v1439_v9 = vsel %vm1410_vm13, %v1437_v26, 0.0  ;;  %v1440_v14 = vsel %vm1411_vm2, %v1438_v62, 0.0  ;;  %1808 = vrot.lane.b32.xlu1 %v2513_v33, %s2453_s26  ;;  %1787 = vrot.lane.b32.xlu0 %v2518_v38, %s2452_s23  ;;  %vm1482_vm13 = vcmask 916480   ;;  %vm1515_vm2 = vcmask 908288   ;;  %s4088_s23 = sld [smem:[#allocation3 + $0x26]] }
 0x1d7   : > { %v1441_v53 = vadd.f32 %v1439_v9, %v1408_v20  ;;  %v1442_v4 = vadd.f32 %v1440_v14, %v1409_v55  ;;  %1810 = vrot.lane.b32.xlu2 %v2511_v32, %s2453_s26  ;;  %v1497_v55 = vstv %s2225_s27  ;;  %s2234_s27 = sld [smem:[#allocation3 + $0x28]] }
 0x1d8   : > { %v1456_v15 = vpop.permute.xlu1 %1455  ;;  %v1448_v6 = vpop.permute.xlu0 %1447 }
 0x1d9   : > { %v1459_v40 = vsel %vm1449_vm12, %v1456_v15, %v3848_v47  ;;  %v1463_v27 = vsel %vm1449_vm12, %v3848_v47, %v1456_v15  ;;  %v1450_v61 = vsel %vm1449_vm12, %v3827_v5, %v1448_v6  ;;  %v1454_v60 = vsel %vm1449_vm12, %v1448_v6, %v3827_v5  ;;  %v3915_v29 = vpop.permute.xlu2 %1544  ;;  %vm1476_vm12 = vmand %vm3855_vm3, %vm4564_vm8 }
 0x1da   : > { %v1468_v35 = vmul.f32 %v1467_v8, %v1459_v40  ;;  %v1469_v58 = vmul.f32 %v1467_v8, %v1463_v27  ;;  %v1465_v18 = vmul.f32 %v1464_v3, %v1450_v61  ;;  %v1466_v45 = vmul.f32 %v1464_v3, %v1454_v60 }
 0x1db   : > { %v1533_v15 = vstv %s3936_s4  ;;  %s2285_s4 = sld [smem:[#allocation3 + $0x5b]] }
 0x1dc   : > { %v1470_v47 = vadd.f32 %v1468_v35, %v1465_v18  ;;  %v1471_v30 = vadd.f32 %v1469_v58, %v1466_v45 }
 0x1de   : > { %v1472_v22 = vsel %vm1443_vm5, %v1470_v47, 0.0  ;;  %v1473_v5 = vsel %vm1444_vm14, %v1471_v30, 0.0  ;;  %1820 = vrot.lane.b32.xlu1 %v2518_v38, %s2453_s26  ;;  %1818 = vrot.lane.b32.xlu0 %v2523_v41, %s2453_s26  ;;  %vm4608_vm5 = vnez %v4486_v1  ;;  %s4115_s26 = sld [smem:[#allocation3 + $0x27]] }
 0x1df   : > { %v1474_v49 = vadd.f32 %v1472_v22, %v1441_v53  ;;  %v1475_v28 = vadd.f32 %v1473_v5, %v1442_v4  ;;  %1841 = vrot.lane.b32.xlu2 %v2513_v33, %s2454_s29  ;;  %vm1477_vm14 = vmand %vm3863_vm6, %vm4608_vm5  ;;  %v1530_v4 = vstv %s3934_s30  ;;  %s2284_s30 = sld [smem:[#allocation3 + $0x5a]] }
 0x1e0   : > { %v1481_v39 = vpop.permute.xlu1 %1480  ;;  %v1479_v13 = vpop.permute.xlu0 %1478 }
 0x1e1   : > { %v1483_v52 = vsel %vm1482_vm13, %v1479_v13, %v1481_v39  ;;  %v1487_v36 = vsel %vm1482_vm13, %v1481_v39, %v1479_v13  ;;  %v3930_v20 = vpop.permute.xlu2 %1556  ;;  %v1566_v39 = vstv %s3959_s6  ;;  %v1563_v13 = vstv %s3963_s7  ;;  %s4189_s6 = sld [smem:[#allocation3 + $0x2b]] }
 0x1e2   : > { %v1498_v10 = vmul.f32 %v1497_v55, %v1483_v52  ;;  %v1499_v26 = vmul.f32 %v1497_v55, %v1487_v36  ;;  %s4194_s7 = sld [smem:[#allocation3 + $0x2c]] }
 0x1e6   : > { %1851 = vrot.lane.b32.xlu1 %v2523_v41, %s2454_s29  ;;  %1843 = vrot.lane.b32.xlu0 %v2511_v32, %s2454_s29 }
 0x1e7   : > { %1853 = vrot.lane.b32.xlu2 %v2518_v38, %s2454_s29  ;;  %s4145_s29 = sld [smem:[#allocation3 + $0x29]] }
 0x1e8   : > { %v1512_v17 = vpop.permute.xlu1 %1511  ;;  %v1491_v51 = vpop.permute.xlu0 %1490 }
 0x1e9   : > { %v1516_v0 = vsel %vm1515_vm2, %v1512_v17, %v3896_v46  ;;  %v1520_v37 = vsel %vm1515_vm2, %v3896_v46, %v1512_v17  ;;  %v1492_v59 = vsel %vm1482_vm13, %v3875_v23, %v1491_v51  ;;  %v1496_v63 = vsel %vm1482_vm13, %v1491_v51, %v3875_v23  ;;  %v3947_v7 = vpop.permute.xlu2 %1587  ;;  %vm1509_vm13 = vmand %vm3855_vm3, %vm4596_vm10 }
 0x1ea   : > { %v1501_v62 = vmul.f32 %v1500_v44, %v1492_v59  ;;  %v1502_v9 = vmul.f32 %v1500_v44, %v1496_v63  ;;  %v1531_v35 = vmul.f32 %v1530_v4, %v1516_v0  ;;  %v1532_v58 = vmul.f32 %v1530_v4, %v1520_v37 }
 0x1ec   : > { %v1503_v46 = vadd.f32 %v1501_v62, %v1498_v10  ;;  %v1504_v23 = vadd.f32 %v1502_v9, %v1499_v26 }
 0x1ee   : > { %v1505_v14 = vsel %vm1476_vm12, %v1503_v46, 0.0  ;;  %v1506_v53 = vsel %vm1477_vm14, %v1504_v23, 0.0  ;;  %1876 = vrot.lane.b32.xlu1 %v2511_v32, %s2455_s5  ;;  %1874 = vrot.lane.b32.xlu0 %v2513_v33, %s2455_s5  ;;  %vm1510_vm12 = vmand %vm3863_vm6, %vm4597_vm11  ;;  %vm4609_vm14 = vnez %v4507_v42 }
 0x1ef   : > { %v1507_v8 = vadd.f32 %v1505_v14, %v1474_v49  ;;  %v1508_v3 = vadd.f32 %v1506_v53, %v1475_v28  ;;  %1884 = vrot.lane.b32.xlu2 %v2523_v41, %s2455_s5 }
 0x1f0   : > { %v1524_v6 = vpop.permute.xlu1 %1523  ;;  %v1522_v40 = vpop.permute.xlu0 %1521 }
 0x1f1   : > { %v1525_v27 = vsel %vm1515_vm2, %v1522_v40, %v1524_v6  ;;  %v1529_v61 = vsel %vm1515_vm2, %v1524_v6, %v1522_v40  ;;  %v3968_v60 = vpop.permute.xlu2 %1612  ;;  %vm1548_vm2 = vcmask 900096  }
 0x1f2   : > { %v1534_v18 = vmul.f32 %v1533_v15, %v1525_v27  ;;  %v1535_v45 = vmul.f32 %v1533_v15, %v1529_v61  ;;  %v1599_v15 = vstv %s2277_s10  ;;  %v347_v27 = vadd.s32 2, %v2639_v24  ;;  %s4204_s10 = sld [smem:[#allocation3 + $0x5e]] }
 0x1f3   : > { %v348_v61 = vadd.s32 2, %v2641_v25 }
 0x1f4   : > { %v1536_v47 = vadd.f32 %v1534_v18, %v1531_v35  ;;  %v1537_v30 = vadd.f32 %v1535_v45, %v1532_v58  ;;  %vm351_vm10 = vcmp.lt.s32.totalorder %v347_v27, 16 }
 0x1f5   : > { %vm350_vm5 = vcmp.ge.s32.totalorder %v348_v61, 0  ;;  %vm352_vm8 = vcmp.lt.s32.totalorder %v348_v61, 16 }
 0x1f6   : > { %v1538_v22 = vsel %vm1509_vm13, %v1536_v47, 0.0  ;;  %v1539_v5 = vsel %vm1510_vm12, %v1537_v30, 0.0  ;;  %1907 = vrot.lane.b32.xlu1 %v2513_v33, %s2456_s8  ;;  %1886 = vrot.lane.b32.xlu0 %v2518_v38, %s2455_s5  ;;  %vm1542_vm13 = vmand %vm3855_vm3, %vm4609_vm14  ;;  %vm4610_vm12 = vnez %v4512_v50  ;;  %s2236_s5 = sld [smem:[#allocation3 + $0x2a]] }
 0x1f7   : > { %v1540_v49 = vadd.f32 %v1538_v22, %v1507_v8  ;;  %v1541_v28 = vadd.f32 %v1539_v5, %v1508_v3  ;;  %1909 = vrot.lane.b32.xlu2 %v2511_v32, %s2456_s8  ;;  %vm1543_vm11 = vmand %vm3863_vm6, %vm4610_vm12  ;;  %v1596_v3 = vstv %s2228_s9  ;;  %s4202_s9 = sld [smem:[#allocation3 + $0x5d]] }
 0x1f8   : > { %v1555_v52 = vpop.permute.xlu1 %1554  ;;  %v1547_v36 = vpop.permute.xlu0 %1546 }
 0x1f9   : > { %v1558_v55 = vsel %vm1548_vm2, %v1555_v52, %v3930_v20  ;;  %v1562_v44 = vsel %vm1548_vm2, %v3930_v20, %v1555_v52  ;;  %v1549_v17 = vsel %vm1548_vm2, %v3915_v29, %v1547_v36  ;;  %v1553_v51 = vsel %vm1548_vm2, %v1547_v36, %v3915_v29  ;;  %v3987_v0 = vpop.permute.xlu2 %1643 }
 0x1fa   : > { %v1567_v37 = vmul.f32 %v1566_v39, %v1558_v55  ;;  %v1568_v59 = vmul.f32 %v1566_v39, %v1562_v44  ;;  %v1564_v63 = vmul.f32 %v1563_v13, %v1549_v17  ;;  %v1565_v10 = vmul.f32 %v1563_v13, %v1553_v51 }
 0x1fb   : > { %vm1581_vm2 = vcmask 891904   ;;  %v1632_v36 = vstv %s4008_s13  ;;  %s4244_s13 = sld [smem:[#allocation3 + $0x2f]] }
 0x1fc   : > { %v1569_v20 = vadd.f32 %v1567_v37, %v1564_v63  ;;  %v1570_v26 = vadd.f32 %v1568_v59, %v1565_v10 }
 0x1fe   : > { %v1571_v62 = vsel %vm1542_vm13, %v1569_v20, 0.0  ;;  %v1572_v29 = vsel %vm1543_vm11, %v1570_v26, 0.0  ;;  %1919 = vrot.lane.b32.xlu1 %v2518_v38, %s2456_s8  ;;  %1917 = vrot.lane.b32.xlu0 %v2523_v41, %s2456_s8  ;;  %vm4440_vm11 = vcmask 809984   ;;  %vm4611_vm13 = vnez %v4525_v34  ;;  %s4198_s8 = sld [smem:[#allocation3 + $0x5c]] }
 0x1ff   : > { %v1573_v9 = vadd.f32 %v1571_v62, %v1540_v49  ;;  %v1574_v46 = vadd.f32 %v1572_v29, %v1541_v28  ;;  %1940 = vrot.lane.b32.xlu2 %v2513_v33, %s2457_s11  ;;  %vm1575_vm12 = vmand %vm3855_vm3, %vm4611_vm13 }
 0x200   : > { %v1580_v23 = vpop.permute.xlu1 %1579  ;;  %v1578_v14 = vpop.permute.xlu0 %1577 }
 0x201   : > { %v1582_v53 = vsel %vm1581_vm2, %v1578_v14, %v1580_v23  ;;  %v1586_v4 = vsel %vm1581_vm2, %v1580_v23, %v1578_v14  ;;  %v4002_v8 = vpop.permute.xlu2 %1655 }
 0x202   : > { %v1597_v30 = vmul.f32 %v1596_v3, %v1582_v53  ;;  %v1598_v22 = vmul.f32 %v1596_v3, %v1586_v4  ;;  %v1665_v53 = vstv %s4033_s17  ;;  %v1662_v4 = vstv %s4041_s18  ;;  %s4255_s17 = sld [smem:[#allocation3 + $0x60]] }
 0x203   : > { %s4310_s18 = sld [smem:[#allocation3 + $0x61]] }
 0x206   : > { %1950 = vrot.lane.b32.xlu1 %v2523_v41, %s2457_s11  ;;  %1942 = vrot.lane.b32.xlu0 %v2511_v32, %s2457_s11 }
 0x207   : > { %1952 = vrot.lane.b32.xlu2 %v2518_v38, %s2457_s11  ;;  %s4206_s11 = sld [smem:[#allocation3 + $0x2d]] }
 0x208   : > { %v1611_v6 = vpop.permute.xlu1 %1610  ;;  %v1590_v40 = vpop.permute.xlu0 %1589 }
 0x209   : > { %v1615_v35 = vsel %vm4440_vm11, %v1611_v6, %v3968_v60  ;;  %v1619_v58 = vsel %vm4440_vm11, %v3968_v60, %v1611_v6  ;;  %v1591_v18 = vsel %vm1581_vm2, %v3947_v7, %v1590_v40  ;;  %v1595_v45 = vsel %vm1581_vm2, %v1590_v40, %v3947_v7  ;;  %v4021_v47 = vpop.permute.xlu2 %1686 }
 0x20a   : > { %v1600_v5 = vmul.f32 %v1599_v15, %v1591_v18  ;;  %v1601_v49 = vmul.f32 %v1599_v15, %v1595_v45  ;;  %vm4612_vm11 = vnez %v4530_v48  ;;  %vm349_vm2 = vcmp.ge.s32.totalorder %v347_v27, 0 }
 0x20b   : > { %vm1576_vm14 = vmand %vm3863_vm6, %vm4612_vm11  ;;  %v1630_v63 = vmul.f32 %v1629_v21, %v1615_v35  ;;  %v1631_v10 = vmul.f32 %v1629_v21, %v1619_v58 }
 0x20c   : > { %v1602_v60 = vadd.f32 %v1600_v5, %v1597_v30  ;;  %v1603_v7 = vadd.f32 %v1601_v49, %v1598_v22  ;;  %vm4036_vm3 = vmand %vm349_vm2, %vm351_vm10 }
 0x20d   : > { %vm4046_vm6 = vmand %vm350_vm5, %vm352_vm8  ;;  %vm1647_vm5 = vcmask 801792  }
 0x20e   : > { %v1604_v28 = vsel %vm1575_vm12, %v1602_v60, 0.0  ;;  %v1605_v39 = vsel %vm1576_vm14, %v1603_v7, 0.0  ;;  %1975 = vrot.lane.b32.xlu1 %v2511_v32, %s2458_s16  ;;  %1973 = vrot.lane.b32.xlu0 %v2513_v33, %s2458_s16  ;;  %vm4617_vm14 = vcmask 809984   ;;  %vm1608_vm10 = vmand %vm4036_vm3, %vm2759_vm7 }
 0x20f   : > { %v1606_v13 = vadd.f32 %v1604_v28, %v1573_v9  ;;  %v1607_v31 = vadd.f32 %v1605_v39, %v1574_v46  ;;  %1983 = vrot.lane.b32.xlu2 %v2523_v41, %s2458_s16  ;;  %vm4618_vm12 = vmmov %vm4617_vm14 }
 0x210   : > { %v1623_v55 = vpop.permute.xlu1 %1622  ;;  %v1621_v17 = vpop.permute.xlu0 %1620  ;;  %vm1609_vm8 = vmand %vm4046_vm6, %vm2769_vm4 }
 0x211   : > { %v1624_v51 = vsel %vm4617_vm14, %v1621_v17, %v1623_v55  ;;  %v1628_v37 = vsel %vm4618_vm12, %v1623_v55, %v1621_v17  ;;  %v4052_v59 = vpop.permute.xlu2 %1711  ;;  %vm1641_vm2 = vmand %vm4036_vm3, %vm2836_vm9  ;;  %vm1680_vm12 = vcmask 793600  }
 0x212   : > { %v1633_v20 = vmul.f32 %v1632_v36, %v1624_v51  ;;  %v1634_v26 = vmul.f32 %v1632_v36, %v1628_v37  ;;  %vm1642_vm14 = vmand %vm4046_vm6, %vm4581_vm15  ;;  %v1698_v36 = vstv %s2280_s21 }
 0x214   : > { %v1635_v62 = vadd.f32 %v1633_v20, %v1630_v63  ;;  %v1636_v29 = vadd.f32 %v1634_v26, %v1631_v10 }
 0x216   : > { %v1637_v9 = vsel %vm1608_vm10, %v1635_v62, 0.0  ;;  %v1638_v46 = vsel %vm1609_vm8, %v1636_v29, 0.0  ;;  %2006 = vrot.lane.b32.xlu1 %v2513_v33, %s2459_s1  ;;  %1985 = vrot.lane.b32.xlu0 %v2518_v38, %s2458_s16  ;;  %vm1713_vm10 = vcmask 785408   ;;  %vm1674_vm8 = vmand %vm4036_vm3, %vm2812_vm0  ;;  %v1728_v29 = vstv %s4088_s23  ;;  %s4253_s16 = sld [smem:[#allocation3 + $0x5f]] }
 0x217   : > { %v1639_v23 = vadd.f32 %v1637_v9, %v1606_v13  ;;  %v1640_v14 = vadd.f32 %v1638_v46, %v1607_v31  ;;  %2008 = vrot.lane.b32.xlu2 %v2511_v32, %s2459_s1  ;;  %v1695_v31 = vstv %s2231_s20 }
 0x218   : > { %v1654_v3 = vpop.permute.xlu1 %1653  ;;  %v1646_v15 = vpop.permute.xlu0 %1645 }
 0x219   : > { %v1657_v6 = vsel %vm1647_vm5, %v1654_v3, %v4002_v8  ;;  %v1661_v40 = vsel %vm1647_vm5, %v4002_v8, %v1654_v3  ;;  %v1648_v27 = vsel %vm1647_vm5, %v3987_v0, %v1646_v15  ;;  %v1652_v61 = vsel %vm1647_vm5, %v1646_v15, %v3987_v0  ;;  %v4071_v35 = vpop.permute.xlu2 %1742  ;;  %vm1675_vm5 = vmand %vm4046_vm6, %vm4582_vm1 }
 0x21a   : > { %v1666_v58 = vmul.f32 %v1665_v53, %v1657_v6  ;;  %v1667_v18 = vmul.f32 %v1665_v53, %v1661_v40  ;;  %v1663_v45 = vmul.f32 %v1662_v4, %v1648_v27  ;;  %v1664_v30 = vmul.f32 %v1662_v4, %v1652_v61 }
 0x21c   : > { %v1668_v8 = vadd.f32 %v1666_v58, %v1663_v45  ;;  %v1669_v22 = vadd.f32 %v1667_v18, %v1664_v30 }
 0x21e   : > { %v1670_v5 = vsel %vm1641_vm2, %v1668_v8, 0.0  ;;  %v1671_v0 = vsel %vm1642_vm14, %v1669_v22, 0.0  ;;  %2018 = vrot.lane.b32.xlu1 %v2518_v38, %s2459_s1  ;;  %2016 = vrot.lane.b32.xlu0 %v2523_v41, %s2459_s1  ;;  %vm4619_vm2 = vnez %v4480_v16  ;;  %s4320_s1 = sld [smem:[#allocation3 + $0x30]] }
 0x21f   : > { %v1672_v49 = vadd.f32 %v1670_v5, %v1639_v23  ;;  %v1673_v60 = vadd.f32 %v1671_v0, %v1640_v14  ;;  %2039 = vrot.lane.b32.xlu2 %v2513_v33, %s2460_s22  ;;  %v1731_v23 = vstv %s4090_s24  ;;  %vm1707_vm14 = vmand %vm4036_vm3, %vm4619_vm2  ;;  %v1764_v5 = vstv %s4111_s25 }
 0x220   : > { %v1679_v7 = vpop.permute.xlu1 %1678  ;;  %v1677_v28 = vpop.permute.xlu0 %1676  ;;  %v1761_v0 = vstv %s4115_s26 }
 0x221   : > { %v1681_v39 = vsel %vm1680_vm12, %v1677_v28, %v1679_v7  ;;  %v1685_v21 = vsel %vm1680_vm12, %v1679_v7, %v1677_v28  ;;  %v1755_v13 = vpop.permute.xlu2 %1754 }
 0x222   : > { %v1696_v63 = vmul.f32 %v1695_v31, %v1681_v39 }
 0x226   : > { %2049 = vrot.lane.b32.xlu1 %v2523_v41, %s2460_s22  ;;  %2041 = vrot.lane.b32.xlu0 %v2511_v32, %s2460_s22 }
 0x227   : > { %2051 = vrot.lane.b32.xlu2 %v2518_v38, %s2460_s22  ;;  %v1697_v38 = vmul.f32 %v1695_v31, %v1685_v21  ;;  %s185_s22 = scalar_lea.vmem %s4397_s3, %s2296_s19 }
 0x228   : > { %v1710_v33 = vpop.permute.xlu1 %1709  ;;  %v1689_v55 = vpop.permute.xlu0 %1688 }
 0x229   : > { %v1714_v17 = vsel %vm1713_vm10, %v1710_v33, %v4052_v59  ;;  %v1718_v41 = vsel %vm1713_vm10, %v4052_v59, %v1710_v33  ;;  %v1690_v32 = vsel %vm1680_vm12, %v4021_v47, %v1689_v55  ;;  %v1694_v51 = vsel %vm1680_vm12, %v1689_v55, %v4021_v47  ;;  %v4101_v37 = vpop.permute.xlu2 %1785 }
 0x22a   : > { %v1699_v10 = vmul.f32 %v1698_v36, %v1690_v32  ;;  %v1700_v20 = vmul.f32 %v1698_v36, %v1694_v51  ;;  %v1729_v6 = vmul.f32 %v1728_v29, %v1714_v17  ;;  %v1730_v40 = vmul.f32 %v1728_v29, %v1718_v41 }
 0x22b   : > { %vm4620_vm12 = vnez %v4486_v1 }
 0x22c   : > { %v1701_v59 = vadd.f32 %v1699_v10, %v1696_v63  ;;  %v1702_v26 = vadd.f32 %v1700_v20, %v1697_v38 }
 0x22e   : > { %v1703_v47 = vsel %vm1674_vm8, %v1701_v59, 0.0  ;;  %v1704_v62 = vsel %vm1675_vm5, %v1702_v26, 0.0  ;;  %vm1708_vm8 = vmand %vm4046_vm6, %vm4620_vm12  ;;  %vm4621_vm5 = vnez %v4491_v11 }
 0x22f   : > { %v1705_v9 = vadd.f32 %v1703_v47, %v1672_v49  ;;  %v1706_v46 = vadd.f32 %v1704_v62, %v1673_v60  ;;  %v1794_v47 = vstv %s2234_s27  ;;  %v1797_v62 = vstv %s2283_s28 }
 0x230   : > { %v1722_v14 = vpop.permute.xlu1 %1721  ;;  %v1720_v53 = vpop.permute.xlu0 %1719 }
 0x231   : > { %v1723_v4 = vsel %vm1713_vm10, %v1720_v53, %v1722_v14  ;;  %v1727_v3 = vsel %vm1713_vm10, %v1722_v14, %v1720_v53  ;;  %v1811_v15 = vpop.permute.xlu2 %1810  ;;  %vm1746_vm10 = vcmask 777216  }
 0x232   : > { %v1732_v27 = vmul.f32 %v1731_v23, %v1723_v4  ;;  %v1733_v61 = vmul.f32 %v1731_v23, %v1727_v3 }
 0x234   : > { %v1734_v58 = vadd.f32 %v1732_v27, %v1729_v6  ;;  %v1735_v18 = vadd.f32 %v1733_v61, %v1730_v40 }
 0x236   : > { %v1736_v45 = vsel %vm1707_vm14, %v1734_v58, 0.0  ;;  %v1737_v30 = vsel %vm1708_vm8, %v1735_v18, 0.0  ;;  %vm1740_vm14 = vmand %vm4036_vm3, %vm4621_vm5  ;;  %vm4622_vm8 = vnez %v4502_v57  ;;  %vm4624_vm5 = vnez %v4512_v50 }
 0x237   : > { %v1738_v8 = vadd.f32 %v1736_v45, %v1705_v9  ;;  %v1739_v22 = vadd.f32 %v1737_v30, %v1706_v46  ;;  %vm1741_vm12 = vmand %vm4046_vm6, %vm4622_vm8  ;;  %vm4443_vm8 = vcmask 760832   ;;  %v1827_v18 = vstv %s4145_s29 }
 0x238   : > { %v1753_v49 = vpop.permute.xlu1 %1752  ;;  %v1745_v60 = vpop.permute.xlu0 %1744  ;;  %v1830_v30 = vstv %s2284_s30 }
 0x239   : > { %v1756_v7 = vsel %vm1746_vm10, %v1753_v49, %v1755_v13  ;;  %v1760_v28 = vsel %vm1746_vm10, %v1755_v13, %v1753_v49  ;;  %v1747_v39 = vsel %vm1746_vm10, %v4071_v35, %v1745_v60  ;;  %v1751_v21 = vsel %vm1746_vm10, %v1745_v60, %v4071_v35  ;;  %v4139_v17 = vpop.permute.xlu2 %1841 }
 0x23a   : > { %v1765_v31 = vmul.f32 %v1764_v5, %v1756_v7  ;;  %v1766_v36 = vmul.f32 %v1764_v5, %v1760_v28  ;;  %v1762_v33 = vmul.f32 %v1761_v0, %v1747_v39  ;;  %v1763_v55 = vmul.f32 %v1761_v0, %v1751_v21 }
 0x23b   : > { %vm1779_vm10 = vcmask 769024  }
 0x23c   : > { %v1767_v13 = vadd.f32 %v1765_v31, %v1762_v33  ;;  %v1768_v41 = vadd.f32 %v1766_v36, %v1763_v55 }
 0x23e   : > { %v1769_v32 = vsel %vm1740_vm14, %v1767_v13, 0.0  ;;  %v1770_v35 = vsel %vm1741_vm12, %v1768_v41, 0.0  ;;  %vm4623_vm12 = vnez %v4507_v42 }
 0x23f   : > { %v1771_v51 = vadd.f32 %v1769_v32, %v1738_v8  ;;  %v1772_v63 = vadd.f32 %v1770_v35, %v1739_v22  ;;  %vm1773_vm14 = vmand %vm4036_vm3, %vm4623_vm12 }
 0x240   : > { %v1778_v38 = vpop.permute.xlu1 %1777  ;;  %v1776_v10 = vpop.permute.xlu0 %1775 }
 0x241   : > { %v1780_v20 = vsel %vm1779_vm10, %v1776_v10, %v1778_v38  ;;  %v1784_v59 = vsel %vm1779_vm10, %v1778_v38, %v1776_v10  ;;  %v4143_v26 = vpop.permute.xlu2 %1853 }
 0x242   : > { %v1795_v4 = vmul.f32 %v1794_v47, %v1780_v20  ;;  %v1796_v3 = vmul.f32 %v1794_v47, %v1784_v59 }
 0x248   : > { %v1809_v29 = vpop.permute.xlu1 %1808  ;;  %v1788_v9 = vpop.permute.xlu0 %1787 }
 0x249   : > { %v1813_v46 = vsel %vm4443_vm8, %v1809_v29, %v1811_v15  ;;  %v1817_v23 = vsel %vm4443_vm8, %v1811_v15, %v1809_v29  ;;  %v1789_v14 = vsel %vm1779_vm10, %v4101_v37, %v1788_v9  ;;  %v1793_v53 = vsel %vm1779_vm10, %v1788_v9, %v4101_v37  ;;  %vm1774_vm8 = vmand %vm4046_vm6, %vm4624_vm5  ;;  %v4162_v8 = vpop.permute.xlu2 %1884 }
 0x24a   : > { %v1798_v6 = vmul.f32 %v1797_v62, %v1789_v14  ;;  %v1799_v40 = vmul.f32 %v1797_v62, %v1793_v53  ;;  %vm4625_vm10 = vcmask 760832   ;;  %v1828_v60 = vmul.f32 %v1827_v18, %v1813_v46 }
 0x24b   : > { %vm4626_vm12 = vmmov %vm4625_vm10  ;;  %v1829_v7 = vmul.f32 %v1827_v18, %v1817_v23  ;;  %v355_v62 = vadd.s32 3, %v2639_v24  ;;  %v356_v46 = vadd.s32 3, %v2641_v25  ;;  %v1863_v23 = vstv %s2285_s4 }
 0x24c   : > { %v1800_v15 = vadd.f32 %v1798_v6, %v1795_v4  ;;  %v1801_v27 = vadd.f32 %v1799_v40, %v1796_v3  ;;  %v1860_v53 = vstv %s2236_s5  ;;  %v1893_v18 = vstv %s4189_s6 }
 0x24e   : > { %v1802_v61 = vsel %vm1773_vm14, %v1800_v15, 0.0  ;;  %v1803_v58 = vsel %vm1774_vm8, %v1801_v27, 0.0  ;;  %vm1806_vm14 = vmand %vm4036_vm3, %vm4611_vm13  ;;  %vm1845_vm3 = vcmask 678912  }
 0x24f   : > { %v1804_v37 = vadd.f32 %v1802_v61, %v1771_v51  ;;  %v1805_v45 = vadd.f32 %v1803_v58, %v1772_v63  ;;  %vm1807_vm8 = vmand %vm4046_vm6, %vm4612_vm11  ;;  %vm357_vm6 = vcmp.ge.s32.totalorder %v355_v62, 0  ;;  %vm1878_vm11 = vcmask 670720  }
 0x250   : > { %v1821_v22 = vpop.permute.xlu1 %1820  ;;  %v1819_v5 = vpop.permute.xlu0 %1818 }
 0x251   : > { %v1822_v0 = vsel %vm4625_vm10, %v1819_v5, %v1821_v22  ;;  %v1826_v49 = vsel %vm4626_vm12, %v1821_v22, %v1819_v5  ;;  %v4178_v35 = vpop.permute.xlu2 %1909  ;;  %vm359_vm12 = vcmp.lt.s32.totalorder %v355_v62, 16  ;;  %vm358_vm10 = vcmp.ge.s32.totalorder %v356_v46, 0 }
 0x252   : > { %v1831_v28 = vmul.f32 %v1830_v30, %v1822_v0  ;;  %v1832_v39 = vmul.f32 %v1830_v30, %v1826_v49  ;;  %v1926_v49 = vstv %s4194_s7 }
 0x254   : > { %v1833_v21 = vadd.f32 %v1831_v28, %v1828_v60  ;;  %v1834_v31 = vadd.f32 %v1832_v39, %v1829_v7  ;;  %v1929_v7 = vstv %s4202_s9 }
 0x256   : > { %v1835_v36 = vsel %vm1806_vm14, %v1833_v21, 0.0  ;;  %v1836_v33 = vsel %vm1807_vm8, %v1834_v31, 0.0  ;;  %vm360_vm14 = vcmp.lt.s32.totalorder %v356_v46, 16  ;;  %vm4208_vm8 = vmand %vm357_vm6, %vm359_vm12  ;;  %vm1911_vm12 = vcmask 662528  }
 0x257   : > { %v4174_v55 = vadd.f32 %v1835_v36, %v1804_v37  ;;  %v4176_v13 = vadd.f32 %v1836_v33, %v1805_v45  ;;  %vm1839_vm6 = vmand %vm4208_vm8, %vm2759_vm7  ;;  %v1896_v45 = vstv %s4198_s8  ;;  %v1962_v31 = vstv %s4204_s10 }
 0x258   : > { %v1852_v41 = vpop.permute.xlu1 %1851  ;;  %v1844_v32 = vpop.permute.xlu0 %1843  ;;  %v1959_v36 = vstv %s4206_s11  ;;  %vm1872_vm7 = vmand %vm4208_vm8, %vm2836_vm9  ;;  %vm2010_vm9 = vcmask 637952  }
 0x259   : > { %v4180_v63 = vpop.permute.xlu2 %1940  ;;  %v1855_v14 = vsel %vm1845_vm3, %v1852_v41, %v4143_v26  ;;  %v1846_v4 = vsel %vm1845_vm3, %v4139_v17, %v1844_v32  ;;  %v1859_v3 = vsel %vm1845_vm3, %v4143_v26, %v1852_v41  ;;  %v1850_v24 = vsel %vm1845_vm3, %v1844_v32, %v4139_v17  ;;  %vm4212_vm3 = vmand %vm358_vm10, %vm360_vm14 }
 0x25a   : > { %v1864_v25 = vmul.f32 %v1863_v23, %v1855_v14  ;;  %v1861_v6 = vmul.f32 %v1860_v53, %v1846_v4  ;;  %v1865_v40 = vmul.f32 %v1863_v23, %v1859_v3  ;;  %v1862_v15 = vmul.f32 %v1860_v53, %v1850_v24  ;;  %vm1840_vm10 = vmand %vm4212_vm3, %vm2769_vm4 }
 0x25b   : > { %vm1944_vm14 = vcmask 654336   ;;  %vm1977_vm4 = vcmask 646144  }
 0x25c   : > { %v1866_v58 = vadd.f32 %v1864_v25, %v1861_v6  ;;  %v1867_v37 = vadd.f32 %v1865_v40, %v1862_v15  ;;  %v2025_v25 = vstv %s4244_s13  ;;  %v1995_v15 = vstv %s4253_s16 }
 0x25e   : > { %v1868_v43 = vsel %vm1839_vm6, %v1866_v58, 0.0  ;;  %vm1905_vm6 = vmand %vm4208_vm8, %vm2812_vm0  ;;  %vm4632_vm0 = vnez %v4491_v11 }
 0x260   : > { %v1877_v52 = vpop.permute.xlu1 %1876  ;;  %v1875_v51 = vpop.permute.xlu0 %1874 }
 0x261   : > { %v4184_v10 = vpop.permute.xlu2 %1952  ;;  %v1879_v5 = vsel %vm1878_vm11, %v1875_v51, %v1877_v52  ;;  %v1883_v0 = vsel %vm1878_vm11, %v1877_v52, %v1875_v51 }
 0x262   : > { %v1894_v33 = vmul.f32 %v1893_v18, %v1879_v5  ;;  %v1895_v41 = vmul.f32 %v1893_v18, %v1883_v0  ;;  %v2028_v5 = vstv %s4255_s17 }
 0x268   : > { %v4182_v38 = vpop.permute.xlu1 %1907  ;;  %v1887_v44 = vpop.permute.xlu0 %1886 }
 0x269   : > { %v4186_v47 = vpop.permute.xlu2 %1983  ;;  %v1888_v30 = vsel %vm1878_vm11, %v4162_v8, %v1887_v44  ;;  %v1892_v60 = vsel %vm1878_vm11, %v1887_v44, %v4162_v8  ;;  %v1869_v8 = vsel %vm1840_vm10, %v1867_v37, 0.0  ;;  %v1912_v52 = vsel %vm1911_vm12, %v4182_v38, %v4178_v35  ;;  %vm1873_vm11 = vmand %vm4212_vm3, %vm4581_vm15 }
 0x26a   : > { %v1897_v21 = vmul.f32 %v1896_v45, %v1888_v30  ;;  %v1898_v32 = vmul.f32 %v1896_v45, %v1892_v60  ;;  %v1916_v56 = vsel %vm1911_vm12, %v4178_v35, %v4182_v38  ;;  %v1870_v35 = vadd.f32 %v1868_v43, %v4174_v55  ;;  %vm1938_vm10 = vmand %vm4208_vm8, %vm4619_vm2 }
 0x26b   : > { %v1871_v38 = vadd.f32 %v1869_v8, %v4176_v13  ;;  %v1927_v4 = vmul.f32 %v1926_v49, %v1912_v52  ;;  %v1928_v3 = vmul.f32 %v1926_v49, %v1916_v56  ;;  %vm4631_vm15 = vnez %v4486_v1 }
 0x26c   : > { %v1899_v53 = vadd.f32 %v1897_v21, %v1894_v33 }
 0x26e   : > { %v1901_v40 = vsel %vm1872_vm7, %v1899_v53, 0.0 }
 0x26f   : > { %v1903_v33 = vadd.f32 %v1901_v40, %v1870_v35 }
 0x270   : > { %v1920_v20 = vpop.permute.xlu1 %1919  ;;  %v1918_v59 = vpop.permute.xlu0 %1917 }
 0x271   : > { %v4230_v22 = vpop.permute.xlu2 %2008  ;;  %v1921_v28 = vsel %vm1911_vm12, %v1918_v59, %v1920_v20  ;;  %v1925_v39 = vsel %vm1911_vm12, %v1920_v20, %v1918_v59  ;;  %vm1906_vm12 = vmand %vm4212_vm3, %vm4582_vm1 }
 0x272   : > { %v1930_v51 = vmul.f32 %v1929_v7, %v1921_v28  ;;  %v1931_v44 = vmul.f32 %v1929_v7, %v1925_v39  ;;  %vm1971_vm1 = vmand %vm4208_vm8, %vm4632_vm0 }
 0x274   : > { %v1932_v54 = vadd.f32 %v1930_v51, %v1927_v4  ;;  %v1933_v24 = vadd.f32 %v1931_v44, %v1928_v3 }
 0x278   : > { %v1951_v29 = vpop.permute.xlu1 %1950  ;;  %v4191_v9 = vpop.permute.xlu0 %1942 }
 0x279   : > { %v1954_v20 = vsel %vm1944_vm14, %v1951_v29, %v4184_v10  ;;  %v1958_v59 = vsel %vm1944_vm14, %v4184_v10, %v1951_v29  ;;  %v1945_v62 = vsel %vm1944_vm14, %v4180_v63, %v4191_v9  ;;  %v1949_v46 = vsel %vm1944_vm14, %v4191_v9, %v4180_v63  ;;  %v2040_v6 = vpop.permute.xlu2 %2039  ;;  %vm1939_vm14 = vmand %vm4212_vm3, %vm4631_vm15 }
 0x27a   : > { %v1900_v10 = vadd.f32 %v1898_v32, %v1895_v41  ;;  %v1992_v29 = vstv %s4228_s12  ;;  %v1963_v55 = vmul.f32 %v1962_v31, %v1954_v20  ;;  %v1964_v13 = vmul.f32 %v1962_v31, %v1958_v59 }
 0x27b   : > { %v1960_v63 = vmul.f32 %v1959_v36, %v1945_v62  ;;  %v1961_v9 = vmul.f32 %v1959_v36, %v1949_v46 }
 0x27c   : > { %v1902_v37 = vsel %vm1873_vm11, %v1900_v10, 0.0  ;;  %vm4634_vm11 = vnez %v4507_v42 }
 0x27d   : > { %v1966_v12 = vadd.f32 %v1964_v13, %v1961_v9  ;;  %v1904_v41 = vadd.f32 %v1902_v37, %v1871_v38  ;;  %vm2004_vm2 = vmand %vm4208_vm8, %vm4634_vm11 }
 0x27f   : > { %v1968_v52 = vsel %vm1939_vm14, %v1966_v12, 0.0 }
 0x280   : > { %v4216_v27 = vpop.permute.xlu1 %1975  ;;  %v4218_v61 = vpop.permute.xlu0 %1973 }
 0x281   : > { %v1978_v45 = vsel %vm1977_vm4, %v4218_v61, %v4216_v27  ;;  %v1982_v30 = vsel %vm1977_vm4, %v4216_v27, %v4218_v61  ;;  %v1934_v27 = vsel %vm1905_vm6, %v1932_v54, 0.0  ;;  %v1935_v61 = vsel %vm1906_vm12, %v1933_v24, 0.0  ;;  %vm2005_vm6 = vmand %vm4212_vm3, %vm4624_vm5  ;;  %v2052_v1 = vpop.permute.xlu2 %2051 }
 0x282   : > { %v1993_v39 = vmul.f32 %v1992_v29, %v1978_v45  ;;  %v1994_v43 = vmul.f32 %v1992_v29, %v1982_v30  ;;  %v1936_v20 = vadd.f32 %v1934_v27, %v1903_v33  ;;  %v1937_v59 = vadd.f32 %v1935_v61, %v1904_v41  ;;  %vm2037_vm5 = vmand %vm4208_vm8, %vm4611_vm13 }
 0x283   : > { %vm4635_vm12 = vnez %v4530_v48 }
 0x284   : > { %v1970_v46 = vadd.f32 %v1968_v52, %v1937_v59 }
 0x288   : > { %v2007_v23 = vpop.permute.xlu1 %2006  ;;  %v1986_v14 = vpop.permute.xlu0 %1985 }
 0x289   : > { %v1987_v58 = vsel %vm1977_vm4, %v4186_v47, %v1986_v14  ;;  %v1991_v18 = vsel %vm1977_vm4, %v1986_v14, %v4186_v47  ;;  %v1965_v47 = vadd.f32 %v1963_v55, %v1960_v63  ;;  %v2011_v0 = vsel %vm2010_vm9, %v2007_v23, %v4230_v22 }
 0x28a   : > { %v2015_v49 = vsel %vm2010_vm9, %v4230_v22, %v2007_v23  ;;  %v1996_v22 = vmul.f32 %v1995_v15, %v1987_v58  ;;  %v1997_v60 = vmul.f32 %v1995_v15, %v1991_v18  ;;  %v2026_v31 = vmul.f32 %v2025_v25, %v2011_v0 }
 0x28b   : > { %v2027_v36 = vmul.f32 %v2025_v25, %v2015_v49  ;;  %v1967_v32 = vsel %vm1938_vm10, %v1965_v47, 0.0  ;;  %vm4633_vm4 = vnez %v4502_v57  ;;  %v2061_v23 = vstv %s4310_s18  ;;  %vm2038_vm10 = vmand %vm4212_vm3, %vm4635_vm12 }
 0x28c   : > { %vm1972_vm7 = vmand %vm4212_vm3, %vm4633_vm4  ;;  %v1998_v56 = vadd.f32 %v1996_v22, %v1993_v39  ;;  %v1999_v51 = vadd.f32 %v1997_v60, %v1994_v43  ;;  %v1969_v62 = vadd.f32 %v1967_v32, %v1936_v20  ;;  %v2058_v14 = vstv %s4320_s1 }
 0x28e   : > { %v2000_v42 = vsel %vm1971_vm1, %v1998_v56, 0.0  ;;  %v2001_v50 = vsel %vm1972_vm7, %v1999_v51, 0.0  ;;  %vm4636_vm7 = vcmask 1043456   ;;  %v4637_v51 = vld [vmem:[#allocation6_spill] sm:$0xff] }
 0x28f   : > { %v2002_v57 = vadd.f32 %v2000_v42, %v1969_v62  ;;  %v2003_v54 = vadd.f32 %v2001_v50, %v1970_v46 }
 0x290   : > { %v2019_v7 = vpop.permute.xlu1 %2018  ;;  %v2017_v28 = vpop.permute.xlu0 %2016 }
 0x291   : > { %v2020_v19 = vsel %vm2010_vm9, %v2017_v28, %v2019_v7  ;;  %v2024_v21 = vsel %vm2010_vm9, %v2019_v7, %v2017_v28  ;;  %vm2043_vm9 = vcmask 629760  }
 0x292   : > { %v2029_v2 = vmul.f32 %v2028_v5, %v2020_v19  ;;  %v2030_v8 = vmul.f32 %v2028_v5, %v2024_v21 }
 0x294   : > { %v2031_v16 = vadd.f32 %v2029_v2, %v2026_v31  ;;  %v2032_v44 = vadd.f32 %v2030_v8, %v2027_v36 }
 0x296   : > { %v2033_v35 = vsel %vm2004_vm2, %v2031_v16, 0.0  ;;  %v2034_v38 = vsel %vm2005_vm6, %v2032_v44, 0.0 }
 0x297   : > { %v2035_v40 = vadd.f32 %v2033_v35, %v2002_v57 }
 0x298   : > { %v2050_v53 = vpop.permute.xlu1 %2049  ;;  %v2042_v4 = vpop.permute.xlu0 %2041 }
 0x299   : > { %v2053_v3 = vsel %vm2043_vm9, %v2050_v53, %v2052_v1  ;;  %v2057_v10 = vsel %vm2043_vm9, %v2052_v1, %v2050_v53  ;;  %v2044_v29 = vsel %vm2043_vm9, %v2040_v6, %v2042_v4  ;;  %v2048_v55 = vsel %vm2043_vm9, %v2042_v4, %v2040_v6 }
 0x29a   : > { %v2062_v13 = vmul.f32 %v2061_v23, %v2053_v3  ;;  %v2063_v63 = vmul.f32 %v2061_v23, %v2057_v10  ;;  %v2059_v11 = vmul.f32 %v2058_v14, %v2044_v29  ;;  %v2060_v9 = vmul.f32 %v2058_v14, %v2048_v55 }
 0x29b   : > { %v2036_v6 = vadd.f32 %v2034_v38, %v2003_v54 }
 0x29c   : > { %v2064_v24 = vadd.f32 %v2062_v13, %v2059_v11  ;;  %v2065_v25 = vadd.f32 %v2063_v63, %v2060_v9 }
 0x29e   : > { %v2066_v15 = vsel %vm2037_vm5, %v2064_v24, 0.0  ;;  %v2067_v58 = vsel %vm2038_vm10, %v2065_v25, 0.0 }
 0x29f   : > { %v2068_v18 = vadd.f32 %v2066_v15, %v2035_v40  ;;  %v2069_v34 = vadd.f32 %v2067_v58, %v2036_v6 }
 0x2a1   : > { %v2292_v37 = vmul.f32 -1.442695, %v2068_v18  ;;  %v2293_v26 = vmul.f32 -1.442695, %v2069_v34 }
 0x2a3   : > { %2375 = vpow2.f32 %v2292_v37 }
 0x2a4   : > { %2377 = vpow2.f32 %v2293_v26 }
 0x2a9   : > { %v2376_v45 = vpop.eup %2375 }
 0x2aa   : > { %v2378_v30 = vpop.eup %2377  ;;  %v2076_v5 = vadd.f32 1.0, %v2376_v45 }
 0x2ab   : > { %v2077_v47 = vadd.f32 1.0, %v2378_v30 }
 0x2ac   : > { %2379 = vrcp.f32 %v2076_v5  ;;  %v2089_v22 = vand.u32 2147483648, %v2076_v5  ;;  %v2087_v7 = vand.u32 2147483647, %v2076_v5  ;;  %vm2083_vm3 = vweird.f32 %v2076_v5 }
 0x2ad   : > { %2381 = vrcp.f32 %v2077_v47  ;;  %v2104_v60 = vand.u32 2147483648, %v2077_v47  ;;  %v2102_v39 = vand.u32 2147483647, %v2077_v47  ;;  %vm2098_vm14 = vweird.f32 %v2077_v47 }
 0x2ae   : > { %v2090_v31 = vor.u32 1.1754944e-38, %v2089_v22  ;;  %vm2088_vm1 = vcmp.eq.f32.partialorder %v2087_v7, 8.507059e+37 }
 0x2af   : > { %v2105_v36 = vor.u32 1.1754944e-38, %v2104_v60  ;;  %vm2103_vm4 = vcmp.eq.f32.partialorder %v2102_v39, 8.507059e+37 }
 0x2b2   : > { %v2380_v48 = vpop.eup %2379 }
 0x2b3   : > { %v2382_v17 = vpop.eup %2381  ;;  %v2079_v12 = vmul.f32 %v2380_v48, %v2076_v5  ;;  %vm2084_vm13 = vweird.f32 %v2380_v48 }
 0x2b4   : > { %v2094_v0 = vmul.f32 %v2382_v17, %v2077_v47  ;;  %vm2099_vm8 = vweird.f32 %v2382_v17  ;;  %vm2085_vm15 = vmor %vm2083_vm3, %vm2084_vm13 }
 0x2b5   : > { %v2080_v49 = vsub.f32 1.0, %v2079_v12  ;;  %vm2100_vm0 = vmor %vm2098_vm14, %vm2099_vm8 }
 0x2b6   : > { %v2095_v27 = vsub.f32 1.0, %v2094_v0 }
 0x2b7   : > { %v2081_v61 = vmul.f32 %v2380_v48, %v2080_v49 }
 0x2b8   : > { %v2096_v28 = vmul.f32 %v2382_v17, %v2095_v27 }
 0x2b9   : > { %v2082_v43 = vadd.f32 %v2380_v48, %v2081_v61 }
 0x2ba   : > { %v2097_v19 = vadd.f32 %v2382_v17, %v2096_v28 }
 0x2bb   : > { %v2086_v21 = vsel %vm2085_vm15, %v2380_v48, %v2082_v43 }
 0x2bc   : > { %v2101_v2 = vsel %vm2100_vm0, %v2382_v17, %v2097_v19  ;;  %v2091_v8 = vsel %vm2088_vm1, %v2090_v31, %v2086_v21 }
 0x2bd   : > { %v2106_v33 = vsel %vm2103_vm4, %v2105_v36, %v2101_v2  ;;  %v2108_v32 = vperm.slane %v2091_v8, 0 }
 0x2be   : > { %v2109_v41 = vperm.slane %v2106_v33, 0 }
 0x2c0   : > { %v2112_v52 = vrot.slane %v2109_v41, 4 }
 0x2c2   : > { %v2113_v56 = vsel %vm4636_vm7, %v2108_v32, %v2112_v52 }
 0x2c3   : > { %v2115_v16 = vmul.f32 %v2113_v56, %v4637_v51 }
 0x2c5   : > { %2116 = vst [vmem:[%s185_s22] sm:$0xff] %v2115_v16 }
 0x2c6 PF: > { %s15_s14 = sadd.s32 1, %s2408_s14  }
 0x2c7   : > { %p12_p7 = scmp.ge.s32.totalorder %s15_s14, 4  }
 0x2c9   :  { %14 = sbr.rel (!%p12_p7) target bundleno = 3 (0x3), region = 67 }
 0x2ce   :  { %2138 = vsyncpa [#allocation4], 1 }
 0x2cf   :  { %2140 = vsyncpa [#allocation4 + $0x1], 1 }

</bundles_post_ra>
